<compile_context>
chip_gen: v5e
topology: v5e:2x2
jax: 0.10.0
libtpu: 0.0.40
codegen_flags: <defaults>
</compile_context>

<pallas_src>
import functools

import jax
import jax.numpy as jnp
from jax.experimental import pallas as pl
from jax.experimental.pallas import tpu as pltpu

LN_EPS = 1e-5


def _time_chunk(T):
    # Largest chunk in (32, 16, 8) that divides T (keeps the sublane dim of the
    # (B, TC, *) blocks a multiple of 8); fall back to a single chunk otherwise.
    for c in (32, 16, 8):
        if T % c == 0:
            return c
    return T


# ----------------- Kernel A: LayerNorm + ReLU6 + input projection -----------------
def _ln_relu6_proj_kernel(x_ref, g_ref, b_ref, wf_ref, bf_ref, wb_ref, bb_ref,
                          of_ref, ob_ref):
    x = x_ref[...].astype(jnp.float32)                             # (RT, D)
    mean = jnp.mean(x, axis=-1, keepdims=True)
    var = jnp.mean(jnp.square(x - mean), axis=-1, keepdims=True)   # biased var (PyTorch LN)
    y = (x - mean) * jax.lax.rsqrt(var + LN_EPS)
    y = y * g_ref[...] + b_ref[...]
    y = jnp.clip(y, 0.0, 6.0)                                      # ReLU6
    yb = y.astype(jnp.bfloat16)                                    # bf16 MXU operands, f32 accum
    of_ref[...] = (jnp.dot(yb, wf_ref[...], preferred_element_type=jnp.float32)
                   + bf_ref[...]).astype(of_ref.dtype)
    ob_ref[...] = (jnp.dot(yb, wb_ref[...], preferred_element_type=jnp.float32)
                   + bb_ref[...]).astype(ob_ref.dtype)


def ln_relu6_input_proj(x, gamma, beta, w_ih_f, b_ih_f, w_ih_b, b_ih_b):
    """Returns xg_f, xg_b of shape (B, T, 3H): relu6(ln(x)) @ W_ih + b_ih per direction."""
    B, T, D = x.shape
    H3 = w_ih_f.shape[1]
    R = B * T
    RT = R if R <= 256 else 256          # 256-row tiles (multiple of 8) for bigger shapes
    x2d = x.reshape(R, D)                # (B,T,D)->(B*T,D) is a free reshape

    row_spec = pl.BlockSpec((RT, D), lambda i: (i, 0))
    const2d = lambda shape: pl.BlockSpec(shape, lambda i: (0, 0))
    out_spec = pl.BlockSpec((RT, H3), lambda i: (i, 0))

    xg_f, xg_b = pl.pallas_call(
        _ln_relu6_proj_kernel,
        out_shape=(jax.ShapeDtypeStruct((R, H3), jnp.float32),
                   jax.ShapeDtypeStruct((R, H3), jnp.float32)),
        grid=(pl.cdiv(R, RT),),
        in_specs=[row_spec,
                  const2d((1, D)), const2d((1, D)),
                  const2d((D, H3)), const2d((1, H3)),
                  const2d((D, H3)), const2d((1, H3))],
        out_specs=(out_spec, out_spec),
        compiler_params=pltpu.CompilerParams(dimension_semantics=("parallel",)),
    )(x2d,
      gamma.reshape(1, D), beta.reshape(1, D),
      w_ih_f.astype(jnp.bfloat16), b_ih_f.reshape(1, H3),
      w_ih_b.astype(jnp.bfloat16), b_ih_b.reshape(1, H3))
    return xg_f.reshape(B, T, H3), xg_b.reshape(B, T, H3)


# ------------------- Kernel B: GRU recurrence (one direction) ---------------------
def _gru_body(xg_ref, whh_ref, bhh_ref, mask_ref, o_ref, h_scr, *, reverse):
    @pl.when(pl.program_id(0) == 0)
    def _init():
        h_scr[...] = jnp.zeros_like(h_scr)

    w = whh_ref[...]                              # (H, 3H) bf16 (resident; index_map constant)
    bhh = bhh_ref[...].astype(jnp.float32)        # (1, 3H)
    h = h_scr[...]                                # (B, H) f32 hidden state (carried)
    H = h.shape[-1]
    TC = xg_ref.shape[1]

    # Static unroll over the chunk; backward direction simply walks the chunk in
    # reverse (its blocks are already delivered in reverse time order by the index_map).
    steps = range(TC - 1, -1, -1) if reverse else range(TC)
    for j in steps:
        xg = xg_ref[:, j, :].astype(jnp.float32)  # (B, 3H): precomputed x@W_ih + b_ih
        hg = jnp.dot(h.astype(jnp.bfloat16), w,
                     preferred_element_type=jnp.float32) + bhh
        # PyTorch gate order r, z, n.
        # NOTE: keep H a multiple of 128 in production so these slices are lane-aligned.
        r = jax.nn.sigmoid(xg[:, 0:H] + hg[:, 0:H])
        z = jax.nn.sigmoid(xg[:, H:2 * H] + hg[:, H:2 * H])
        n = jnp.tanh(xg[:, 2 * H:3 * H] + r * hg[:, 2 * H:3 * H])
        h = (1.0 - z) * n + z * h
        y = h * mask_ref[:, j, :] if mask_ref is not None else h   # fused dropout
        o_ref[:, j, :] = y.astype(o_ref.dtype)
    h_scr[...] = h


def _make_gru_kernel(reverse, use_mask):
    if use_mask:
        def kernel(xg_ref, whh_ref, bhh_ref, mask_ref, o_ref, h_scr):
            _gru_body(xg_ref, whh_ref, bhh_ref, mask_ref, o_ref, h_scr, reverse=reverse)
    else:
        def kernel(xg_ref, whh_ref, bhh_ref, o_ref, h_scr):
            _gru_body(xg_ref, whh_ref, bhh_ref, None, o_ref, h_scr, reverse=reverse)
    return kernel


def gru_direction(xg, w_hh, b_hh, dropout_mask=None, *, reverse, out_dtype):
    """xg: (B, T, 3H) precomputed input gates; returns hidden states (B, T, H)."""
    B, T, H3 = xg.shape
    H = H3 // 3
    TC = _time_chunk(T)
    nT = T // TC
    # Backward direction: deliver time blocks in reverse order via the index_map.
    t_block = (lambda c: (0, nT - 1 - c, 0)) if reverse else (lambda c: (0, c, 0))

    in_specs = [pl.BlockSpec((B, TC, H3), t_block),
                pl.BlockSpec((H, H3), lambda c: (0, 0)),
                pl.BlockSpec((1, H3), lambda c: (0, 0))]
    operands = [xg, w_hh.astype(jnp.bfloat16), b_hh.reshape(1, H3)]
    if dropout_mask is not None:
        in_specs.append(pl.BlockSpec((B, TC, H), t_block))
        operands.append(dropout_mask)

    return pl.pallas_call(
        _make_gru_kernel(reverse, dropout_mask is not None),
        out_shape=jax.ShapeDtypeStruct((B, T, H), out_dtype),
        grid=(nT,),
        in_specs=in_specs,
        out_specs=pl.BlockSpec((B, TC, H), t_block),
        scratch_shapes=[pltpu.VMEM((B, H), jnp.float32)],   # hidden state across chunks
        compiler_params=pltpu.CompilerParams(
            dimension_semantics=("arbitrary",),             # sequential recurrence
            vmem_limit_bytes=64 * 1024 * 1024),
    )(*operands)


# ------------------------------- RNNBlock forward ---------------------------------
@functools.partial(jax.jit, static_argnames=("dropout_p",))
def rnn_block_forward(x, params, key, dropout_p):
    B, T, D = x.shape
    H = params["w_hh_f"].shape[0]

    # LayerNorm + ReLU6 + x@W_ih hoisted out of the recurrence (one big matmul).
    xg_f, xg_b = ln_relu6_input_proj(x, params["ln_gamma"], params["ln_beta"],
                                     params["w_ih_f"], params["b_ih_f"],
                                     params["w_ih_b"], params["b_ih_b"])

    # Dropout (module constructs nn.Dropout fresh in forward -> active, inverted scaling).
    # TODO(synk): generate the mask in-kernel with pltpu.prng_random_bits on real TPU runs;
    # kept host-side (jax.random) so the kernels also lower under interpret/CPU checking
    # where the TPU PRNG primitives are unavailable.  Application is fused into the GRU
    # writeback, so there is no separate dropout pass over the output.
    mask_f = mask_b = None
    if dropout_p > 0.0:
        kf, kb = jax.random.split(key)
        scale = 1.0 / (1.0 - dropout_p)
        mask_f = jax.random.bernoulli(kf, 1.0 - dropout_p, (B, T, H)).astype(jnp.float32) * scale
        mask_b = jax.random.bernoulli(kb, 1.0 - dropout_p, (B, T, H)).astype(jnp.float32) * scale

    out_f = gru_direction(xg_f, params["w_hh_f"], params["b_hh_f"], mask_f,
                          reverse=False, out_dtype=x.dtype)
    out_b = gru_direction(xg_b, params["w_hh_b"], params["b_hh_b"], mask_b,
                          reverse=True, out_dtype=x.dtype)

    # NOTE: with H a multiple of 128 (production sizes) the two directions can write the
    # two lane-halves of a single (B, T, 2H) buffer directly (out_spec column blocks +
    # input_output_aliases) and this concat disappears; at the demo's H=32 such half-lane
    # blocks would violate the TPU lane-tiling constraint, so one concat remains.
    return jnp.concatenate([out_f, out_b], axis=-1)


def init_params(key, input_size, hidden_size):
    D, H = input_size, hidden_size
    ks = jax.random.split(key, 10)
    bound = 1.0 / jnp.sqrt(jnp.float32(H))
    u = lambda k, shape: jax.random.uniform(k, shape, jnp.float32, -bound, bound)
    return {
        "ln_gamma": jax.random.uniform(ks[0], (D,), jnp.float32, 0.9, 1.1),
        "ln_beta": jax.random.uniform(ks[1], (D,), jnp.float32, -0.1, 0.1),
        # stored transposed relative to PyTorch: (D, 3H) and (H, 3H), gate order r,z,n
        "w_ih_f": u(ks[2], (D, 3 * H)),
        "w_hh_f": u(ks[3], (H, 3 * H)),
        "b_ih_f": u(ks[4], (3 * H,)),
        "b_hh_f": u(ks[5], (3 * H,)),
        "w_ih_b": u(ks[6], (D, 3 * H)),
        "w_hh_b": u(ks[7], (H, 3 * H)),
        "b_ih_b": u(ks[8], (3 * H,)),
        "b_hh_b": u(ks[9], (3 * H,)),
    }


if __name__ == "__main__":
    B, T, D, H = 2, 8, 16, 32
    dropout_p = 0.1

    key = jax.random.PRNGKey(0)
    pkey, xkey, dkey = jax.random.split(key, 3)
    params = init_params(pkey, D, H)
    x = jax.random.normal(xkey, (B, T, D), jnp.float32)

    out = rnn_block_forward(x, params, dkey, dropout_p=dropout_p)
    out = jax.block_until_ready(out)
    assert out.shape == (B, T, 2 * H), out.shape
    print("KERNEL_OK")
</pallas_src>

<mosaic_0001>
module attributes {stable_mosaic.version = 11 : i64} {
  func.func @_ln_relu6_proj_kernel(%arg0: i32, %arg1: memref<16x16xf32, #tpu.memory_space<vmem>>, %arg2: memref<1x16xf32, #tpu.memory_space<vmem>>, %arg3: memref<1x16xf32, #tpu.memory_space<vmem>>, %arg4: memref<16x96xbf16, #tpu.memory_space<vmem>>, %arg5: memref<1x96xf32, #tpu.memory_space<vmem>>, %arg6: memref<16x96xbf16, #tpu.memory_space<vmem>>, %arg7: memref<1x96xf32, #tpu.memory_space<vmem>>, %arg8: memref<16x96xf32, #tpu.memory_space<vmem>>, %arg9: memref<16x96xf32, #tpu.memory_space<vmem>>) attributes {dimension_semantics = [#tpu.dimension_semantics<parallel>], iteration_bounds = array<i64: 1>, scalar_prefetch = 0 : i64, scratch_operands = 0 : i64, tpu.core_type = #tpu.core_type<tc>, window_params = [{transform_indices = @transform_0, window_bounds = array<i64: 16, 16>}, {pipeline_mode = #tpu.pipeline_mode<synchronous>, transform_indices = @transform_1, window_bounds = array<i64: 1, 16>}, {pipeline_mode = #tpu.pipeline_mode<synchronous>, transform_indices = @transform_2, window_bounds = array<i64: 1, 16>}, {pipeline_mode = #tpu.pipeline_mode<synchronous>, transform_indices = @transform_3, window_bounds = array<i64: 16, 96>}, {pipeline_mode = #tpu.pipeline_mode<synchronous>, transform_indices = @transform_4, window_bounds = array<i64: 1, 96>}, {pipeline_mode = #tpu.pipeline_mode<synchronous>, transform_indices = @transform_5, window_bounds = array<i64: 16, 96>}, {pipeline_mode = #tpu.pipeline_mode<synchronous>, transform_indices = @transform_6, window_bounds = array<i64: 1, 96>}, {transform_indices = @transform_7, window_bounds = array<i64: 16, 96>}, {transform_indices = @transform_8, window_bounds = array<i64: 16, 96>}]} {
    %c0 = arith.constant 0 : index
    %c0_0 = arith.constant 0 : index
    %0 = vector.load %arg1[%c0, %c0_0] : memref<16x16xf32, #tpu.memory_space<vmem>>, vector<16x16xf32>
    %cst = arith.constant dense<0.000000e+00> : vector<16xf32>
    %1 = vector.multi_reduction <add>, %0, %cst [1] : vector<16x16xf32> to vector<16xf32>
    %2 = vector.shape_cast %1 : vector<16xf32> to vector<16x1xf32>
    %cst_1 = arith.constant 1.600000e+01 : f32
    %3 = vector.broadcast %cst_1 : f32 to vector<16x1xf32>
    %4 = arith.divf %2, %3 : vector<16x1xf32>
    %5 = vector.broadcast %4 : vector<16x1xf32> to vector<16x16xf32>
    %6 = arith.subf %0, %5 : vector<16x16xf32>
    %7 = arith.mulf %6, %6 : vector<16x16xf32>
    %cst_2 = arith.constant dense<0.000000e+00> : vector<16xf32>
    %8 = vector.multi_reduction <add>, %7, %cst_2 [1] : vector<16x16xf32> to vector<16xf32>
    %9 = vector.shape_cast %8 : vector<16xf32> to vector<16x1xf32>
    %cst_3 = arith.constant 1.600000e+01 : f32
    %10 = vector.broadcast %cst_3 : f32 to vector<16x1xf32>
    %11 = arith.divf %9, %10 : vector<16x1xf32>
    %12 = vector.broadcast %4 : vector<16x1xf32> to vector<16x16xf32>
    %13 = arith.subf %0, %12 : vector<16x16xf32>
    %cst_4 = arith.constant 9.99999974E-6 : f32
    %14 = vector.broadcast %cst_4 : f32 to vector<16x1xf32>
    %15 = arith.addf %11, %14 : vector<16x1xf32>
    %16 = math.rsqrt %15 : vector<16x1xf32>
    %17 = vector.broadcast %16 : vector<16x1xf32> to vector<16x16xf32>
    %18 = arith.mulf %13, %17 : vector<16x16xf32>
    %c0_5 = arith.constant 0 : index
    %c0_6 = arith.constant 0 : index
    %19 = vector.load %arg2[%c0_5, %c0_6] : memref<1x16xf32, #tpu.memory_space<vmem>>, vector<1x16xf32>
    %20 = vector.broadcast %19 : vector<1x16xf32> to vector<16x16xf32>
    %21 = arith.mulf %18, %20 : vector<16x16xf32>
    %c0_7 = arith.constant 0 : index
    %c0_8 = arith.constant 0 : index
    %22 = vector.load %arg3[%c0_7, %c0_8] : memref<1x16xf32, #tpu.memory_space<vmem>>, vector<1x16xf32>
    %23 = vector.broadcast %22 : vector<1x16xf32> to vector<16x16xf32>
    %24 = arith.addf %21, %23 : vector<16x16xf32>
    %cst_9 = arith.constant 0.000000e+00 : f32
    %cst_10 = arith.constant 6.000000e+00 : f32
    %25 = vector.broadcast %cst_9 : f32 to vector<16x16xf32>
    %26 = arith.maximumf %25, %24 : vector<16x16xf32>
    %27 = vector.broadcast %cst_10 : f32 to vector<16x16xf32>
    %28 = arith.minimumf %27, %26 : vector<16x16xf32>
    %29 = arith.truncf %28 : vector<16x16xf32> to vector<16x16xbf16>
    %c0_11 = arith.constant 0 : index
    %c0_12 = arith.constant 0 : index
    %30 = vector.load %arg4[%c0_11, %c0_12] : memref<16x96xbf16, #tpu.memory_space<vmem>>, vector<16x96xbf16>
    %cst_13 = arith.constant dense<0.000000e+00> : vector<16x96xf32>
    %31 = tpu.matmul %29, %30, %cst_13 {dimension_numbers = #tpu.dot_dimension_numbers<[1], [0], [0], [1], [0, 0, 1, 1], [], []>} : vector<16x16xbf16>, vector<16x96xbf16>, vector<16x96xf32> -> vector<16x96xf32>
    %c0_14 = arith.constant 0 : index
    %c0_15 = arith.constant 0 : index
    %32 = vector.load %arg5[%c0_14, %c0_15] : memref<1x96xf32, #tpu.memory_space<vmem>>, vector<1x96xf32>
    %33 = vector.broadcast %32 : vector<1x96xf32> to vector<16x96xf32>
    %34 = arith.addf %31, %33 : vector<16x96xf32>
    %c0_16 = arith.constant 0 : index
    %c0_17 = arith.constant 0 : index
    %35 = vector.load %arg8[%c0_16, %c0_17] : memref<16x96xf32, #tpu.memory_space<vmem>>, vector<16x96xf32>
    tpu.vector_store %arg8[%c0_16, %c0_17], %34 {strides = array<i32>} : memref<16x96xf32, #tpu.memory_space<vmem>>, vector<16x96xf32>,
    %c0_18 = arith.constant 0 : index
    %c0_19 = arith.constant 0 : index
    %36 = vector.load %arg6[%c0_18, %c0_19] : memref<16x96xbf16, #tpu.memory_space<vmem>>, vector<16x96xbf16>
    %cst_20 = arith.constant dense<0.000000e+00> : vector<16x96xf32>
    %37 = tpu.matmul %29, %36, %cst_20 {dimension_numbers = #tpu.dot_dimension_numbers<[1], [0], [0], [1], [0, 0, 1, 1], [], []>} : vector<16x16xbf16>, vector<16x96xbf16>, vector<16x96xf32> -> vector<16x96xf32>
    %c0_21 = arith.constant 0 : index
    %c0_22 = arith.constant 0 : index
    %38 = vector.load %arg7[%c0_21, %c0_22] : memref<1x96xf32, #tpu.memory_space<vmem>>, vector<1x96xf32>
    %39 = vector.broadcast %38 : vector<1x96xf32> to vector<16x96xf32>
    %40 = arith.addf %37, %39 : vector<16x96xf32>
    %c0_23 = arith.constant 0 : index
    %c0_24 = arith.constant 0 : index
    %41 = vector.load %arg9[%c0_23, %c0_24] : memref<16x96xf32, #tpu.memory_space<vmem>>, vector<16x96xf32>
    tpu.vector_store %arg9[%c0_23, %c0_24], %40 {strides = array<i32>} : memref<16x96xf32, #tpu.memory_space<vmem>>, vector<16x96xf32>,
    return
  }
  func.func @transform_0(%arg0: i32) -> (i32, i32) {
    %c0_i32 = arith.constant 0 : i32
    %c0_i32_0 = arith.constant 0 : i32
    return %arg0, %c0_i32 : i32, i32
  }
  func.func @transform_1(%arg0: i32) -> (i32, i32) {
    %c0_i32 = arith.constant 0 : i32
    %c0_i32_0 = arith.constant 0 : i32
    %c0_i32_1 = arith.constant 0 : i32
    return %c0_i32, %c0_i32_0 : i32, i32
  }
  func.func @transform_2(%arg0: i32) -> (i32, i32) {
    %c0_i32 = arith.constant 0 : i32
    %c0_i32_0 = arith.constant 0 : i32
    %c0_i32_1 = arith.constant 0 : i32
    return %c0_i32, %c0_i32_0 : i32, i32
  }
  func.func @transform_3(%arg0: i32) -> (i32, i32) {
    %c0_i32 = arith.constant 0 : i32
    %c0_i32_0 = arith.constant 0 : i32
    %c0_i32_1 = arith.constant 0 : i32
    return %c0_i32, %c0_i32_0 : i32, i32
  }
  func.func @transform_4(%arg0: i32) -> (i32, i32) {
    %c0_i32 = arith.constant 0 : i32
    %c0_i32_0 = arith.constant 0 : i32
    %c0_i32_1 = arith.constant 0 : i32
    return %c0_i32, %c0_i32_0 : i32, i32
  }
  func.func @transform_5(%arg0: i32) -> (i32, i32) {
    %c0_i32 = arith.constant 0 : i32
    %c0_i32_0 = arith.constant 0 : i32
    %c0_i32_1 = arith.constant 0 : i32
    return %c0_i32, %c0_i32_0 : i32, i32
  }
  func.func @transform_6(%arg0: i32) -> (i32, i32) {
    %c0_i32 = arith.constant 0 : i32
    %c0_i32_0 = arith.constant 0 : i32
    %c0_i32_1 = arith.constant 0 : i32
    return %c0_i32, %c0_i32_0 : i32, i32
  }
  func.func @transform_7(%arg0: i32) -> (i32, i32) {
    %c0_i32 = arith.constant 0 : i32
    %c0_i32_0 = arith.constant 0 : i32
    return %arg0, %c0_i32 : i32, i32
  }
  func.func @transform_8(%arg0: i32) -> (i32, i32) {
    %c0_i32 = arith.constant 0 : i32
    %c0_i32_0 = arith.constant 0 : i32
    return %arg0, %c0_i32 : i32, i32
  }
}

module attributes {stable_mosaic.version = 11 : i64} {
  func.func @kernel(%arg0: i32, %arg1: memref<2x8x96xf32, #tpu.memory_space<vmem>>, %arg2: memref<32x96xbf16, #tpu.memory_space<vmem>>, %arg3: memref<1x96xf32, #tpu.memory_space<vmem>>, %arg4: memref<2x8x32xf32, #tpu.memory_space<vmem>>, %arg5: memref<2x8x32xf32, #tpu.memory_space<vmem>>, %arg6: memref<2x32xf32, #tpu.memory_space<vmem>>) attributes {dimension_semantics = [#tpu.dimension_semantics<arbitrary>], iteration_bounds = array<i64: 1>, scalar_prefetch = 0 : i64, scratch_operands = 1 : i64, tpu.core_type = #tpu.core_type<tc>, window_params = [{transform_indices = @transform_0, window_bounds = array<i64: 2, 8, 96>}, {pipeline_mode = #tpu.pipeline_mode<synchronous>, transform_indices = @transform_1, window_bounds = array<i64: 32, 96>}, {pipeline_mode = #tpu.pipeline_mode<synchronous>, transform_indices = @transform_2, window_bounds = array<i64: 1, 96>}, {transform_indices = @transform_3, window_bounds = array<i64: 2, 8, 32>}, {transform_indices = @transform_4, window_bounds = array<i64: 2, 8, 32>}]} {
    %c0_i32 = arith.constant 0 : i32
    %0 = arith.cmpi eq, %arg0, %c0_i32 : i32
    %1 = arith.extui %0 : i1 to i32
    %c0_i32_0 = arith.constant 0 : i32
    %2 = arith.cmpi ne, %1, %c0_i32_0 : i32
    scf.if %2 {
      %cst_104 = arith.constant 0.000000e+00 : f32
      %311 = vector.broadcast %cst_104 : f32 to vector<2x32xf32>
      %c0_105 = arith.constant 0 : index
      %c0_106 = arith.constant 0 : index
      %312 = vector.load %arg6[%c0_105, %c0_106] : memref<2x32xf32, #tpu.memory_space<vmem>>, vector<2x32xf32>
      tpu.vector_store %arg6[%c0_105, %c0_106], %311 {strides = array<i32>} : memref<2x32xf32, #tpu.memory_space<vmem>>, vector<2x32xf32>,
    } else {
    }
    %c0 = arith.constant 0 : index
    %c0_1 = arith.constant 0 : index
    %3 = vector.load %arg2[%c0, %c0_1] : memref<32x96xbf16, #tpu.memory_space<vmem>>, vector<32x96xbf16>
    %c0_2 = arith.constant 0 : index
    %c0_3 = arith.constant 0 : index
    %4 = vector.load %arg3[%c0_2, %c0_3] : memref<1x96xf32, #tpu.memory_space<vmem>>, vector<1x96xf32>
    %c0_4 = arith.constant 0 : index
    %c0_5 = arith.constant 0 : index
    %5 = vector.load %arg6[%c0_4, %c0_5] : memref<2x32xf32, #tpu.memory_space<vmem>>, vector<2x32xf32>
    %c0_6 = arith.constant 0 : index
    %c0_7 = arith.constant 0 : index
    %c0_8 = arith.constant 0 : index
    %6 = vector.load %arg1[%c0_6, %c0_7, %c0_8] : memref<2x8x96xf32, #tpu.memory_space<vmem>>, vector<2x1x96xf32>
    %7 = vector.shape_cast %6 : vector<2x1x96xf32> to vector<2x96xf32>
    %8 = arith.truncf %5 : vector<2x32xf32> to vector<2x32xbf16>
    %cst = arith.constant dense<0.000000e+00> : vector<2x96xf32>
    %9 = tpu.matmul %8, %3, %cst {dimension_numbers = #tpu.dot_dimension_numbers<[1], [0], [0], [1], [0, 0, 1, 1], [], []>} : vector<2x32xbf16>, vector<32x96xbf16>, vector<2x96xf32> -> vector<2x96xf32>
    %10 = vector.broadcast %4 : vector<1x96xf32> to vector<2x96xf32>
    %11 = arith.addf %9, %10 : vector<2x96xf32>
    %12 = vector.extract_strided_slice %7 {offsets = [0, 0], sizes = [2, 32], strides = [1, 1]} : vector<2x96xf32> to vector<2x32xf32>
    %13 = vector.extract_strided_slice %11 {offsets = [0, 0], sizes = [2, 32], strides = [1, 1]} : vector<2x96xf32> to vector<2x32xf32>
    %14 = arith.addf %12, %13 : vector<2x32xf32>
    %15 = arith.negf %14 : vector<2x32xf32>
    %16 = math.exp %15 : vector<2x32xf32>
    %cst_9 = arith.constant 1.000000e+00 : f32
    %17 = vector.broadcast %cst_9 : f32 to vector<2x32xf32>
    %18 = arith.addf %17, %16 : vector<2x32xf32>
    %19 = arith.divf %17, %18 : vector<2x32xf32>
    %20 = vector.extract_strided_slice %7 {offsets = [0, 32], sizes = [2, 32], strides = [1, 1]} : vector<2x96xf32> to vector<2x32xf32>
    %21 = vector.extract_strided_slice %11 {offsets = [0, 32], sizes = [2, 32], strides = [1, 1]} : vector<2x96xf32> to vector<2x32xf32>
    %22 = arith.addf %20, %21 : vector<2x32xf32>
    %23 = arith.negf %22 : vector<2x32xf32>
    %24 = math.exp %23 : vector<2x32xf32>
    %cst_10 = arith.constant 1.000000e+00 : f32
    %25 = vector.broadcast %cst_10 : f32 to vector<2x32xf32>
    %26 = arith.addf %25, %24 : vector<2x32xf32>
    %27 = arith.divf %25, %26 : vector<2x32xf32>
    %28 = vector.extract_strided_slice %7 {offsets = [0, 64], sizes = [2, 32], strides = [1, 1]} : vector<2x96xf32> to vector<2x32xf32>
    %29 = vector.extract_strided_slice %11 {offsets = [0, 64], sizes = [2, 32], strides = [1, 1]} : vector<2x96xf32> to vector<2x32xf32>
    %30 = arith.mulf %19, %29 : vector<2x32xf32>
    %31 = arith.addf %28, %30 : vector<2x32xf32>
    %32 = math.tanh %31 : vector<2x32xf32>
    %cst_11 = arith.constant 1.000000e+00 : f32
    %33 = vector.broadcast %cst_11 : f32 to vector<2x32xf32>
    %34 = arith.subf %33, %27 : vector<2x32xf32>
    %35 = arith.mulf %34, %32 : vector<2x32xf32>
    %36 = arith.mulf %27, %5 : vector<2x32xf32>
    %37 = arith.addf %35, %36 : vector<2x32xf32>
    %c0_12 = arith.constant 0 : index
    %c0_13 = arith.constant 0 : index
    %c0_14 = arith.constant 0 : index
    %38 = vector.load %arg4[%c0_12, %c0_13, %c0_14] : memref<2x8x32xf32, #tpu.memory_space<vmem>>, vector<2x1x32xf32>
    %39 = vector.shape_cast %38 : vector<2x1x32xf32> to vector<2x32xf32>
    %40 = arith.mulf %37, %39 : vector<2x32xf32>
    %c0_15 = arith.constant 0 : index
    %c0_16 = arith.constant 0 : index
    %c0_17 = arith.constant 0 : index
    %41 = vector.load %arg5[%c0_15, %c0_16, %c0_17] : memref<2x8x32xf32, #tpu.memory_space<vmem>>, vector<2x1x32xf32>
    %42 = vector.shape_cast %41 : vector<2x1x32xf32> to vector<2x32xf32>
    %43 = vector.shape_cast %40 : vector<2x32xf32> to vector<2x1x32xf32>
    tpu.vector_store %arg5[%c0_15, %c0_16, %c0_17], %43 {strides = array<i32>} : memref<2x8x32xf32, #tpu.memory_space<vmem>>, vector<2x1x32xf32>,
    %c0_18 = arith.constant 0 : index
    %c1 = arith.constant 1 : index
    %c0_19 = arith.constant 0 : index
    %44 = vector.load %arg1[%c0_18, %c1, %c0_19] : memref<2x8x96xf32, #tpu.memory_space<vmem>>, vector<2x1x96xf32>
    %45 = vector.shape_cast %44 : vector<2x1x96xf32> to vector<2x96xf32>
    %46 = arith.truncf %37 : vector<2x32xf32> to vector<2x32xbf16>
    %cst_20 = arith.constant dense<0.000000e+00> : vector<2x96xf32>
    %47 = tpu.matmul %46, %3, %cst_20 {dimension_numbers = #tpu.dot_dimension_numbers<[1], [0], [0], [1], [0, 0, 1, 1], [], []>} : vector<2x32xbf16>, vector<32x96xbf16>, vector<2x96xf32> -> vector<2x96xf32>
    %48 = vector.broadcast %4 : vector<1x96xf32> to vector<2x96xf32>
    %49 = arith.addf %47, %48 : vector<2x96xf32>
    %50 = vector.extract_strided_slice %45 {offsets = [0, 0], sizes = [2, 32], strides = [1, 1]} : vector<2x96xf32> to vector<2x32xf32>
    %51 = vector.extract_strided_slice %49 {offsets = [0, 0], sizes = [2, 32], strides = [1, 1]} : vector<2x96xf32> to vector<2x32xf32>
    %52 = arith.addf %50, %51 : vector<2x32xf32>
    %53 = arith.negf %52 : vector<2x32xf32>
    %54 = math.exp %53 : vector<2x32xf32>
    %cst_21 = arith.constant 1.000000e+00 : f32
    %55 = vector.broadcast %cst_21 : f32 to vector<2x32xf32>
    %56 = arith.addf %55, %54 : vector<2x32xf32>
    %57 = arith.divf %55, %56 : vector<2x32xf32>
    %58 = vector.extract_strided_slice %45 {offsets = [0, 32], sizes = [2, 32], strides = [1, 1]} : vector<2x96xf32> to vector<2x32xf32>
    %59 = vector.extract_strided_slice %49 {offsets = [0, 32], sizes = [2, 32], strides = [1, 1]} : vector<2x96xf32> to vector<2x32xf32>
    %60 = arith.addf %58, %59 : vector<2x32xf32>
    %61 = arith.negf %60 : vector<2x32xf32>
    %62 = math.exp %61 : vector<2x32xf32>
    %cst_22 = arith.constant 1.000000e+00 : f32
    %63 = vector.broadcast %cst_22 : f32 to vector<2x32xf32>
    %64 = arith.addf %63, %62 : vector<2x32xf32>
    %65 = arith.divf %63, %64 : vector<2x32xf32>
    %66 = vector.extract_strided_slice %45 {offsets = [0, 64], sizes = [2, 32], strides = [1, 1]} : vector<2x96xf32> to vector<2x32xf32>
    %67 = vector.extract_strided_slice %49 {offsets = [0, 64], sizes = [2, 32], strides = [1, 1]} : vector<2x96xf32> to vector<2x32xf32>
    %68 = arith.mulf %57, %67 : vector<2x32xf32>
    %69 = arith.addf %66, %68 : vector<2x32xf32>
    %70 = math.tanh %69 : vector<2x32xf32>
    %cst_23 = arith.constant 1.000000e+00 : f32
    %71 = vector.broadcast %cst_23 : f32 to vector<2x32xf32>
    %72 = arith.subf %71, %65 : vector<2x32xf32>
    %73 = arith.mulf %72, %70 : vector<2x32xf32>
    %74 = arith.mulf %65, %37 : vector<2x32xf32>
    %75 = arith.addf %73, %74 : vector<2x32xf32>
    %c0_24 = arith.constant 0 : index
    %c1_25 = arith.constant 1 : index
    %c0_26 = arith.constant 0 : index
    %76 = vector.load %arg4[%c0_24, %c1_25, %c0_26] : memref<2x8x32xf32, #tpu.memory_space<vmem>>, vector<2x1x32xf32>
    %77 = vector.shape_cast %76 : vector<2x1x32xf32> to vector<2x32xf32>
    %78 = arith.mulf %75, %77 : vector<2x32xf32>
    %c0_27 = arith.constant 0 : index
    %c1_28 = arith.constant 1 : index
    %c0_29 = arith.constant 0 : index
    %79 = vector.load %arg5[%c0_27, %c1_28, %c0_29] : memref<2x8x32xf32, #tpu.memory_space<vmem>>, vector<2x1x32xf32>
    %80 = vector.shape_cast %79 : vector<2x1x32xf32> to vector<2x32xf32>
    %81 = vector.shape_cast %78 : vector<2x32xf32> to vector<2x1x32xf32>
    tpu.vector_store %arg5[%c0_27, %c1_28, %c0_29], %81 {strides = array<i32>} : memref<2x8x32xf32, #tpu.memory_space<vmem>>, vector<2x1x32xf32>,
    %c0_30 = arith.constant 0 : index
    %c2 = arith.constant 2 : index
    %c0_31 = arith.constant 0 : index
    %82 = vector.load %arg1[%c0_30, %c2, %c0_31] : memref<2x8x96xf32, #tpu.memory_space<vmem>>, vector<2x1x96xf32>
    %83 = vector.shape_cast %82 : vector<2x1x96xf32> to vector<2x96xf32>
    %84 = arith.truncf %75 : vector<2x32xf32> to vector<2x32xbf16>
    %cst_32 = arith.constant dense<0.000000e+00> : vector<2x96xf32>
    %85 = tpu.matmul %84, %3, %cst_32 {dimension_numbers = #tpu.dot_dimension_numbers<[1], [0], [0], [1], [0, 0, 1, 1], [], []>} : vector<2x32xbf16>, vector<32x96xbf16>, vector<2x96xf32> -> vector<2x96xf32>
    %86 = vector.broadcast %4 : vector<1x96xf32> to vector<2x96xf32>
    %87 = arith.addf %85, %86 : vector<2x96xf32>
    %88 = vector.extract_strided_slice %83 {offsets = [0, 0], sizes = [2, 32], strides = [1, 1]} : vector<2x96xf32> to vector<2x32xf32>
    %89 = vector.extract_strided_slice %87 {offsets = [0, 0], sizes = [2, 32], strides = [1, 1]} : vector<2x96xf32> to vector<2x32xf32>
    %90 = arith.addf %88, %89 : vector<2x32xf32>
    %91 = arith.negf %90 : vector<2x32xf32>
    %92 = math.exp %91 : vector<2x32xf32>
    %cst_33 = arith.constant 1.000000e+00 : f32
    %93 = vector.broadcast %cst_33 : f32 to vector<2x32xf32>
    %94 = arith.addf %93, %92 : vector<2x32xf32>
    %95 = arith.divf %93, %94 : vector<2x32xf32>
    %96 = vector.extract_strided_slice %83 {offsets = [0, 32], sizes = [2, 32], strides = [1, 1]} : vector<2x96xf32> to vector<2x32xf32>
    %97 = vector.extract_strided_slice %87 {offsets = [0, 32], sizes = [2, 32], strides = [1, 1]} : vector<2x96xf32> to vector<2x32xf32>
    %98 = arith.addf %96, %97 : vector<2x32xf32>
    %99 = arith.negf %98 : vector<2x32xf32>
    %100 = math.exp %99 : vector<2x32xf32>
    %cst_34 = arith.constant 1.000000e+00 : f32
    %101 = vector.broadcast %cst_34 : f32 to vector<2x32xf32>
    %102 = arith.addf %101, %100 : vector<2x32xf32>
    %103 = arith.divf %101, %102 : vector<2x32xf32>
    %104 = vector.extract_strided_slice %83 {offsets = [0, 64], sizes = [2, 32], strides = [1, 1]} : vector<2x96xf32> to vector<2x32xf32>
    %105 = vector.extract_strided_slice %87 {offsets = [0, 64], sizes = [2, 32], strides = [1, 1]} : vector<2x96xf32> to vector<2x32xf32>
    %106 = arith.mulf %95, %105 : vector<2x32xf32>
    %107 = arith.addf %104, %106 : vector<2x32xf32>
    %108 = math.tanh %107 : vector<2x32xf32>
    %cst_35 = arith.constant 1.000000e+00 : f32
    %109 = vector.broadcast %cst_35 : f32 to vector<2x32xf32>
    %110 = arith.subf %109, %103 : vector<2x32xf32>
    %111 = arith.mulf %110, %108 : vector<2x32xf32>
    %112 = arith.mulf %103, %75 : vector<2x32xf32>
    %113 = arith.addf %111, %112 : vector<2x32xf32>
    %c0_36 = arith.constant 0 : index
    %c2_37 = arith.constant 2 : index
    %c0_38 = arith.constant 0 : index
    %114 = vector.load %arg4[%c0_36, %c2_37, %c0_38] : memref<2x8x32xf32, #tpu.memory_space<vmem>>, vector<2x1x32xf32>
    %115 = vector.shape_cast %114 : vector<2x1x32xf32> to vector<2x32xf32>
    %116 = arith.mulf %113, %115 : vector<2x32xf32>
    %c0_39 = arith.constant 0 : index
    %c2_40 = arith.constant 2 : index
    %c0_41 = arith.constant 0 : index
    %117 = vector.load %arg5[%c0_39, %c2_40, %c0_41] : memref<2x8x32xf32, #tpu.memory_space<vmem>>, vector<2x1x32xf32>
    %118 = vector.shape_cast %117 : vector<2x1x32xf32> to vector<2x32xf32>
    %119 = vector.shape_cast %116 : vector<2x32xf32> to vector<2x1x32xf32>
    tpu.vector_store %arg5[%c0_39, %c2_40, %c0_41], %119 {strides = array<i32>} : memref<2x8x32xf32, #tpu.memory_space<vmem>>, vector<2x1x32xf32>,
    %c0_42 = arith.constant 0 : index
    %c3 = arith.constant 3 : index
    %c0_43 = arith.constant 0 : index
    %120 = vector.load %arg1[%c0_42, %c3, %c0_43] : memref<2x8x96xf32, #tpu.memory_space<vmem>>, vector<2x1x96xf32>
    %121 = vector.shape_cast %120 : vector<2x1x96xf32> to vector<2x96xf32>
    %122 = arith.truncf %113 : vector<2x32xf32> to vector<2x32xbf16>
    %cst_44 = arith.constant dense<0.000000e+00> : vector<2x96xf32>
    %123 = tpu.matmul %122, %3, %cst_44 {dimension_numbers = #tpu.dot_dimension_numbers<[1], [0], [0], [1], [0, 0, 1, 1], [], []>} : vector<2x32xbf16>, vector<32x96xbf16>, vector<2x96xf32> -> vector<2x96xf32>
    %124 = vector.broadcast %4 : vector<1x96xf32> to vector<2x96xf32>
    %125 = arith.addf %123, %124 : vector<2x96xf32>
    %126 = vector.extract_strided_slice %121 {offsets = [0, 0], sizes = [2, 32], strides = [1, 1]} : vector<2x96xf32> to vector<2x32xf32>
    %127 = vector.extract_strided_slice %125 {offsets = [0, 0], sizes = [2, 32], strides = [1, 1]} : vector<2x96xf32> to vector<2x32xf32>
    %128 = arith.addf %126, %127 : vector<2x32xf32>
    %129 = arith.negf %128 : vector<2x32xf32>
    %130 = math.exp %129 : vector<2x32xf32>
    %cst_45 = arith.constant 1.000000e+00 : f32
    %131 = vector.broadcast %cst_45 : f32 to vector<2x32xf32>
    %132 = arith.addf %131, %130 : vector<2x32xf32>
    %133 = arith.divf %131, %132 : vector<2x32xf32>
    %134 = vector.extract_strided_slice %121 {offsets = [0, 32], sizes = [2, 32], strides = [1, 1]} : vector<2x96xf32> to vector<2x32xf32>
    %135 = vector.extract_strided_slice %125 {offsets = [0, 32], sizes = [2, 32], strides = [1, 1]} : vector<2x96xf32> to vector<2x32xf32>
    %136 = arith.addf %134, %135 : vector<2x32xf32>
    %137 = arith.negf %136 : vector<2x32xf32>
    %138 = math.exp %137 : vector<2x32xf32>
    %cst_46 = arith.constant 1.000000e+00 : f32
    %139 = vector.broadcast %cst_46 : f32 to vector<2x32xf32>
    %140 = arith.addf %139, %138 : vector<2x32xf32>
    %141 = arith.divf %139, %140 : vector<2x32xf32>
    %142 = vector.extract_strided_slice %121 {offsets = [0, 64], sizes = [2, 32], strides = [1, 1]} : vector<2x96xf32> to vector<2x32xf32>
    %143 = vector.extract_strided_slice %125 {offsets = [0, 64], sizes = [2, 32], strides = [1, 1]} : vector<2x96xf32> to vector<2x32xf32>
    %144 = arith.mulf %133, %143 : vector<2x32xf32>
    %145 = arith.addf %142, %144 : vector<2x32xf32>
    %146 = math.tanh %145 : vector<2x32xf32>
    %cst_47 = arith.constant 1.000000e+00 : f32
    %147 = vector.broadcast %cst_47 : f32 to vector<2x32xf32>
    %148 = arith.subf %147, %141 : vector<2x32xf32>
    %149 = arith.mulf %148, %146 : vector<2x32xf32>
    %150 = arith.mulf %141, %113 : vector<2x32xf32>
    %151 = arith.addf %149, %150 : vector<2x32xf32>
    %c0_48 = arith.constant 0 : index
    %c3_49 = arith.constant 3 : index
    %c0_50 = arith.constant 0 : index
    %152 = vector.load %arg4[%c0_48, %c3_49, %c0_50] : memref<2x8x32xf32, #tpu.memory_space<vmem>>, vector<2x1x32xf32>
    %153 = vector.shape_cast %152 : vector<2x1x32xf32> to vector<2x32xf32>
    %154 = arith.mulf %151, %153 : vector<2x32xf32>
    %c0_51 = arith.constant 0 : index
    %c3_52 = arith.constant 3 : index
    %c0_53 = arith.constant 0 : index
    %155 = vector.load %arg5[%c0_51, %c3_52, %c0_53] : memref<2x8x32xf32, #tpu.memory_space<vmem>>, vector<2x1x32xf32>
    %156 = vector.shape_cast %155 : vector<2x1x32xf32> to vector<2x32xf32>
    %157 = vector.shape_cast %154 : vector<2x32xf32> to vector<2x1x32xf32>
    tpu.vector_store %arg5[%c0_51, %c3_52, %c0_53], %157 {strides = array<i32>} : memref<2x8x32xf32, #tpu.memory_space<vmem>>, vector<2x1x32xf32>,
    %c0_54 = arith.constant 0 : index
    %c4 = arith.constant 4 : index
    %c0_55 = arith.constant 0 : index
    %158 = vector.load %arg1[%c0_54, %c4, %c0_55] : memref<2x8x96xf32, #tpu.memory_space<vmem>>, vector<2x1x96xf32>
    %159 = vector.shape_cast %158 : vector<2x1x96xf32> to vector<2x96xf32>
    %160 = arith.truncf %151 : vector<2x32xf32> to vector<2x32xbf16>
    %cst_56 = arith.constant dense<0.000000e+00> : vector<2x96xf32>
    %161 = tpu.matmul %160, %3, %cst_56 {dimension_numbers = #tpu.dot_dimension_numbers<[1], [0], [0], [1], [0, 0, 1, 1], [], []>} : vector<2x32xbf16>, vector<32x96xbf16>, vector<2x96xf32> -> vector<2x96xf32>
    %162 = vector.broadcast %4 : vector<1x96xf32> to vector<2x96xf32>
    %163 = arith.addf %161, %162 : vector<2x96xf32>
    %164 = vector.extract_strided_slice %159 {offsets = [0, 0], sizes = [2, 32], strides = [1, 1]} : vector<2x96xf32> to vector<2x32xf32>
    %165 = vector.extract_strided_slice %163 {offsets = [0, 0], sizes = [2, 32], strides = [1, 1]} : vector<2x96xf32> to vector<2x32xf32>
    %166 = arith.addf %164, %165 : vector<2x32xf32>
    %167 = arith.negf %166 : vector<2x32xf32>
    %168 = math.exp %167 : vector<2x32xf32>
    %cst_57 = arith.constant 1.000000e+00 : f32
    %169 = vector.broadcast %cst_57 : f32 to vector<2x32xf32>
    %170 = arith.addf %169, %168 : vector<2x32xf32>
    %171 = arith.divf %169, %170 : vector<2x32xf32>
    %172 = vector.extract_strided_slice %159 {offsets = [0, 32], sizes = [2, 32], strides = [1, 1]} : vector<2x96xf32> to vector<2x32xf32>
    %173 = vector.extract_strided_slice %163 {offsets = [0, 32], sizes = [2, 32], strides = [1, 1]} : vector<2x96xf32> to vector<2x32xf32>
    %174 = arith.addf %172, %173 : vector<2x32xf32>
    %175 = arith.negf %174 : vector<2x32xf32>
    %176 = math.exp %175 : vector<2x32xf32>
    %cst_58 = arith.constant 1.000000e+00 : f32
    %177 = vector.broadcast %cst_58 : f32 to vector<2x32xf32>
    %178 = arith.addf %177, %176 : vector<2x32xf32>
    %179 = arith.divf %177, %178 : vector<2x32xf32>
    %180 = vector.extract_strided_slice %159 {offsets = [0, 64], sizes = [2, 32], strides = [1, 1]} : vector<2x96xf32> to vector<2x32xf32>
    %181 = vector.extract_strided_slice %163 {offsets = [0, 64], sizes = [2, 32], strides = [1, 1]} : vector<2x96xf32> to vector<2x32xf32>
    %182 = arith.mulf %171, %181 : vector<2x32xf32>
    %183 = arith.addf %180, %182 : vector<2x32xf32>
    %184 = math.tanh %183 : vector<2x32xf32>
    %cst_59 = arith.constant 1.000000e+00 : f32
    %185 = vector.broadcast %cst_59 : f32 to vector<2x32xf32>
    %186 = arith.subf %185, %179 : vector<2x32xf32>
    %187 = arith.mulf %186, %184 : vector<2x32xf32>
    %188 = arith.mulf %179, %151 : vector<2x32xf32>
    %189 = arith.addf %187, %188 : vector<2x32xf32>
    %c0_60 = arith.constant 0 : index
    %c4_61 = arith.constant 4 : index
    %c0_62 = arith.constant 0 : index
    %190 = vector.load %arg4[%c0_60, %c4_61, %c0_62] : memref<2x8x32xf32, #tpu.memory_space<vmem>>, vector<2x1x32xf32>
    %191 = vector.shape_cast %190 : vector<2x1x32xf32> to vector<2x32xf32>
    %192 = arith.mulf %189, %191 : vector<2x32xf32>
    %c0_63 = arith.constant 0 : index
    %c4_64 = arith.constant 4 : index
    %c0_65 = arith.constant 0 : index
    %193 = vector.load %arg5[%c0_63, %c4_64, %c0_65] : memref<2x8x32xf32, #tpu.memory_space<vmem>>, vector<2x1x32xf32>
    %194 = vector.shape_cast %193 : vector<2x1x32xf32> to vector<2x32xf32>
    %195 = vector.shape_cast %192 : vector<2x32xf32> to vector<2x1x32xf32>
    tpu.vector_store %arg5[%c0_63, %c4_64, %c0_65], %195 {strides = array<i32>} : memref<2x8x32xf32, #tpu.memory_space<vmem>>, vector<2x1x32xf32>,
    %c0_66 = arith.constant 0 : index
    %c5 = arith.constant 5 : index
    %c0_67 = arith.constant 0 : index
    %196 = vector.load %arg1[%c0_66, %c5, %c0_67] : memref<2x8x96xf32, #tpu.memory_space<vmem>>, vector<2x1x96xf32>
    %197 = vector.shape_cast %196 : vector<2x1x96xf32> to vector<2x96xf32>
    %198 = arith.truncf %189 : vector<2x32xf32> to vector<2x32xbf16>
    %cst_68 = arith.constant dense<0.000000e+00> : vector<2x96xf32>
    %199 = tpu.matmul %198, %3, %cst_68 {dimension_numbers = #tpu.dot_dimension_numbers<[1], [0], [0], [1], [0, 0, 1, 1], [], []>} : vector<2x32xbf16>, vector<32x96xbf16>, vector<2x96xf32> -> vector<2x96xf32>
    %200 = vector.broadcast %4 : vector<1x96xf32> to vector<2x96xf32>
    %201 = arith.addf %199, %200 : vector<2x96xf32>
    %202 = vector.extract_strided_slice %197 {offsets = [0, 0], sizes = [2, 32], strides = [1, 1]} : vector<2x96xf32> to vector<2x32xf32>
    %203 = vector.extract_strided_slice %201 {offsets = [0, 0], sizes = [2, 32], strides = [1, 1]} : vector<2x96xf32> to vector<2x32xf32>
    %204 = arith.addf %202, %203 : vector<2x32xf32>
    %205 = arith.negf %204 : vector<2x32xf32>
    %206 = math.exp %205 : vector<2x32xf32>
    %cst_69 = arith.constant 1.000000e+00 : f32
    %207 = vector.broadcast %cst_69 : f32 to vector<2x32xf32>
    %208 = arith.addf %207, %206 : vector<2x32xf32>
    %209 = arith.divf %207, %208 : vector<2x32xf32>
    %210 = vector.extract_strided_slice %197 {offsets = [0, 32], sizes = [2, 32], strides = [1, 1]} : vector<2x96xf32> to vector<2x32xf32>
    %211 = vector.extract_strided_slice %201 {offsets = [0, 32], sizes = [2, 32], strides = [1, 1]} : vector<2x96xf32> to vector<2x32xf32>
    %212 = arith.addf %210, %211 : vector<2x32xf32>
    %213 = arith.negf %212 : vector<2x32xf32>
    %214 = math.exp %213 : vector<2x32xf32>
    %cst_70 = arith.constant 1.000000e+00 : f32
    %215 = vector.broadcast %cst_70 : f32 to vector<2x32xf32>
    %216 = arith.addf %215, %214 : vector<2x32xf32>
    %217 = arith.divf %215, %216 : vector<2x32xf32>
    %218 = vector.extract_strided_slice %197 {offsets = [0, 64], sizes = [2, 32], strides = [1, 1]} : vector<2x96xf32> to vector<2x32xf32>
    %219 = vector.extract_strided_slice %201 {offsets = [0, 64], sizes = [2, 32], strides = [1, 1]} : vector<2x96xf32> to vector<2x32xf32>
    %220 = arith.mulf %209, %219 : vector<2x32xf32>
    %221 = arith.addf %218, %220 : vector<2x32xf32>
    %222 = math.tanh %221 : vector<2x32xf32>
    %cst_71 = arith.constant 1.000000e+00 : f32
    %223 = vector.broadcast %cst_71 : f32 to vector<2x32xf32>
    %224 = arith.subf %223, %217 : vector<2x32xf32>
    %225 = arith.mulf %224, %222 : vector<2x32xf32>
    %226 = arith.mulf %217, %189 : vector<2x32xf32>
    %227 = arith.addf %225, %226 : vector<2x32xf32>
    %c0_72 = arith.constant 0 : index
    %c5_73 = arith.constant 5 : index
    %c0_74 = arith.constant 0 : index
    %228 = vector.load %arg4[%c0_72, %c5_73, %c0_74] : memref<2x8x32xf32, #tpu.memory_space<vmem>>, vector<2x1x32xf32>
    %229 = vector.shape_cast %228 : vector<2x1x32xf32> to vector<2x32xf32>
    %230 = arith.mulf %227, %229 : vector<2x32xf32>
    %c0_75 = arith.constant 0 : index
    %c5_76 = arith.constant 5 : index
    %c0_77 = arith.constant 0 : index
    %231 = vector.load %arg5[%c0_75, %c5_76, %c0_77] : memref<2x8x32xf32, #tpu.memory_space<vmem>>, vector<2x1x32xf32>
    %232 = vector.shape_cast %231 : vector<2x1x32xf32> to vector<2x32xf32>
    %233 = vector.shape_cast %230 : vector<2x32xf32> to vector<2x1x32xf32>
    tpu.vector_store %arg5[%c0_75, %c5_76, %c0_77], %233 {strides = array<i32>} : memref<2x8x32xf32, #tpu.memory_space<vmem>>, vector<2x1x32xf32>,
    %c0_78 = arith.constant 0 : index
    %c6 = arith.constant 6 : index
    %c0_79 = arith.constant 0 : index
    %234 = vector.load %arg1[%c0_78, %c6, %c0_79] : memref<2x8x96xf32, #tpu.memory_space<vmem>>, vector<2x1x96xf32>
    %235 = vector.shape_cast %234 : vector<2x1x96xf32> to vector<2x96xf32>
    %236 = arith.truncf %227 : vector<2x32xf32> to vector<2x32xbf16>
    %cst_80 = arith.constant dense<0.000000e+00> : vector<2x96xf32>
    %237 = tpu.matmul %236, %3, %cst_80 {dimension_numbers = #tpu.dot_dimension_numbers<[1], [0], [0], [1], [0, 0, 1, 1], [], []>} : vector<2x32xbf16>, vector<32x96xbf16>, vector<2x96xf32> -> vector<2x96xf32>
    %238 = vector.broadcast %4 : vector<1x96xf32> to vector<2x96xf32>
    %239 = arith.addf %237, %238 : vector<2x96xf32>
    %240 = vector.extract_strided_slice %235 {offsets = [0, 0], sizes = [2, 32], strides = [1, 1]} : vector<2x96xf32> to vector<2x32xf32>
    %241 = vector.extract_strided_slice %239 {offsets = [0, 0], sizes = [2, 32], strides = [1, 1]} : vector<2x96xf32> to vector<2x32xf32>
    %242 = arith.addf %240, %241 : vector<2x32xf32>
    %243 = arith.negf %242 : vector<2x32xf32>
    %244 = math.exp %243 : vector<2x32xf32>
    %cst_81 = arith.constant 1.000000e+00 : f32
    %245 = vector.broadcast %cst_81 : f32 to vector<2x32xf32>
    %246 = arith.addf %245, %244 : vector<2x32xf32>
    %247 = arith.divf %245, %246 : vector<2x32xf32>
    %248 = vector.extract_strided_slice %235 {offsets = [0, 32], sizes = [2, 32], strides = [1, 1]} : vector<2x96xf32> to vector<2x32xf32>
    %249 = vector.extract_strided_slice %239 {offsets = [0, 32], sizes = [2, 32], strides = [1, 1]} : vector<2x96xf32> to vector<2x32xf32>
    %250 = arith.addf %248, %249 : vector<2x32xf32>
    %251 = arith.negf %250 : vector<2x32xf32>
    %252 = math.exp %251 : vector<2x32xf32>
    %cst_82 = arith.constant 1.000000e+00 : f32
    %253 = vector.broadcast %cst_82 : f32 to vector<2x32xf32>
    %254 = arith.addf %253, %252 : vector<2x32xf32>
    %255 = arith.divf %253, %254 : vector<2x32xf32>
    %256 = vector.extract_strided_slice %235 {offsets = [0, 64], sizes = [2, 32], strides = [1, 1]} : vector<2x96xf32> to vector<2x32xf32>
    %257 = vector.extract_strided_slice %239 {offsets = [0, 64], sizes = [2, 32], strides = [1, 1]} : vector<2x96xf32> to vector<2x32xf32>
    %258 = arith.mulf %247, %257 : vector<2x32xf32>
    %259 = arith.addf %256, %258 : vector<2x32xf32>
    %260 = math.tanh %259 : vector<2x32xf32>
    %cst_83 = arith.constant 1.000000e+00 : f32
    %261 = vector.broadcast %cst_83 : f32 to vector<2x32xf32>
    %262 = arith.subf %261, %255 : vector<2x32xf32>
    %263 = arith.mulf %262, %260 : vector<2x32xf32>
    %264 = arith.mulf %255, %227 : vector<2x32xf32>
    %265 = arith.addf %263, %264 : vector<2x32xf32>
    %c0_84 = arith.constant 0 : index
    %c6_85 = arith.constant 6 : index
    %c0_86 = arith.constant 0 : index
    %266 = vector.load %arg4[%c0_84, %c6_85, %c0_86] : memref<2x8x32xf32, #tpu.memory_space<vmem>>, vector<2x1x32xf32>
    %267 = vector.shape_cast %266 : vector<2x1x32xf32> to vector<2x32xf32>
    %268 = arith.mulf %265, %267 : vector<2x32xf32>
    %c0_87 = arith.constant 0 : index
    %c6_88 = arith.constant 6 : index
    %c0_89 = arith.constant 0 : index
    %269 = vector.load %arg5[%c0_87, %c6_88, %c0_89] : memref<2x8x32xf32, #tpu.memory_space<vmem>>, vector<2x1x32xf32>
    %270 = vector.shape_cast %269 : vector<2x1x32xf32> to vector<2x32xf32>
    %271 = vector.shape_cast %268 : vector<2x32xf32> to vector<2x1x32xf32>
    tpu.vector_store %arg5[%c0_87, %c6_88, %c0_89], %271 {strides = array<i32>} : memref<2x8x32xf32, #tpu.memory_space<vmem>>, vector<2x1x32xf32>,
    %c0_90 = arith.constant 0 : index
    %c7 = arith.constant 7 : index
    %c0_91 = arith.constant 0 : index
    %272 = vector.load %arg1[%c0_90, %c7, %c0_91] : memref<2x8x96xf32, #tpu.memory_space<vmem>>, vector<2x1x96xf32>
    %273 = vector.shape_cast %272 : vector<2x1x96xf32> to vector<2x96xf32>
    %274 = arith.truncf %265 : vector<2x32xf32> to vector<2x32xbf16>
    %cst_92 = arith.constant dense<0.000000e+00> : vector<2x96xf32>
    %275 = tpu.matmul %274, %3, %cst_92 {dimension_numbers = #tpu.dot_dimension_numbers<[1], [0], [0], [1], [0, 0, 1, 1], [], []>} : vector<2x32xbf16>, vector<32x96xbf16>, vector<2x96xf32> -> vector<2x96xf32>
    %276 = vector.broadcast %4 : vector<1x96xf32> to vector<2x96xf32>
    %277 = arith.addf %275, %276 : vector<2x96xf32>
    %278 = vector.extract_strided_slice %273 {offsets = [0, 0], sizes = [2, 32], strides = [1, 1]} : vector<2x96xf32> to vector<2x32xf32>
    %279 = vector.extract_strided_slice %277 {offsets = [0, 0], sizes = [2, 32], strides = [1, 1]} : vector<2x96xf32> to vector<2x32xf32>
    %280 = arith.addf %278, %279 : vector<2x32xf32>
    %281 = arith.negf %280 : vector<2x32xf32>
    %282 = math.exp %281 : vector<2x32xf32>
    %cst_93 = arith.constant 1.000000e+00 : f32
    %283 = vector.broadcast %cst_93 : f32 to vector<2x32xf32>
    %284 = arith.addf %283, %282 : vector<2x32xf32>
    %285 = arith.divf %283, %284 : vector<2x32xf32>
    %286 = vector.extract_strided_slice %273 {offsets = [0, 32], sizes = [2, 32], strides = [1, 1]} : vector<2x96xf32> to vector<2x32xf32>
    %287 = vector.extract_strided_slice %277 {offsets = [0, 32], sizes = [2, 32], strides = [1, 1]} : vector<2x96xf32> to vector<2x32xf32>
    %288 = arith.addf %286, %287 : vector<2x32xf32>
    %289 = arith.negf %288 : vector<2x32xf32>
    %290 = math.exp %289 : vector<2x32xf32>
    %cst_94 = arith.constant 1.000000e+00 : f32
    %291 = vector.broadcast %cst_94 : f32 to vector<2x32xf32>
    %292 = arith.addf %291, %290 : vector<2x32xf32>
    %293 = arith.divf %291, %292 : vector<2x32xf32>
    %294 = vector.extract_strided_slice %273 {offsets = [0, 64], sizes = [2, 32], strides = [1, 1]} : vector<2x96xf32> to vector<2x32xf32>
    %295 = vector.extract_strided_slice %277 {offsets = [0, 64], sizes = [2, 32], strides = [1, 1]} : vector<2x96xf32> to vector<2x32xf32>
    %296 = arith.mulf %285, %295 : vector<2x32xf32>
    %297 = arith.addf %294, %296 : vector<2x32xf32>
    %298 = math.tanh %297 : vector<2x32xf32>
    %cst_95 = arith.constant 1.000000e+00 : f32
    %299 = vector.broadcast %cst_95 : f32 to vector<2x32xf32>
    %300 = arith.subf %299, %293 : vector<2x32xf32>
    %301 = arith.mulf %300, %298 : vector<2x32xf32>
    %302 = arith.mulf %293, %265 : vector<2x32xf32>
    %303 = arith.addf %301, %302 : vector<2x32xf32>
    %c0_96 = arith.constant 0 : index
    %c7_97 = arith.constant 7 : index
    %c0_98 = arith.constant 0 : index
    %304 = vector.load %arg4[%c0_96, %c7_97, %c0_98] : memref<2x8x32xf32, #tpu.memory_space<vmem>>, vector<2x1x32xf32>
    %305 = vector.shape_cast %304 : vector<2x1x32xf32> to vector<2x32xf32>
    %306 = arith.mulf %303, %305 : vector<2x32xf32>
    %c0_99 = arith.constant 0 : index
    %c7_100 = arith.constant 7 : index
    %c0_101 = arith.constant 0 : index
    %307 = vector.load %arg5[%c0_99, %c7_100, %c0_101] : memref<2x8x32xf32, #tpu.memory_space<vmem>>, vector<2x1x32xf32>
    %308 = vector.shape_cast %307 : vector<2x1x32xf32> to vector<2x32xf32>
    %309 = vector.shape_cast %306 : vector<2x32xf32> to vector<2x1x32xf32>
    tpu.vector_store %arg5[%c0_99, %c7_100, %c0_101], %309 {strides = array<i32>} : memref<2x8x32xf32, #tpu.memory_space<vmem>>, vector<2x1x32xf32>,
    %c0_102 = arith.constant 0 : index
    %c0_103 = arith.constant 0 : index
    %310 = vector.load %arg6[%c0_102, %c0_103] : memref<2x32xf32, #tpu.memory_space<vmem>>, vector<2x32xf32>
    tpu.vector_store %arg6[%c0_102, %c0_103], %303 {strides = array<i32>} : memref<2x32xf32, #tpu.memory_space<vmem>>, vector<2x32xf32>,
    return
  }
  func.func @transform_0(%arg0: i32) -> (i32, i32, i32) {
    %c0_i32 = arith.constant 0 : i32
    %c0_i32_0 = arith.constant 0 : i32
    %c0_i32_1 = arith.constant 0 : i32
    return %c0_i32, %arg0, %c0_i32_0 : i32, i32, i32
  }
  func.func @transform_1(%arg0: i32) -> (i32, i32) {
    %c0_i32 = arith.constant 0 : i32
    %c0_i32_0 = arith.constant 0 : i32
    %c0_i32_1 = arith.constant 0 : i32
    return %c0_i32, %c0_i32_0 : i32, i32
  }
  func.func @transform_2(%arg0: i32) -> (i32, i32) {
    %c0_i32 = arith.constant 0 : i32
    %c0_i32_0 = arith.constant 0 : i32
    %c0_i32_1 = arith.constant 0 : i32
    return %c0_i32, %c0_i32_0 : i32, i32
  }
  func.func @transform_3(%arg0: i32) -> (i32, i32, i32) {
    %c0_i32 = arith.constant 0 : i32
    %c0_i32_0 = arith.constant 0 : i32
    %c0_i32_1 = arith.constant 0 : i32
    return %c0_i32, %arg0, %c0_i32_0 : i32, i32, i32
  }
  func.func @transform_4(%arg0: i32) -> (i32, i32, i32) {
    %c0_i32 = arith.constant 0 : i32
    %c0_i32_0 = arith.constant 0 : i32
    %c0_i32_1 = arith.constant 0 : i32
    return %c0_i32, %arg0, %c0_i32_0 : i32, i32, i32
  }
}

module attributes {stable_mosaic.version = 11 : i64} {
  func.func @kernel(%arg0: i32, %arg1: memref<2x8x96xf32, #tpu.memory_space<vmem>>, %arg2: memref<32x96xbf16, #tpu.memory_space<vmem>>, %arg3: memref<1x96xf32, #tpu.memory_space<vmem>>, %arg4: memref<2x8x32xf32, #tpu.memory_space<vmem>>, %arg5: memref<2x8x32xf32, #tpu.memory_space<vmem>>, %arg6: memref<2x32xf32, #tpu.memory_space<vmem>>) attributes {dimension_semantics = [#tpu.dimension_semantics<arbitrary>], iteration_bounds = array<i64: 1>, scalar_prefetch = 0 : i64, scratch_operands = 1 : i64, tpu.core_type = #tpu.core_type<tc>, window_params = [{transform_indices = @transform_0, window_bounds = array<i64: 2, 8, 96>}, {pipeline_mode = #tpu.pipeline_mode<synchronous>, transform_indices = @transform_1, window_bounds = array<i64: 32, 96>}, {pipeline_mode = #tpu.pipeline_mode<synchronous>, transform_indices = @transform_2, window_bounds = array<i64: 1, 96>}, {transform_indices = @transform_3, window_bounds = array<i64: 2, 8, 32>}, {transform_indices = @transform_4, window_bounds = array<i64: 2, 8, 32>}]} {
    %c0_i32 = arith.constant 0 : i32
    %0 = arith.cmpi eq, %arg0, %c0_i32 : i32
    %1 = arith.extui %0 : i1 to i32
    %c0_i32_0 = arith.constant 0 : i32
    %2 = arith.cmpi ne, %1, %c0_i32_0 : i32
    scf.if %2 {
      %cst_104 = arith.constant 0.000000e+00 : f32
      %311 = vector.broadcast %cst_104 : f32 to vector<2x32xf32>
      %c0_105 = arith.constant 0 : index
      %c0_106 = arith.constant 0 : index
      %312 = vector.load %arg6[%c0_105, %c0_106] : memref<2x32xf32, #tpu.memory_space<vmem>>, vector<2x32xf32>
      tpu.vector_store %arg6[%c0_105, %c0_106], %311 {strides = array<i32>} : memref<2x32xf32, #tpu.memory_space<vmem>>, vector<2x32xf32>,
    } else {
    }
    %c0 = arith.constant 0 : index
    %c0_1 = arith.constant 0 : index
    %3 = vector.load %arg2[%c0, %c0_1] : memref<32x96xbf16, #tpu.memory_space<vmem>>, vector<32x96xbf16>
    %c0_2 = arith.constant 0 : index
    %c0_3 = arith.constant 0 : index
    %4 = vector.load %arg3[%c0_2, %c0_3] : memref<1x96xf32, #tpu.memory_space<vmem>>, vector<1x96xf32>
    %c0_4 = arith.constant 0 : index
    %c0_5 = arith.constant 0 : index
    %5 = vector.load %arg6[%c0_4, %c0_5] : memref<2x32xf32, #tpu.memory_space<vmem>>, vector<2x32xf32>
    %c0_6 = arith.constant 0 : index
    %c7 = arith.constant 7 : index
    %c0_7 = arith.constant 0 : index
    %6 = vector.load %arg1[%c0_6, %c7, %c0_7] : memref<2x8x96xf32, #tpu.memory_space<vmem>>, vector<2x1x96xf32>
    %7 = vector.shape_cast %6 : vector<2x1x96xf32> to vector<2x96xf32>
    %8 = arith.truncf %5 : vector<2x32xf32> to vector<2x32xbf16>
    %cst = arith.constant dense<0.000000e+00> : vector<2x96xf32>
    %9 = tpu.matmul %8, %3, %cst {dimension_numbers = #tpu.dot_dimension_numbers<[1], [0], [0], [1], [0, 0, 1, 1], [], []>} : vector<2x32xbf16>, vector<32x96xbf16>, vector<2x96xf32> -> vector<2x96xf32>
    %10 = vector.broadcast %4 : vector<1x96xf32> to vector<2x96xf32>
    %11 = arith.addf %9, %10 : vector<2x96xf32>
    %12 = vector.extract_strided_slice %7 {offsets = [0, 0], sizes = [2, 32], strides = [1, 1]} : vector<2x96xf32> to vector<2x32xf32>
    %13 = vector.extract_strided_slice %11 {offsets = [0, 0], sizes = [2, 32], strides = [1, 1]} : vector<2x96xf32> to vector<2x32xf32>
    %14 = arith.addf %12, %13 : vector<2x32xf32>
    %15 = arith.negf %14 : vector<2x32xf32>
    %16 = math.exp %15 : vector<2x32xf32>
    %cst_8 = arith.constant 1.000000e+00 : f32
    %17 = vector.broadcast %cst_8 : f32 to vector<2x32xf32>
    %18 = arith.addf %17, %16 : vector<2x32xf32>
    %19 = arith.divf %17, %18 : vector<2x32xf32>
    %20 = vector.extract_strided_slice %7 {offsets = [0, 32], sizes = [2, 32], strides = [1, 1]} : vector<2x96xf32> to vector<2x32xf32>
    %21 = vector.extract_strided_slice %11 {offsets = [0, 32], sizes = [2, 32], strides = [1, 1]} : vector<2x96xf32> to vector<2x32xf32>
    %22 = arith.addf %20, %21 : vector<2x32xf32>
    %23 = arith.negf %22 : vector<2x32xf32>
    %24 = math.exp %23 : vector<2x32xf32>
    %cst_9 = arith.constant 1.000000e+00 : f32
    %25 = vector.broadcast %cst_9 : f32 to vector<2x32xf32>
    %26 = arith.addf %25, %24 : vector<2x32xf32>
    %27 = arith.divf %25, %26 : vector<2x32xf32>
    %28 = vector.extract_strided_slice %7 {offsets = [0, 64], sizes = [2, 32], strides = [1, 1]} : vector<2x96xf32> to vector<2x32xf32>
    %29 = vector.extract_strided_slice %11 {offsets = [0, 64], sizes = [2, 32], strides = [1, 1]} : vector<2x96xf32> to vector<2x32xf32>
    %30 = arith.mulf %19, %29 : vector<2x32xf32>
    %31 = arith.addf %28, %30 : vector<2x32xf32>
    %32 = math.tanh %31 : vector<2x32xf32>
    %cst_10 = arith.constant 1.000000e+00 : f32
    %33 = vector.broadcast %cst_10 : f32 to vector<2x32xf32>
    %34 = arith.subf %33, %27 : vector<2x32xf32>
    %35 = arith.mulf %34, %32 : vector<2x32xf32>
    %36 = arith.mulf %27, %5 : vector<2x32xf32>
    %37 = arith.addf %35, %36 : vector<2x32xf32>
    %c0_11 = arith.constant 0 : index
    %c7_12 = arith.constant 7 : index
    %c0_13 = arith.constant 0 : index
    %38 = vector.load %arg4[%c0_11, %c7_12, %c0_13] : memref<2x8x32xf32, #tpu.memory_space<vmem>>, vector<2x1x32xf32>
    %39 = vector.shape_cast %38 : vector<2x1x32xf32> to vector<2x32xf32>
    %40 = arith.mulf %37, %39 : vector<2x32xf32>
    %c0_14 = arith.constant 0 : index
    %c7_15 = arith.constant 7 : index
    %c0_16 = arith.constant 0 : index
    %41 = vector.load %arg5[%c0_14, %c7_15, %c0_16] : memref<2x8x32xf32, #tpu.memory_space<vmem>>, vector<2x1x32xf32>
    %42 = vector.shape_cast %41 : vector<2x1x32xf32> to vector<2x32xf32>
    %43 = vector.shape_cast %40 : vector<2x32xf32> to vector<2x1x32xf32>
    tpu.vector_store %arg5[%c0_14, %c7_15, %c0_16], %43 {strides = array<i32>} : memref<2x8x32xf32, #tpu.memory_space<vmem>>, vector<2x1x32xf32>,
    %c0_17 = arith.constant 0 : index
    %c6 = arith.constant 6 : index
    %c0_18 = arith.constant 0 : index
    %44 = vector.load %arg1[%c0_17, %c6, %c0_18] : memref<2x8x96xf32, #tpu.memory_space<vmem>>, vector<2x1x96xf32>
    %45 = vector.shape_cast %44 : vector<2x1x96xf32> to vector<2x96xf32>
    %46 = arith.truncf %37 : vector<2x32xf32> to vector<2x32xbf16>
    %cst_19 = arith.constant dense<0.000000e+00> : vector<2x96xf32>
    %47 = tpu.matmul %46, %3, %cst_19 {dimension_numbers = #tpu.dot_dimension_numbers<[1], [0], [0], [1], [0, 0, 1, 1], [], []>} : vector<2x32xbf16>, vector<32x96xbf16>, vector<2x96xf32> -> vector<2x96xf32>
    %48 = vector.broadcast %4 : vector<1x96xf32> to vector<2x96xf32>
    %49 = arith.addf %47, %48 : vector<2x96xf32>
    %50 = vector.extract_strided_slice %45 {offsets = [0, 0], sizes = [2, 32], strides = [1, 1]} : vector<2x96xf32> to vector<2x32xf32>
    %51 = vector.extract_strided_slice %49 {offsets = [0, 0], sizes = [2, 32], strides = [1, 1]} : vector<2x96xf32> to vector<2x32xf32>
    %52 = arith.addf %50, %51 : vector<2x32xf32>
    %53 = arith.negf %52 : vector<2x32xf32>
    %54 = math.exp %53 : vector<2x32xf32>
    %cst_20 = arith.constant 1.000000e+00 : f32
    %55 = vector.broadcast %cst_20 : f32 to vector<2x32xf32>
    %56 = arith.addf %55, %54 : vector<2x32xf32>
    %57 = arith.divf %55, %56 : vector<2x32xf32>
    %58 = vector.extract_strided_slice %45 {offsets = [0, 32], sizes = [2, 32], strides = [1, 1]} : vector<2x96xf32> to vector<2x32xf32>
    %59 = vector.extract_strided_slice %49 {offsets = [0, 32], sizes = [2, 32], strides = [1, 1]} : vector<2x96xf32> to vector<2x32xf32>
    %60 = arith.addf %58, %59 : vector<2x32xf32>
    %61 = arith.negf %60 : vector<2x32xf32>
    %62 = math.exp %61 : vector<2x32xf32>
    %cst_21 = arith.constant 1.000000e+00 : f32
    %63 = vector.broadcast %cst_21 : f32 to vector<2x32xf32>
    %64 = arith.addf %63, %62 : vector<2x32xf32>
    %65 = arith.divf %63, %64 : vector<2x32xf32>
    %66 = vector.extract_strided_slice %45 {offsets = [0, 64], sizes = [2, 32], strides = [1, 1]} : vector<2x96xf32> to vector<2x32xf32>
    %67 = vector.extract_strided_slice %49 {offsets = [0, 64], sizes = [2, 32], strides = [1, 1]} : vector<2x96xf32> to vector<2x32xf32>
    %68 = arith.mulf %57, %67 : vector<2x32xf32>
    %69 = arith.addf %66, %68 : vector<2x32xf32>
    %70 = math.tanh %69 : vector<2x32xf32>
    %cst_22 = arith.constant 1.000000e+00 : f32
    %71 = vector.broadcast %cst_22 : f32 to vector<2x32xf32>
    %72 = arith.subf %71, %65 : vector<2x32xf32>
    %73 = arith.mulf %72, %70 : vector<2x32xf32>
    %74 = arith.mulf %65, %37 : vector<2x32xf32>
    %75 = arith.addf %73, %74 : vector<2x32xf32>
    %c0_23 = arith.constant 0 : index
    %c6_24 = arith.constant 6 : index
    %c0_25 = arith.constant 0 : index
    %76 = vector.load %arg4[%c0_23, %c6_24, %c0_25] : memref<2x8x32xf32, #tpu.memory_space<vmem>>, vector<2x1x32xf32>
    %77 = vector.shape_cast %76 : vector<2x1x32xf32> to vector<2x32xf32>
    %78 = arith.mulf %75, %77 : vector<2x32xf32>
    %c0_26 = arith.constant 0 : index
    %c6_27 = arith.constant 6 : index
    %c0_28 = arith.constant 0 : index
    %79 = vector.load %arg5[%c0_26, %c6_27, %c0_28] : memref<2x8x32xf32, #tpu.memory_space<vmem>>, vector<2x1x32xf32>
    %80 = vector.shape_cast %79 : vector<2x1x32xf32> to vector<2x32xf32>
    %81 = vector.shape_cast %78 : vector<2x32xf32> to vector<2x1x32xf32>
    tpu.vector_store %arg5[%c0_26, %c6_27, %c0_28], %81 {strides = array<i32>} : memref<2x8x32xf32, #tpu.memory_space<vmem>>, vector<2x1x32xf32>,
    %c0_29 = arith.constant 0 : index
    %c5 = arith.constant 5 : index
    %c0_30 = arith.constant 0 : index
    %82 = vector.load %arg1[%c0_29, %c5, %c0_30] : memref<2x8x96xf32, #tpu.memory_space<vmem>>, vector<2x1x96xf32>
    %83 = vector.shape_cast %82 : vector<2x1x96xf32> to vector<2x96xf32>
    %84 = arith.truncf %75 : vector<2x32xf32> to vector<2x32xbf16>
    %cst_31 = arith.constant dense<0.000000e+00> : vector<2x96xf32>
    %85 = tpu.matmul %84, %3, %cst_31 {dimension_numbers = #tpu.dot_dimension_numbers<[1], [0], [0], [1], [0, 0, 1, 1], [], []>} : vector<2x32xbf16>, vector<32x96xbf16>, vector<2x96xf32> -> vector<2x96xf32>
    %86 = vector.broadcast %4 : vector<1x96xf32> to vector<2x96xf32>
    %87 = arith.addf %85, %86 : vector<2x96xf32>
    %88 = vector.extract_strided_slice %83 {offsets = [0, 0], sizes = [2, 32], strides = [1, 1]} : vector<2x96xf32> to vector<2x32xf32>
    %89 = vector.extract_strided_slice %87 {offsets = [0, 0], sizes = [2, 32], strides = [1, 1]} : vector<2x96xf32> to vector<2x32xf32>
    %90 = arith.addf %88, %89 : vector<2x32xf32>
    %91 = arith.negf %90 : vector<2x32xf32>
    %92 = math.exp %91 : vector<2x32xf32>
    %cst_32 = arith.constant 1.000000e+00 : f32
    %93 = vector.broadcast %cst_32 : f32 to vector<2x32xf32>
    %94 = arith.addf %93, %92 : vector<2x32xf32>
    %95 = arith.divf %93, %94 : vector<2x32xf32>
    %96 = vector.extract_strided_slice %83 {offsets = [0, 32], sizes = [2, 32], strides = [1, 1]} : vector<2x96xf32> to vector<2x32xf32>
    %97 = vector.extract_strided_slice %87 {offsets = [0, 32], sizes = [2, 32], strides = [1, 1]} : vector<2x96xf32> to vector<2x32xf32>
    %98 = arith.addf %96, %97 : vector<2x32xf32>
    %99 = arith.negf %98 : vector<2x32xf32>
    %100 = math.exp %99 : vector<2x32xf32>
    %cst_33 = arith.constant 1.000000e+00 : f32
    %101 = vector.broadcast %cst_33 : f32 to vector<2x32xf32>
    %102 = arith.addf %101, %100 : vector<2x32xf32>
    %103 = arith.divf %101, %102 : vector<2x32xf32>
    %104 = vector.extract_strided_slice %83 {offsets = [0, 64], sizes = [2, 32], strides = [1, 1]} : vector<2x96xf32> to vector<2x32xf32>
    %105 = vector.extract_strided_slice %87 {offsets = [0, 64], sizes = [2, 32], strides = [1, 1]} : vector<2x96xf32> to vector<2x32xf32>
    %106 = arith.mulf %95, %105 : vector<2x32xf32>
    %107 = arith.addf %104, %106 : vector<2x32xf32>
    %108 = math.tanh %107 : vector<2x32xf32>
    %cst_34 = arith.constant 1.000000e+00 : f32
    %109 = vector.broadcast %cst_34 : f32 to vector<2x32xf32>
    %110 = arith.subf %109, %103 : vector<2x32xf32>
    %111 = arith.mulf %110, %108 : vector<2x32xf32>
    %112 = arith.mulf %103, %75 : vector<2x32xf32>
    %113 = arith.addf %111, %112 : vector<2x32xf32>
    %c0_35 = arith.constant 0 : index
    %c5_36 = arith.constant 5 : index
    %c0_37 = arith.constant 0 : index
    %114 = vector.load %arg4[%c0_35, %c5_36, %c0_37] : memref<2x8x32xf32, #tpu.memory_space<vmem>>, vector<2x1x32xf32>
    %115 = vector.shape_cast %114 : vector<2x1x32xf32> to vector<2x32xf32>
    %116 = arith.mulf %113, %115 : vector<2x32xf32>
    %c0_38 = arith.constant 0 : index
    %c5_39 = arith.constant 5 : index
    %c0_40 = arith.constant 0 : index
    %117 = vector.load %arg5[%c0_38, %c5_39, %c0_40] : memref<2x8x32xf32, #tpu.memory_space<vmem>>, vector<2x1x32xf32>
    %118 = vector.shape_cast %117 : vector<2x1x32xf32> to vector<2x32xf32>
    %119 = vector.shape_cast %116 : vector<2x32xf32> to vector<2x1x32xf32>
    tpu.vector_store %arg5[%c0_38, %c5_39, %c0_40], %119 {strides = array<i32>} : memref<2x8x32xf32, #tpu.memory_space<vmem>>, vector<2x1x32xf32>,
    %c0_41 = arith.constant 0 : index
    %c4 = arith.constant 4 : index
    %c0_42 = arith.constant 0 : index
    %120 = vector.load %arg1[%c0_41, %c4, %c0_42] : memref<2x8x96xf32, #tpu.memory_space<vmem>>, vector<2x1x96xf32>
    %121 = vector.shape_cast %120 : vector<2x1x96xf32> to vector<2x96xf32>
    %122 = arith.truncf %113 : vector<2x32xf32> to vector<2x32xbf16>
    %cst_43 = arith.constant dense<0.000000e+00> : vector<2x96xf32>
    %123 = tpu.matmul %122, %3, %cst_43 {dimension_numbers = #tpu.dot_dimension_numbers<[1], [0], [0], [1], [0, 0, 1, 1], [], []>} : vector<2x32xbf16>, vector<32x96xbf16>, vector<2x96xf32> -> vector<2x96xf32>
    %124 = vector.broadcast %4 : vector<1x96xf32> to vector<2x96xf32>
    %125 = arith.addf %123, %124 : vector<2x96xf32>
    %126 = vector.extract_strided_slice %121 {offsets = [0, 0], sizes = [2, 32], strides = [1, 1]} : vector<2x96xf32> to vector<2x32xf32>
    %127 = vector.extract_strided_slice %125 {offsets = [0, 0], sizes = [2, 32], strides = [1, 1]} : vector<2x96xf32> to vector<2x32xf32>
    %128 = arith.addf %126, %127 : vector<2x32xf32>
    %129 = arith.negf %128 : vector<2x32xf32>
    %130 = math.exp %129 : vector<2x32xf32>
    %cst_44 = arith.constant 1.000000e+00 : f32
    %131 = vector.broadcast %cst_44 : f32 to vector<2x32xf32>
    %132 = arith.addf %131, %130 : vector<2x32xf32>
    %133 = arith.divf %131, %132 : vector<2x32xf32>
    %134 = vector.extract_strided_slice %121 {offsets = [0, 32], sizes = [2, 32], strides = [1, 1]} : vector<2x96xf32> to vector<2x32xf32>
    %135 = vector.extract_strided_slice %125 {offsets = [0, 32], sizes = [2, 32], strides = [1, 1]} : vector<2x96xf32> to vector<2x32xf32>
    %136 = arith.addf %134, %135 : vector<2x32xf32>
    %137 = arith.negf %136 : vector<2x32xf32>
    %138 = math.exp %137 : vector<2x32xf32>
    %cst_45 = arith.constant 1.000000e+00 : f32
    %139 = vector.broadcast %cst_45 : f32 to vector<2x32xf32>
    %140 = arith.addf %139, %138 : vector<2x32xf32>
    %141 = arith.divf %139, %140 : vector<2x32xf32>
    %142 = vector.extract_strided_slice %121 {offsets = [0, 64], sizes = [2, 32], strides = [1, 1]} : vector<2x96xf32> to vector<2x32xf32>
    %143 = vector.extract_strided_slice %125 {offsets = [0, 64], sizes = [2, 32], strides = [1, 1]} : vector<2x96xf32> to vector<2x32xf32>
    %144 = arith.mulf %133, %143 : vector<2x32xf32>
    %145 = arith.addf %142, %144 : vector<2x32xf32>
    %146 = math.tanh %145 : vector<2x32xf32>
    %cst_46 = arith.constant 1.000000e+00 : f32
    %147 = vector.broadcast %cst_46 : f32 to vector<2x32xf32>
    %148 = arith.subf %147, %141 : vector<2x32xf32>
    %149 = arith.mulf %148, %146 : vector<2x32xf32>
    %150 = arith.mulf %141, %113 : vector<2x32xf32>
    %151 = arith.addf %149, %150 : vector<2x32xf32>
    %c0_47 = arith.constant 0 : index
    %c4_48 = arith.constant 4 : index
    %c0_49 = arith.constant 0 : index
    %152 = vector.load %arg4[%c0_47, %c4_48, %c0_49] : memref<2x8x32xf32, #tpu.memory_space<vmem>>, vector<2x1x32xf32>
    %153 = vector.shape_cast %152 : vector<2x1x32xf32> to vector<2x32xf32>
    %154 = arith.mulf %151, %153 : vector<2x32xf32>
    %c0_50 = arith.constant 0 : index
    %c4_51 = arith.constant 4 : index
    %c0_52 = arith.constant 0 : index
    %155 = vector.load %arg5[%c0_50, %c4_51, %c0_52] : memref<2x8x32xf32, #tpu.memory_space<vmem>>, vector<2x1x32xf32>
    %156 = vector.shape_cast %155 : vector<2x1x32xf32> to vector<2x32xf32>
    %157 = vector.shape_cast %154 : vector<2x32xf32> to vector<2x1x32xf32>
    tpu.vector_store %arg5[%c0_50, %c4_51, %c0_52], %157 {strides = array<i32>} : memref<2x8x32xf32, #tpu.memory_space<vmem>>, vector<2x1x32xf32>,
    %c0_53 = arith.constant 0 : index
    %c3 = arith.constant 3 : index
    %c0_54 = arith.constant 0 : index
    %158 = vector.load %arg1[%c0_53, %c3, %c0_54] : memref<2x8x96xf32, #tpu.memory_space<vmem>>, vector<2x1x96xf32>
    %159 = vector.shape_cast %158 : vector<2x1x96xf32> to vector<2x96xf32>
    %160 = arith.truncf %151 : vector<2x32xf32> to vector<2x32xbf16>
    %cst_55 = arith.constant dense<0.000000e+00> : vector<2x96xf32>
    %161 = tpu.matmul %160, %3, %cst_55 {dimension_numbers = #tpu.dot_dimension_numbers<[1], [0], [0], [1], [0, 0, 1, 1], [], []>} : vector<2x32xbf16>, vector<32x96xbf16>, vector<2x96xf32> -> vector<2x96xf32>
    %162 = vector.broadcast %4 : vector<1x96xf32> to vector<2x96xf32>
    %163 = arith.addf %161, %162 : vector<2x96xf32>
    %164 = vector.extract_strided_slice %159 {offsets = [0, 0], sizes = [2, 32], strides = [1, 1]} : vector<2x96xf32> to vector<2x32xf32>
    %165 = vector.extract_strided_slice %163 {offsets = [0, 0], sizes = [2, 32], strides = [1, 1]} : vector<2x96xf32> to vector<2x32xf32>
    %166 = arith.addf %164, %165 : vector<2x32xf32>
    %167 = arith.negf %166 : vector<2x32xf32>
    %168 = math.exp %167 : vector<2x32xf32>
    %cst_56 = arith.constant 1.000000e+00 : f32
    %169 = vector.broadcast %cst_56 : f32 to vector<2x32xf32>
    %170 = arith.addf %169, %168 : vector<2x32xf32>
    %171 = arith.divf %169, %170 : vector<2x32xf32>
    %172 = vector.extract_strided_slice %159 {offsets = [0, 32], sizes = [2, 32], strides = [1, 1]} : vector<2x96xf32> to vector<2x32xf32>
    %173 = vector.extract_strided_slice %163 {offsets = [0, 32], sizes = [2, 32], strides = [1, 1]} : vector<2x96xf32> to vector<2x32xf32>
    %174 = arith.addf %172, %173 : vector<2x32xf32>
    %175 = arith.negf %174 : vector<2x32xf32>
    %176 = math.exp %175 : vector<2x32xf32>
    %cst_57 = arith.constant 1.000000e+00 : f32
    %177 = vector.broadcast %cst_57 : f32 to vector<2x32xf32>
    %178 = arith.addf %177, %176 : vector<2x32xf32>
    %179 = arith.divf %177, %178 : vector<2x32xf32>
    %180 = vector.extract_strided_slice %159 {offsets = [0, 64], sizes = [2, 32], strides = [1, 1]} : vector<2x96xf32> to vector<2x32xf32>
    %181 = vector.extract_strided_slice %163 {offsets = [0, 64], sizes = [2, 32], strides = [1, 1]} : vector<2x96xf32> to vector<2x32xf32>
    %182 = arith.mulf %171, %181 : vector<2x32xf32>
    %183 = arith.addf %180, %182 : vector<2x32xf32>
    %184 = math.tanh %183 : vector<2x32xf32>
    %cst_58 = arith.constant 1.000000e+00 : f32
    %185 = vector.broadcast %cst_58 : f32 to vector<2x32xf32>
    %186 = arith.subf %185, %179 : vector<2x32xf32>
    %187 = arith.mulf %186, %184 : vector<2x32xf32>
    %188 = arith.mulf %179, %151 : vector<2x32xf32>
    %189 = arith.addf %187, %188 : vector<2x32xf32>
    %c0_59 = arith.constant 0 : index
    %c3_60 = arith.constant 3 : index
    %c0_61 = arith.constant 0 : index
    %190 = vector.load %arg4[%c0_59, %c3_60, %c0_61] : memref<2x8x32xf32, #tpu.memory_space<vmem>>, vector<2x1x32xf32>
    %191 = vector.shape_cast %190 : vector<2x1x32xf32> to vector<2x32xf32>
    %192 = arith.mulf %189, %191 : vector<2x32xf32>
    %c0_62 = arith.constant 0 : index
    %c3_63 = arith.constant 3 : index
    %c0_64 = arith.constant 0 : index
    %193 = vector.load %arg5[%c0_62, %c3_63, %c0_64] : memref<2x8x32xf32, #tpu.memory_space<vmem>>, vector<2x1x32xf32>
    %194 = vector.shape_cast %193 : vector<2x1x32xf32> to vector<2x32xf32>
    %195 = vector.shape_cast %192 : vector<2x32xf32> to vector<2x1x32xf32>
    tpu.vector_store %arg5[%c0_62, %c3_63, %c0_64], %195 {strides = array<i32>} : memref<2x8x32xf32, #tpu.memory_space<vmem>>, vector<2x1x32xf32>,
    %c0_65 = arith.constant 0 : index
    %c2 = arith.constant 2 : index
    %c0_66 = arith.constant 0 : index
    %196 = vector.load %arg1[%c0_65, %c2, %c0_66] : memref<2x8x96xf32, #tpu.memory_space<vmem>>, vector<2x1x96xf32>
    %197 = vector.shape_cast %196 : vector<2x1x96xf32> to vector<2x96xf32>
    %198 = arith.truncf %189 : vector<2x32xf32> to vector<2x32xbf16>
    %cst_67 = arith.constant dense<0.000000e+00> : vector<2x96xf32>
    %199 = tpu.matmul %198, %3, %cst_67 {dimension_numbers = #tpu.dot_dimension_numbers<[1], [0], [0], [1], [0, 0, 1, 1], [], []>} : vector<2x32xbf16>, vector<32x96xbf16>, vector<2x96xf32> -> vector<2x96xf32>
    %200 = vector.broadcast %4 : vector<1x96xf32> to vector<2x96xf32>
    %201 = arith.addf %199, %200 : vector<2x96xf32>
    %202 = vector.extract_strided_slice %197 {offsets = [0, 0], sizes = [2, 32], strides = [1, 1]} : vector<2x96xf32> to vector<2x32xf32>
    %203 = vector.extract_strided_slice %201 {offsets = [0, 0], sizes = [2, 32], strides = [1, 1]} : vector<2x96xf32> to vector<2x32xf32>
    %204 = arith.addf %202, %203 : vector<2x32xf32>
    %205 = arith.negf %204 : vector<2x32xf32>
    %206 = math.exp %205 : vector<2x32xf32>
    %cst_68 = arith.constant 1.000000e+00 : f32
    %207 = vector.broadcast %cst_68 : f32 to vector<2x32xf32>
    %208 = arith.addf %207, %206 : vector<2x32xf32>
    %209 = arith.divf %207, %208 : vector<2x32xf32>
    %210 = vector.extract_strided_slice %197 {offsets = [0, 32], sizes = [2, 32], strides = [1, 1]} : vector<2x96xf32> to vector<2x32xf32>
    %211 = vector.extract_strided_slice %201 {offsets = [0, 32], sizes = [2, 32], strides = [1, 1]} : vector<2x96xf32> to vector<2x32xf32>
    %212 = arith.addf %210, %211 : vector<2x32xf32>
    %213 = arith.negf %212 : vector<2x32xf32>
    %214 = math.exp %213 : vector<2x32xf32>
    %cst_69 = arith.constant 1.000000e+00 : f32
    %215 = vector.broadcast %cst_69 : f32 to vector<2x32xf32>
    %216 = arith.addf %215, %214 : vector<2x32xf32>
    %217 = arith.divf %215, %216 : vector<2x32xf32>
    %218 = vector.extract_strided_slice %197 {offsets = [0, 64], sizes = [2, 32], strides = [1, 1]} : vector<2x96xf32> to vector<2x32xf32>
    %219 = vector.extract_strided_slice %201 {offsets = [0, 64], sizes = [2, 32], strides = [1, 1]} : vector<2x96xf32> to vector<2x32xf32>
    %220 = arith.mulf %209, %219 : vector<2x32xf32>
    %221 = arith.addf %218, %220 : vector<2x32xf32>
    %222 = math.tanh %221 : vector<2x32xf32>
    %cst_70 = arith.constant 1.000000e+00 : f32
    %223 = vector.broadcast %cst_70 : f32 to vector<2x32xf32>
    %224 = arith.subf %223, %217 : vector<2x32xf32>
    %225 = arith.mulf %224, %222 : vector<2x32xf32>
    %226 = arith.mulf %217, %189 : vector<2x32xf32>
    %227 = arith.addf %225, %226 : vector<2x32xf32>
    %c0_71 = arith.constant 0 : index
    %c2_72 = arith.constant 2 : index
    %c0_73 = arith.constant 0 : index
    %228 = vector.load %arg4[%c0_71, %c2_72, %c0_73] : memref<2x8x32xf32, #tpu.memory_space<vmem>>, vector<2x1x32xf32>
    %229 = vector.shape_cast %228 : vector<2x1x32xf32> to vector<2x32xf32>
    %230 = arith.mulf %227, %229 : vector<2x32xf32>
    %c0_74 = arith.constant 0 : index
    %c2_75 = arith.constant 2 : index
    %c0_76 = arith.constant 0 : index
    %231 = vector.load %arg5[%c0_74, %c2_75, %c0_76] : memref<2x8x32xf32, #tpu.memory_space<vmem>>, vector<2x1x32xf32>
    %232 = vector.shape_cast %231 : vector<2x1x32xf32> to vector<2x32xf32>
    %233 = vector.shape_cast %230 : vector<2x32xf32> to vector<2x1x32xf32>
    tpu.vector_store %arg5[%c0_74, %c2_75, %c0_76], %233 {strides = array<i32>} : memref<2x8x32xf32, #tpu.memory_space<vmem>>, vector<2x1x32xf32>,
    %c0_77 = arith.constant 0 : index
    %c1 = arith.constant 1 : index
    %c0_78 = arith.constant 0 : index
    %234 = vector.load %arg1[%c0_77, %c1, %c0_78] : memref<2x8x96xf32, #tpu.memory_space<vmem>>, vector<2x1x96xf32>
    %235 = vector.shape_cast %234 : vector<2x1x96xf32> to vector<2x96xf32>
    %236 = arith.truncf %227 : vector<2x32xf32> to vector<2x32xbf16>
    %cst_79 = arith.constant dense<0.000000e+00> : vector<2x96xf32>
    %237 = tpu.matmul %236, %3, %cst_79 {dimension_numbers = #tpu.dot_dimension_numbers<[1], [0], [0], [1], [0, 0, 1, 1], [], []>} : vector<2x32xbf16>, vector<32x96xbf16>, vector<2x96xf32> -> vector<2x96xf32>
    %238 = vector.broadcast %4 : vector<1x96xf32> to vector<2x96xf32>
    %239 = arith.addf %237, %238 : vector<2x96xf32>
    %240 = vector.extract_strided_slice %235 {offsets = [0, 0], sizes = [2, 32], strides = [1, 1]} : vector<2x96xf32> to vector<2x32xf32>
    %241 = vector.extract_strided_slice %239 {offsets = [0, 0], sizes = [2, 32], strides = [1, 1]} : vector<2x96xf32> to vector<2x32xf32>
    %242 = arith.addf %240, %241 : vector<2x32xf32>
    %243 = arith.negf %242 : vector<2x32xf32>
    %244 = math.exp %243 : vector<2x32xf32>
    %cst_80 = arith.constant 1.000000e+00 : f32
    %245 = vector.broadcast %cst_80 : f32 to vector<2x32xf32>
    %246 = arith.addf %245, %244 : vector<2x32xf32>
    %247 = arith.divf %245, %246 : vector<2x32xf32>
    %248 = vector.extract_strided_slice %235 {offsets = [0, 32], sizes = [2, 32], strides = [1, 1]} : vector<2x96xf32> to vector<2x32xf32>
    %249 = vector.extract_strided_slice %239 {offsets = [0, 32], sizes = [2, 32], strides = [1, 1]} : vector<2x96xf32> to vector<2x32xf32>
    %250 = arith.addf %248, %249 : vector<2x32xf32>
    %251 = arith.negf %250 : vector<2x32xf32>
    %252 = math.exp %251 : vector<2x32xf32>
    %cst_81 = arith.constant 1.000000e+00 : f32
    %253 = vector.broadcast %cst_81 : f32 to vector<2x32xf32>
    %254 = arith.addf %253, %252 : vector<2x32xf32>
    %255 = arith.divf %253, %254 : vector<2x32xf32>
    %256 = vector.extract_strided_slice %235 {offsets = [0, 64], sizes = [2, 32], strides = [1, 1]} : vector<2x96xf32> to vector<2x32xf32>
    %257 = vector.extract_strided_slice %239 {offsets = [0, 64], sizes = [2, 32], strides = [1, 1]} : vector<2x96xf32> to vector<2x32xf32>
    %258 = arith.mulf %247, %257 : vector<2x32xf32>
    %259 = arith.addf %256, %258 : vector<2x32xf32>
    %260 = math.tanh %259 : vector<2x32xf32>
    %cst_82 = arith.constant 1.000000e+00 : f32
    %261 = vector.broadcast %cst_82 : f32 to vector<2x32xf32>
    %262 = arith.subf %261, %255 : vector<2x32xf32>
    %263 = arith.mulf %262, %260 : vector<2x32xf32>
    %264 = arith.mulf %255, %227 : vector<2x32xf32>
    %265 = arith.addf %263, %264 : vector<2x32xf32>
    %c0_83 = arith.constant 0 : index
    %c1_84 = arith.constant 1 : index
    %c0_85 = arith.constant 0 : index
    %266 = vector.load %arg4[%c0_83, %c1_84, %c0_85] : memref<2x8x32xf32, #tpu.memory_space<vmem>>, vector<2x1x32xf32>
    %267 = vector.shape_cast %266 : vector<2x1x32xf32> to vector<2x32xf32>
    %268 = arith.mulf %265, %267 : vector<2x32xf32>
    %c0_86 = arith.constant 0 : index
    %c1_87 = arith.constant 1 : index
    %c0_88 = arith.constant 0 : index
    %269 = vector.load %arg5[%c0_86, %c1_87, %c0_88] : memref<2x8x32xf32, #tpu.memory_space<vmem>>, vector<2x1x32xf32>
    %270 = vector.shape_cast %269 : vector<2x1x32xf32> to vector<2x32xf32>
    %271 = vector.shape_cast %268 : vector<2x32xf32> to vector<2x1x32xf32>
    tpu.vector_store %arg5[%c0_86, %c1_87, %c0_88], %271 {strides = array<i32>} : memref<2x8x32xf32, #tpu.memory_space<vmem>>, vector<2x1x32xf32>,
    %c0_89 = arith.constant 0 : index
    %c0_90 = arith.constant 0 : index
    %c0_91 = arith.constant 0 : index
    %272 = vector.load %arg1[%c0_89, %c0_90, %c0_91] : memref<2x8x96xf32, #tpu.memory_space<vmem>>, vector<2x1x96xf32>
    %273 = vector.shape_cast %272 : vector<2x1x96xf32> to vector<2x96xf32>
    %274 = arith.truncf %265 : vector<2x32xf32> to vector<2x32xbf16>
    %cst_92 = arith.constant dense<0.000000e+00> : vector<2x96xf32>
    %275 = tpu.matmul %274, %3, %cst_92 {dimension_numbers = #tpu.dot_dimension_numbers<[1], [0], [0], [1], [0, 0, 1, 1], [], []>} : vector<2x32xbf16>, vector<32x96xbf16>, vector<2x96xf32> -> vector<2x96xf32>
    %276 = vector.broadcast %4 : vector<1x96xf32> to vector<2x96xf32>
    %277 = arith.addf %275, %276 : vector<2x96xf32>
    %278 = vector.extract_strided_slice %273 {offsets = [0, 0], sizes = [2, 32], strides = [1, 1]} : vector<2x96xf32> to vector<2x32xf32>
    %279 = vector.extract_strided_slice %277 {offsets = [0, 0], sizes = [2, 32], strides = [1, 1]} : vector<2x96xf32> to vector<2x32xf32>
    %280 = arith.addf %278, %279 : vector<2x32xf32>
    %281 = arith.negf %280 : vector<2x32xf32>
    %282 = math.exp %281 : vector<2x32xf32>
    %cst_93 = arith.constant 1.000000e+00 : f32
    %283 = vector.broadcast %cst_93 : f32 to vector<2x32xf32>
    %284 = arith.addf %283, %282 : vector<2x32xf32>
    %285 = arith.divf %283, %284 : vector<2x32xf32>
    %286 = vector.extract_strided_slice %273 {offsets = [0, 32], sizes = [2, 32], strides = [1, 1]} : vector<2x96xf32> to vector<2x32xf32>
    %287 = vector.extract_strided_slice %277 {offsets = [0, 32], sizes = [2, 32], strides = [1, 1]} : vector<2x96xf32> to vector<2x32xf32>
    %288 = arith.addf %286, %287 : vector<2x32xf32>
    %289 = arith.negf %288 : vector<2x32xf32>
    %290 = math.exp %289 : vector<2x32xf32>
    %cst_94 = arith.constant 1.000000e+00 : f32
    %291 = vector.broadcast %cst_94 : f32 to vector<2x32xf32>
    %292 = arith.addf %291, %290 : vector<2x32xf32>
    %293 = arith.divf %291, %292 : vector<2x32xf32>
    %294 = vector.extract_strided_slice %273 {offsets = [0, 64], sizes = [2, 32], strides = [1, 1]} : vector<2x96xf32> to vector<2x32xf32>
    %295 = vector.extract_strided_slice %277 {offsets = [0, 64], sizes = [2, 32], strides = [1, 1]} : vector<2x96xf32> to vector<2x32xf32>
    %296 = arith.mulf %285, %295 : vector<2x32xf32>
    %297 = arith.addf %294, %296 : vector<2x32xf32>
    %298 = math.tanh %297 : vector<2x32xf32>
    %cst_95 = arith.constant 1.000000e+00 : f32
    %299 = vector.broadcast %cst_95 : f32 to vector<2x32xf32>
    %300 = arith.subf %299, %293 : vector<2x32xf32>
    %301 = arith.mulf %300, %298 : vector<2x32xf32>
    %302 = arith.mulf %293, %265 : vector<2x32xf32>
    %303 = arith.addf %301, %302 : vector<2x32xf32>
    %c0_96 = arith.constant 0 : index
    %c0_97 = arith.constant 0 : index
    %c0_98 = arith.constant 0 : index
    %304 = vector.load %arg4[%c0_96, %c0_97, %c0_98] : memref<2x8x32xf32, #tpu.memory_space<vmem>>, vector<2x1x32xf32>
    %305 = vector.shape_cast %304 : vector<2x1x32xf32> to vector<2x32xf32>
    %306 = arith.mulf %303, %305 : vector<2x32xf32>
    %c0_99 = arith.constant 0 : index
    %c0_100 = arith.constant 0 : index
    %c0_101 = arith.constant 0 : index
    %307 = vector.load %arg5[%c0_99, %c0_100, %c0_101] : memref<2x8x32xf32, #tpu.memory_space<vmem>>, vector<2x1x32xf32>
    %308 = vector.shape_cast %307 : vector<2x1x32xf32> to vector<2x32xf32>
    %309 = vector.shape_cast %306 : vector<2x32xf32> to vector<2x1x32xf32>
    tpu.vector_store %arg5[%c0_99, %c0_100, %c0_101], %309 {strides = array<i32>} : memref<2x8x32xf32, #tpu.memory_space<vmem>>, vector<2x1x32xf32>,
    %c0_102 = arith.constant 0 : index
    %c0_103 = arith.constant 0 : index
    %310 = vector.load %arg6[%c0_102, %c0_103] : memref<2x32xf32, #tpu.memory_space<vmem>>, vector<2x32xf32>
    tpu.vector_store %arg6[%c0_102, %c0_103], %303 {strides = array<i32>} : memref<2x32xf32, #tpu.memory_space<vmem>>, vector<2x32xf32>,
    return
  }
  func.func @transform_0(%arg0: i32) -> (i32, i32, i32) {
    %c0_i32 = arith.constant 0 : i32
    %0 = arith.subi %c0_i32, %arg0 : i32
    %c0_i32_0 = arith.constant 0 : i32
    %c0_i32_1 = arith.constant 0 : i32
    %c0_i32_2 = arith.constant 0 : i32
    return %c0_i32_0, %0, %c0_i32_1 : i32, i32, i32
  }
  func.func @transform_1(%arg0: i32) -> (i32, i32) {
    %c0_i32 = arith.constant 0 : i32
    %c0_i32_0 = arith.constant 0 : i32
    %c0_i32_1 = arith.constant 0 : i32
    return %c0_i32, %c0_i32_0 : i32, i32
  }
  func.func @transform_2(%arg0: i32) -> (i32, i32) {
    %c0_i32 = arith.constant 0 : i32
    %c0_i32_0 = arith.constant 0 : i32
    %c0_i32_1 = arith.constant 0 : i32
    return %c0_i32, %c0_i32_0 : i32, i32
  }
  func.func @transform_3(%arg0: i32) -> (i32, i32, i32) {
    %c0_i32 = arith.constant 0 : i32
    %0 = arith.subi %c0_i32, %arg0 : i32
    %c0_i32_0 = arith.constant 0 : i32
    %c0_i32_1 = arith.constant 0 : i32
    %c0_i32_2 = arith.constant 0 : i32
    return %c0_i32_0, %0, %c0_i32_1 : i32, i32, i32
  }
  func.func @transform_4(%arg0: i32) -> (i32, i32, i32) {
    %c0_i32 = arith.constant 0 : i32
    %0 = arith.subi %c0_i32, %arg0 : i32
    %c0_i32_0 = arith.constant 0 : i32
    %c0_i32_1 = arith.constant 0 : i32
    %c0_i32_2 = arith.constant 0 : i32
    return %c0_i32_0, %0, %c0_i32_1 : i32, i32, i32
  }
}

</mosaic_0001>

<bundles_post_ra>
// kernel: rnn_block_forward.5
= control target key start
LH: loop header
LB: loop body
LE: loop exit
PB: predicated region body
PF: predicated region fallthrough
CT: control target
= control target key end

     0   :  { %vm31_vm0 = vcmask 130048   ;;  %v191_v4 = vmov 16.0   ;;  %vm129_vm8 = vcmask 785408   ;;  %s279_s0 = inlined_call_operand.vmem [shape: f32[16,16], index: 0, kind: input, shape index: {}]   ;;  %s280_s1 = inlined_call_operand.vmem [shape: f32[1,16], index: 1, kind: input, shape index: {}]   ;;  %s281_s2 = inlined_call_operand.vmem [shape: f32[1,16], index: 2, kind: input, shape index: {}]   ;;  %s282_s4 = inlined_call_operand.vmem [shape: f32[1,96], index: 4, kind: input, shape index: {}]   ;;  %s283_s3 = inlined_call_operand.vmem [shape: bf16[16,96], index: 3, kind: input, shape index: {}]   ;;  %s284_s5 = inlined_call_operand.vmem [shape: bf16[16,96], index: 5, kind: input, shape index: {}]   ;;  %s285_s6 = inlined_call_operand.vmem [shape: f32[1,96], index: 6, kind: input, shape index: {}]   ;;  %s286_s7 = inlined_call_operand.vmem [shape: f32[16,96], index: 7, kind: output, shape index: {0}]   ;;  %s287_s8 = inlined_call_operand.vmem [shape: f32[16,96], index: 8, kind: output, shape index: {1}]  }
   0x1   :  { %v29_v0 = vld [vmem:[%s279_s0] sm:$0xff]  ;;  %v30_v2 = vld [vmem:[%s279_s0 + $0x8] sm:$0xff]  ;;  %185 = vrcp.f32 %v191_v4 }
   0x2   :  { %v32_v1 = vsel %vm31_vm0, %v29_v0, 0.0  ;;  %v35_v3 = vsel %vm31_vm0, %v30_v2, 0.0  ;;  %v178_v21 = vld [vmem:[%s283_s3] sm:$0xff] }
   0x3   :  { %33 = vadd.xlane.f32.xlu0 %v32_v1  ;;  %v179_v22 = vld [vmem:[%s284_s5] sm:$0xff]  ;;  %122 = vmatpush.bf16.msra.mxu0 %v178_v21 }
   0x4   :  { %151 = vmatpush.bf16.msra.mxu1 %v179_v22  ;;  %v181_v40 = vld [vmem:[%s280_s1] ss:$0 sm:$0xff] }
   0x5   :  { %v182_v44 = vld [vmem:[%s281_s2] ss:$0 sm:$0xff] }
   0x6   :  { %v183_v56 = vld [vmem:[%s282_s4] ss:$0 sm:$0xff] }
   0x7   :  { %v186_v5 = vpop.eup %185  ;;  %v184_v57 = vld [vmem:[%s285_s6] ss:$0 sm:$0xff] }
   0x8   :  { %v39_v6 = vmul.f32 16.0, %v186_v5  ;;  %vm43_vm1 = vweird.f32 %v186_v5 }
   0xa   :  { %v40_v7 = vsub.f32 1.0, %v39_v6 }
   0xb   :  { %36 = vadd.xlane.f32.xlu0 %v35_v3 }
   0xc   :  { %v41_v8 = vmul.f32 %v186_v5, %v40_v7 }
   0xe   :  { %v42_v9 = vadd.f32 %v186_v5, %v41_v8 }
  0x10   :  { %v44_v10 = vsel %vm43_vm1, %v186_v5, %v42_v9 }
  0x76   :  { %v34_v11 = vpop.xlane.xlu0 %33 }
  0x77   :  { %v45_v12 = vmul.f32 %v44_v10, %v34_v11 }
  0x79   :  { %v47_v13 = vsub.f32 %v29_v0, %v45_v12 }
  0x7b   :  { %v49_v14 = vmul.f32 %v47_v13, %v47_v13 }
  0x7d   :  { %v51_v15 = vsel %vm31_vm0, %v49_v14, 0.0 }
  0x7e   :  { %52 = vadd.xlane.f32.xlu1 %v51_v15  ;;  %v37_v16 = vpop.xlane.xlu0 %36 }
  0x7f   :  { %v46_v17 = vmul.f32 %v44_v10, %v37_v16 }
  0x81   :  { %v48_v18 = vsub.f32 %v30_v2, %v46_v17 }
  0x83   :  { %v50_v19 = vmul.f32 %v48_v18, %v48_v18 }
  0x85   :  { %v54_v20 = vsel %vm31_vm0, %v50_v19, 0.0 }
  0x86   :  { %55 = vadd.xlane.f32.xlu1 %v54_v20 }
  0xf1   :  { %v53_v23 = vpop.xlane.xlu1 %52 }
  0xf2   :  { %v57_v24 = vmul.f32 %v53_v23, %v44_v10 }
  0xf4   :  { %v59_v25 = vadd.f32 1e-05, %v57_v24 }
  0xf6   :  { %187 = vrsqrt.f32 %v59_v25  ;;  %vm67_vm3 = vweird.f32 %v59_v25 }
  0xf9   :  { %v56_v26 = vpop.xlane.xlu1 %55 }
  0xfa   :  { %v58_v27 = vmul.f32 %v56_v26, %v44_v10 }
  0xfc   :  { %v188_v28 = vpop.eup %187  ;;  %v60_v29 = vadd.f32 1e-05, %v58_v27 }
  0xfd   :  { %v62_v30 = vmul.f32 %v188_v28, %v59_v25  ;;  %vm68_vm2 = vweird.f32 %v188_v28 }
  0xfe   :  { %189 = vrsqrt.f32 %v60_v29  ;;  %vm69_vm4 = vmor %vm67_vm3, %vm68_vm2  ;;  %vm77_vm6 = vweird.f32 %v60_v29 }
  0xff   :  { %v63_v31 = vmul.f32 %v188_v28, %v62_v30 }
 0x101   :  { %v64_v32 = vmul.f32 0.5, %v63_v31 }
 0x103   :  { %v65_v33 = vsub.f32 1.5, %v64_v32 }
 0x104   :  { %v190_v34 = vpop.eup %189 }
 0x105   :  { %v66_v35 = vmul.f32 %v188_v28, %v65_v33  ;;  %v72_v36 = vmul.f32 %v190_v34, %v60_v29  ;;  %vm78_vm5 = vweird.f32 %v190_v34 }
 0x106   :  { %vm79_vm7 = vmor %vm77_vm6, %vm78_vm5 }
 0x107   :  { %v70_v37 = vsel %vm69_vm4, %v188_v28, %v66_v35  ;;  %v73_v38 = vmul.f32 %v190_v34, %v72_v36 }
 0x108   :  { %v81_v39 = vmul.f32 %v70_v37, %v47_v13 }
 0x109   :  { %v74_v41 = vmul.f32 0.5, %v73_v38 }
 0x10a   :  { %v87_v43 = vmul.f32 %v181_v40, %v81_v39 }
 0x10b   :  { %v75_v42 = vsub.f32 1.5, %v74_v41 }
 0x10c   :  { %v93_v48 = vadd.f32 %v182_v44, %v87_v43 }
 0x10d   :  { %v76_v45 = vmul.f32 %v190_v34, %v75_v42 }
 0x10e   :  { %v95_v51 = vmax.f32 %v93_v48, 0.0 }
 0x10f   :  { %v80_v46 = vsel %vm79_vm7, %v190_v34, %v76_v45 }
 0x110   :  { %v82_v47 = vmul.f32 %v80_v46, %v48_v18  ;;  %v97_v53 = vmin.f32 %v95_v51, 6.0 }
 0x112   :  { %v88_v49 = vmul.f32 %v181_v40, %v82_v47 }
 0x114   :  { %v94_v50 = vadd.f32 %v182_v44, %v88_v49 }
 0x116   :  { %v96_v52 = vmax.f32 %v94_v50, 0.0 }
 0x118   :  { %v98_v54 = vmin.f32 %v96_v52, 6.0 }
 0x11a   :  { %v99_v55 = vpack.c.bf16 %v98_v54, %v97_v53 }
 0x11c   :  { %172 = vmatmul.msk.bf16.vlgmr.msra.gmra.mxu0 %vm31_vm0, %v99_v55  ;;  %177 = vmatmul.msk.bf16.vlgmr.msra.gmra.mxu1 %vm31_vm0, %v99_v55 }
 0x199   :  { %v124_v58 = vpop.f32.mrf.mxu0  ;;  %v153_v59 = vpop.f32.mrf.mxu1 }
 0x19a   :  { %v125_v60 = vadd.f32 %v183_v56, %v124_v58  ;;  %v154_v61 = vadd.f32 %v184_v57, %v153_v59 }
 0x19c   :  { %130 = vst.msk [vmem:[%s286_s7] sm:$0xff] %vm129_vm8, %v125_v60 }
 0x19d   :  { %158 = vst.msk [vmem:[%s287_s8] sm:$0xff] %vm129_vm8, %v154_v61 }
 0x1a1   :  { %v126_v62 = vpop.f32.mrf.mxu0  ;;  %v155_v63 = vpop.f32.mrf.mxu1 }
 0x1a2   :  { %v127_v0 = vadd.f32 %v183_v56, %v126_v62  ;;  %v156_v1 = vadd.f32 %v184_v57, %v155_v63 }
 0x1a4   :  { %131 = vst.msk [vmem:[%s286_s7 + $0x8] sm:$0xff] %vm129_vm8, %v127_v0 }
 0x1a5   :  { %159 = vst.msk [vmem:[%s287_s8 + $0x8] sm:$0xff] %vm129_vm8, %v156_v1 }

// kernel: rnn_block_forward.7
= control target key start
LH: loop header
LB: loop body
LE: loop exit
PB: predicated region body
PF: predicated region fallthrough
CT: control target
= control target key end

     0   :  { %vm67_vm0 = vcmask 254976   ;;  %v1319_v1 = vmov 0.0   ;;  %vm93_vm1 = vcmask 261120   ;;  %s1320_s20 = smov 64   ;;  %s1321_s25 = smov 32   ;;  %vm230_vm10 = vcmask 1041409   ;;  %s1748_s1 = inlined_call_operand.vmem [shape: bf16[32,96], index: 1, kind: input, shape index: {}]   ;;  %s1749_s2 = inlined_call_operand.vmem [shape: f32[1,96], index: 2, kind: input, shape index: {}]   ;;  %s1750_s0 = inlined_call_operand.vmem [shape: f32[2,8,96], index: 0, kind: input, shape index: {}]   ;;  %s1751_s3 = inlined_call_operand.vmem [shape: f32[2,8,32], index: 3, kind: input, shape index: {}]   ;;  %s1752_s4 = inlined_call_operand.vmem [shape: f32[2,8,32], index: 4, kind: output, shape index: {}]  }
   0x1   :  { %v1216_v0 = vld [vmem:[%s1748_s1 + $0x8] sm:$0xff]  ;;  %68 = vst.msk [vmem:[#allocation2] sm:$0x3] %vm67_vm0, %v1319_v1  ;;  %v1215_v2 = vld [vmem:[%s1748_s1] sm:$0xff]  ;;  %s1322_s26 = smov 96  }
   0x2   :  { %103 = vmatpush.bf16.msra.mxu0 %v1216_v0  ;;  %244 = vmatpush.bf16.msra.mxu1 %v1216_v0  ;;  %v1363_v5 = vld [vmem:[%s1749_s2] ss:$0 sm:$0xff]  ;;  %v76_v10 = vld [vmem:[%s1750_s0 + $0xf] sm:$0x1]  ;;  %v75_v13 = vld [vmem:[%s1750_s0 + $0x7] sm:$0x1] }
   0x3   :  { %375 = vmatpush.bf16.msra.mxu2 %v1216_v0  ;;  %506 = vmatpush.bf16.msra.mxu3 %v1216_v0 }
   0x6   :  { %104 = vmatpush.bf16.msra.mxu0 %v1215_v2  ;;  %245 = vmatpush.bf16.msra.mxu1 %v1215_v2 }
   0x7   :  { %376 = vmatpush.bf16.msra.mxu2 %v1215_v2  ;;  %507 = vmatpush.bf16.msra.mxu3 %v1215_v2 }
   0x8   :  { %v1355_v3 = vld [vmem:[#allocation2] sm:$0x3] }
   0x9   :  { %v77_v4 = vpack.c.bf16 %v1355_v3, %v1355_v3  ;;  %v187_v49 = vrot.slane %v1355_v3, 1 }
   0xa   :  { %637 = vmatpush.bf16.msrb.mxu0 %v1216_v0  ;;  %768 = vmatpush.bf16.msrb.mxu1 %v1216_v0 }
   0xb   :  { %899 = vmatpush.bf16.msrb.mxu2 %v1216_v0  ;;  %1030 = vmatpush.bf16.msrb.mxu3 %v1216_v0 }
   0xc   :  { %1191 = vmatmul.msk.bf16.vlgmr.msra.gmra.mxu0 %vm93_vm1, %v77_v4 }
   0xe   :  { %638 = vmatpush.bf16.msrb.mxu0 %v1215_v2  ;;  %769 = vmatpush.bf16.msrb.mxu1 %v1215_v2 }
   0xf   :  { %900 = vmatpush.bf16.msrb.mxu2 %v1215_v2  ;;  %1031 = vmatpush.bf16.msrb.mxu3 %v1215_v2 }
  0x89   :  { %v106_v6 = vpop.f32.mrf.mxu0 }
  0x8a   :  { %v107_v7 = vadd.f32 %v1363_v5, %v106_v6 }
  0x8c   :  { %v111_v8 = vrot.slane %v107_v7, 1  ;;  %v114_v14 = vadd.f32 %v107_v7, %v75_v13 }
  0x8e   :  { %156 = vrot.lane.b32.xlu0 %v111_v8, %s1320_s20  ;;  %v115_v11 = vadd.f32 %v111_v8, %v76_v10  ;;  %v1192_v15 = vmul.f32 -1.442695, %v114_v14 }
  0x90   :  { %v1193_v12 = vmul.f32 -1.442695, %v115_v11 }
  0x91   :  { %v108_v9 = vpop.f32.mrf.mxu0 }
  0x92   :  { %1222 = vpow2.f32 %v1193_v12  ;;  %v221_v12 = vld [vmem:[%s1750_s0 + $0x6] sm:$0x1] }
  0x93   :  { %1224 = vpow2.f32 %v1192_v15 }
  0x96   :  { %154 = vrot.lane.b32.xlu0 %v107_v7, %s1320_s20 }
  0x98   :  { %v1223_v16 = vpop.eup %1222 }
  0x99   :  { %v123_v17 = vadd.f32 1.0, %v1223_v16  ;;  %v1225_v18 = vpop.eup %1224 }
  0x9a   :  { %v122_v19 = vadd.f32 1.0, %v1225_v18 }
  0x9b   :  { %1226 = vrcp.f32 %v123_v17  ;;  %v150_v28 = vand.u32 2147483648, %v123_v17  ;;  %vm144_vm3 = vweird.f32 %v123_v17  ;;  %v148_v29 = vand.u32 2147483647, %v123_v17 }
  0x9c   :  { %1228 = vrcp.f32 %v122_v19  ;;  %v135_v37 = vand.u32 2147483648, %v122_v19  ;;  %vm129_vm7 = vweird.f32 %v122_v19  ;;  %v133_v38 = vand.u32 2147483647, %v122_v19 }
  0x9d   :  { %v151_v32 = vor.u32 1.1754944e-38, %v150_v28  ;;  %vm149_vm5 = vcmp.eq.f32.partialorder %v148_v29, 8.507059e+37 }
  0x9e   :  { %v136_v40 = vor.u32 1.1754944e-38, %v135_v37  ;;  %vm134_vm9 = vcmp.eq.f32.partialorder %v133_v38, 8.507059e+37 }
  0xa1   :  { %v1227_v20 = vpop.eup %1226 }
  0xa2   :  { %v140_v21 = vmul.f32 %v1227_v20, %v123_v17  ;;  %v1229_v23 = vpop.eup %1228  ;;  %vm145_vm2 = vweird.f32 %v1227_v20 }
  0xa3   :  { %v125_v25 = vmul.f32 %v1229_v23, %v122_v19  ;;  %vm146_vm4 = vmor %vm144_vm3, %vm145_vm2  ;;  %vm130_vm6 = vweird.f32 %v1229_v23 }
  0xa4   :  { %v141_v22 = vsub.f32 1.0, %v140_v21  ;;  %vm131_vm8 = vmor %vm129_vm7, %vm130_vm6 }
  0xa5   :  { %v126_v27 = vsub.f32 1.0, %v125_v25 }
  0xa6   :  { %v142_v24 = vmul.f32 %v1227_v20, %v141_v22 }
  0xa7   :  { %v127_v31 = vmul.f32 %v1229_v23, %v126_v27 }
  0xa8   :  { %v143_v26 = vadd.f32 %v1227_v20, %v142_v24 }
  0xa9   :  { %v128_v36 = vadd.f32 %v1229_v23, %v127_v31 }
  0xaa   :  { %v147_v30 = vsel %vm146_vm4, %v1227_v20, %v143_v26 }
  0xab   :  { %v152_v34 = vsel %vm149_vm5, %v151_v32, %v147_v30  ;;  %v132_v39 = vsel %vm131_vm8, %v1229_v23, %v128_v36 }
  0xac   :  { %v137_v42 = vsel %vm134_vm9, %v136_v40, %v132_v39  ;;  %v175_v53 = vsub.f32 1.0, %v152_v34 }
  0xad   :  { %v174_v59 = vsub.f32 1.0, %v137_v42 }
 0x100   :  { %v157_v33 = vpop.permute.xlu0 %156 }
 0x101   :  { %v161_v35 = vmul.f32 %v157_v33, %v152_v34 }
 0x103   :  { %166 = vrot.lane.b32.xlu1 %v161_v35, %s1320_s20 }
 0x108   :  { %v155_v41 = vpop.permute.xlu0 %154 }
 0x109   :  { %v160_v43 = vmul.f32 %v155_v41, %v137_v42 }
 0x10b   :  { %164 = vrot.lane.b32.xlu1 %v160_v43, %s1320_s20 }
 0x113   :  { %188 = vrot.lane.b32.xlu1 %v1355_v3, %s1321_s25 }
 0x175   :  { %v167_v44 = vpop.permute.xlu1 %166 }
 0x176   :  { %v171_v45 = vadd.f32 %v167_v44, %v76_v10 }
 0x178   :  { %1230 = vtanh.f32 %v171_v45 }
 0x17d   :  { %v165_v46 = vpop.permute.xlu1 %164 }
 0x17e   :  { %v1231_v47 = vpop.eup %1230  ;;  %v170_v48 = vadd.f32 %v165_v46, %v75_v13  ;;  %v222_v13 = vld [vmem:[%s1750_s0 + $0xe] sm:$0x1] }
 0x17f   :  { %180 = vrot.lane.b32.xlu2 %v1231_v47, %s1322_s26 }
 0x180   :  { %1232 = vtanh.f32 %v170_v48 }
 0x185   :  { %v189_v57 = vpop.permute.xlu1 %188 }
 0x186   :  { %v1233_v50 = vpop.eup %1232  ;;  %v194_v61 = vmul.f32 %v189_v57, %v137_v42 }
 0x187   :  { %190 = vrot.lane.b32.xlu2 %v187_v49, %s1321_s25  ;;  %178 = vrot.lane.b32.xlu0 %v1233_v50, %s1322_s26 }
 0x1d9   :  { %v181_v51 = vpop.permute.xlu2 %180 }
 0x1da   :  { %v185_v55 = vmul.f32 %v181_v51, %v175_v53 }
 0x1e1   :  { %v191_v52 = vpop.permute.xlu2 %190 }
 0x1e2   :  { %v195_v54 = vmul.f32 %v191_v52, %v152_v34 }
 0x1e4   :  { %v1382_v56 = vadd.f32 %v195_v54, %v185_v55 }
 0x1e6   :  { %v224_v58 = vpack.c.bf16 %v1382_v56, %v1382_v56 }
 0x1e8   :  { %v228_v63 = vunpack.c.l.b16 %v224_v58 }
 0x1ea   :  { %v229_v2 = vrot.slane %v228_v63, 7 }
 0x1f9   :  { %v179_v60 = vpop.permute.xlu0 %178 }
 0x1fa   :  { %v184_v62 = vmul.f32 %v179_v60, %v174_v59 }
 0x1fc   :  { %v1386_v0 = vadd.f32 %v194_v61, %v184_v62 }
 0x1fe   :  { %v223_v1 = vpack.c.bf16 %v1386_v0, %v1386_v0 }
 0x200   :  { %v227_v3 = vunpack.c.l.b16 %v223_v1 }
 0x202   :  { %v231_v4 = vsel %vm230_vm10, %v229_v2, %v227_v3 }
 0x203   :  { %v232_v6 = vpack.c.b16 %v231_v4, %v231_v4 }
 0x205   :  { %233 = vrot.lane.b32.xlu2 %v232_v6, %s1322_s26 }
 0x25f   :  { %v234_v7 = vpop.permute.xlu2 %233 }
 0x260   :  { %1194 = vmatmul.msk.bf16.vlgmr.msra.gmra.mxu1 %vm93_vm1, %v234_v7 }
 0x2dd   :  { %v247_v8 = vpop.f32.mrf.mxu1 }
 0x2de   :  { %v248_v9 = vadd.f32 %v1363_v5, %v247_v8 }
 0x2e0   :  { %295 = vrot.lane.b32.xlu1 %v248_v9, %s1320_s20  ;;  %v252_v10 = vrot.slane %v248_v9, 1  ;;  %v255_v14 = vadd.f32 %v248_v9, %v221_v12 }
 0x2e2   :  { %297 = vrot.lane.b32.xlu0 %v252_v10, %s1320_s20  ;;  %v256_v15 = vadd.f32 %v252_v10, %v222_v13  ;;  %v1195_v16 = vmul.f32 -1.442695, %v255_v14 }
 0x2e4   :  { %v1196_v17 = vmul.f32 -1.442695, %v256_v15  ;;  %1234 = vpow2.f32 %v1195_v16 }
 0x2e5   :  { %v249_v11 = vpop.f32.mrf.mxu1 }
 0x2e6   :  { %1236 = vpow2.f32 %v1196_v17 }
 0x2ea   :  { %v1235_v18 = vpop.eup %1234 }
 0x2eb   :  { %v263_v20 = vadd.f32 1.0, %v1235_v18  ;;  %v354_v18 = vld [vmem:[%s1750_s0 + $0xd] sm:$0x1] }
 0x2ec   :  { %v1237_v19 = vpop.eup %1236 }
 0x2ed   :  { %v264_v21 = vadd.f32 1.0, %v1237_v19  ;;  %1238 = vrcp.f32 %v263_v20  ;;  %v276_v31 = vand.u32 2147483648, %v263_v20  ;;  %vm270_vm12 = vweird.f32 %v263_v20 }
 0x2ee   :  { %v274_v32 = vand.u32 2147483647, %v263_v20 }
 0x2ef   :  { %1240 = vrcp.f32 %v264_v21  ;;  %v291_v34 = vand.u32 2147483648, %v264_v21  ;;  %vm285_vm15 = vweird.f32 %v264_v21  ;;  %v289_v36 = vand.u32 2147483647, %v264_v21 }
 0x2f0   :  { %v277_v37 = vor.u32 1.1754944e-38, %v276_v31  ;;  %vm275_vm3 = vcmp.eq.f32.partialorder %v274_v32, 8.507059e+37 }
 0x2f1   :  { %v292_v41 = vor.u32 1.1754944e-38, %v291_v34  ;;  %vm290_vm4 = vcmp.eq.f32.partialorder %v289_v36, 8.507059e+37 }
 0x2f3   :  { %v1239_v22 = vpop.eup %1238 }
 0x2f4   :  { %v266_v24 = vmul.f32 %v1239_v22, %v263_v20  ;;  %vm271_vm11 = vweird.f32 %v1239_v22 }
 0x2f5   :  { %v1241_v23 = vpop.eup %1240  ;;  %vm272_vm14 = vmor %vm270_vm12, %vm271_vm11 }
 0x2f6   :  { %v281_v25 = vmul.f32 %v1241_v23, %v264_v21  ;;  %v267_v26 = vsub.f32 1.0, %v266_v24  ;;  %vm286_vm13 = vweird.f32 %v1241_v23 }
 0x2f7   :  { %vm287_vm2 = vmor %vm285_vm15, %vm286_vm13 }
 0x2f8   :  { %v282_v27 = vsub.f32 1.0, %v281_v25  ;;  %v268_v28 = vmul.f32 %v1239_v22, %v267_v26 }
 0x2fa   :  { %v283_v29 = vmul.f32 %v1241_v23, %v282_v27  ;;  %v269_v30 = vadd.f32 %v1239_v22, %v268_v28 }
 0x2fc   :  { %v284_v33 = vadd.f32 %v1241_v23, %v283_v29  ;;  %v273_v35 = vsel %vm272_vm14, %v1239_v22, %v269_v30 }
 0x2fd   :  { %v278_v40 = vsel %vm275_vm3, %v277_v37, %v273_v35 }
 0x2fe   :  { %v288_v38 = vsel %vm287_vm2, %v1241_v23, %v284_v33  ;;  %v315_v52 = vsub.f32 1.0, %v278_v40  ;;  %v327_v54 = vmul.f32 %v278_v40, %v1386_v0 }
 0x2ff   :  { %v293_v44 = vsel %vm290_vm4, %v292_v41, %v288_v38 }
 0x300   :  { %v316_v57 = vsub.f32 1.0, %v293_v44  ;;  %v328_v60 = vmul.f32 %v293_v44, %v1382_v56 }
 0x352   :  { %v296_v39 = vpop.permute.xlu1 %295 }
 0x353   :  { %v301_v42 = vmul.f32 %v296_v39, %v278_v40 }
 0x354   :  { %v298_v43 = vpop.permute.xlu0 %297 }
 0x355   :  { %v302_v45 = vmul.f32 %v298_v43, %v293_v44  ;;  %305 = vrot.lane.b32.xlu0 %v301_v42, %s1320_s20 }
 0x357   :  { %307 = vrot.lane.b32.xlu2 %v302_v45, %s1320_s20 }
 0x3b1   :  { %v308_v46 = vpop.permute.xlu2 %307 }
 0x3b2   :  { %v312_v47 = vadd.f32 %v308_v46, %v222_v13  ;;  %v353_v13 = vld [vmem:[%s1750_s0 + $0x5] sm:$0x1] }
 0x3b4   :  { %1242 = vtanh.f32 %v312_v47 }
 0x3ba   :  { %v1243_v48 = vpop.eup %1242 }
 0x3bb   :  { %321 = vrot.lane.b32.xlu1 %v1243_v48, %s1322_s26 }
 0x3c7   :  { %v306_v49 = vpop.permute.xlu0 %305 }
 0x3c8   :  { %v311_v50 = vadd.f32 %v306_v49, %v221_v12 }
 0x3ca   :  { %1244 = vtanh.f32 %v311_v50 }
 0x3d0   :  { %v1245_v51 = vpop.eup %1244 }
 0x3d1   :  { %319 = vrot.lane.b32.xlu2 %v1245_v51, %s1322_s26 }
 0x42b   :  { %v320_v53 = vpop.permute.xlu2 %319 }
 0x42c   :  { %v325_v55 = vmul.f32 %v320_v53, %v315_v52 }
 0x42d   :  { %v322_v58 = vpop.permute.xlu1 %321 }
 0x42e   :  { %v1407_v59 = vadd.f32 %v327_v54, %v325_v55  ;;  %v326_v61 = vmul.f32 %v322_v58, %v316_v57 }
 0x430   :  { %v1410_v62 = vadd.f32 %v328_v60, %v326_v61  ;;  %v355_v63 = vpack.c.bf16 %v1407_v59, %v1407_v59 }
 0x432   :  { %v356_v1 = vpack.c.bf16 %v1410_v62, %v1410_v62  ;;  %v359_v3 = vunpack.c.l.b16 %v355_v63 }
 0x434   :  { %v360_v2 = vunpack.c.l.b16 %v356_v1 }
 0x436   :  { %v361_v4 = vrot.slane %v360_v2, 7 }
 0x438   :  { %v362_v6 = vsel %vm230_vm10, %v361_v4, %v359_v3 }
 0x439   :  { %v363_v7 = vpack.c.b16 %v362_v6, %v362_v6 }
 0x43b   :  { %364 = vrot.lane.b32.xlu0 %v363_v7, %s1322_s26 }
 0x4ad   :  { %v365_v8 = vpop.permute.xlu0 %364 }
 0x4ae   :  { %1197 = vmatmul.msk.bf16.vlgmr.msra.gmra.mxu2 %vm93_vm1, %v365_v8 }
 0x531   :  { %v378_v9 = vpop.f32.mrf.mxu2 }
 0x532   :  { %v379_v10 = vadd.f32 %v1363_v5, %v378_v9 }
 0x534   :  { %426 = vrot.lane.b32.xlu2 %v379_v10, %s1320_s20  ;;  %v383_v11 = vrot.slane %v379_v10, 1  ;;  %v386_v14 = vadd.f32 %v379_v10, %v353_v13 }
 0x536   :  { %428 = vrot.lane.b32.xlu1 %v383_v11, %s1320_s20  ;;  %v1198_v15 = vmul.f32 -1.442695, %v386_v14  ;;  %v387_v19 = vadd.f32 %v383_v11, %v354_v18 }
 0x538   :  { %1246 = vpow2.f32 %v1198_v15  ;;  %v1199_v21 = vmul.f32 -1.442695, %v387_v19 }
 0x539   :  { %v380_v12 = vpop.f32.mrf.mxu2 }
 0x53e   :  { %v1247_v16 = vpop.eup %1246 }
 0x53f   :  { %v394_v17 = vadd.f32 1.0, %v1247_v16  ;;  %v485_v16 = vld [vmem:[%s1750_s0 + $0xc] sm:$0x1] }
 0x541   :  { %1248 = vrcp.f32 %v394_v17  ;;  %v407_v28 = vand.u32 2147483648, %v394_v17  ;;  %vm401_vm6 = vweird.f32 %v394_v17  ;;  %v405_v29 = vand.u32 2147483647, %v394_v17 }
 0x542   :  { %1250 = vpow2.f32 %v1199_v21  ;;  %v484_v21 = vld [vmem:[%s1750_s0 + $0x4] sm:$0x1] }
 0x543   :  { %v408_v31 = vor.u32 1.1754944e-38, %v407_v28  ;;  %vm406_vm8 = vcmp.eq.f32.partialorder %v405_v29, 8.507059e+37 }
 0x547   :  { %v1249_v20 = vpop.eup %1248 }
 0x548   :  { %v397_v22 = vmul.f32 %v1249_v20, %v394_v17  ;;  %v1251_v25 = vpop.eup %1250  ;;  %vm402_vm5 = vweird.f32 %v1249_v20 }
 0x549   :  { %v395_v27 = vadd.f32 1.0, %v1251_v25  ;;  %vm403_vm7 = vmor %vm401_vm6, %vm402_vm5 }
 0x54a   :  { %v398_v23 = vsub.f32 1.0, %v397_v22 }
 0x54b   :  { %1252 = vrcp.f32 %v395_v27  ;;  %v422_v40 = vand.u32 2147483648, %v395_v27  ;;  %vm416_vm11 = vweird.f32 %v395_v27  ;;  %v420_v41 = vand.u32 2147483647, %v395_v27 }
 0x54c   :  { %v399_v24 = vmul.f32 %v1249_v20, %v398_v23 }
 0x54d   :  { %v423_v43 = vor.u32 1.1754944e-38, %v422_v40  ;;  %vm421_vm13 = vcmp.eq.f32.partialorder %v420_v41, 8.507059e+37 }
 0x54e   :  { %v400_v26 = vadd.f32 %v1249_v20, %v399_v24 }
 0x550   :  { %v404_v30 = vsel %vm403_vm7, %v1249_v20, %v400_v26 }
 0x551   :  { %v409_v33 = vsel %vm406_vm8, %v408_v31, %v404_v30  ;;  %v1253_v35 = vpop.eup %1252 }
 0x552   :  { %v412_v36 = vmul.f32 %v1253_v35, %v395_v27  ;;  %vm417_vm9 = vweird.f32 %v1253_v35  ;;  %v446_v53 = vsub.f32 1.0, %v409_v33  ;;  %v458_v55 = vmul.f32 %v409_v33, %v1407_v59 }
 0x553   :  { %vm418_vm12 = vmor %vm416_vm11, %vm417_vm9 }
 0x554   :  { %v413_v37 = vsub.f32 1.0, %v412_v36 }
 0x556   :  { %v414_v38 = vmul.f32 %v1253_v35, %v413_v37 }
 0x558   :  { %v415_v39 = vadd.f32 %v1253_v35, %v414_v38 }
 0x55a   :  { %v419_v42 = vsel %vm418_vm12, %v1253_v35, %v415_v39 }
 0x55b   :  { %v424_v45 = vsel %vm421_vm13, %v423_v43, %v419_v42 }
 0x55c   :  { %v447_v58 = vsub.f32 1.0, %v424_v45  ;;  %v459_v63 = vmul.f32 %v424_v45, %v1410_v62 }
 0x58e   :  { %v427_v32 = vpop.permute.xlu2 %426 }
 0x58f   :  { %v432_v34 = vmul.f32 %v427_v32, %v409_v33 }
 0x591   :  { %436 = vrot.lane.b32.xlu1 %v432_v34, %s1320_s20 }
 0x5a8   :  { %v429_v44 = vpop.permute.xlu1 %428 }
 0x5a9   :  { %v433_v46 = vmul.f32 %v429_v44, %v424_v45 }
 0x5ab   :  { %438 = vrot.lane.b32.xlu0 %v433_v46, %s1320_s20 }
 0x603   :  { %v437_v47 = vpop.permute.xlu1 %436 }
 0x604   :  { %v442_v48 = vadd.f32 %v437_v47, %v353_v13 }
 0x606   :  { %1254 = vtanh.f32 %v442_v48 }
 0x60c   :  { %v1255_v49 = vpop.eup %1254 }
 0x60d   :  { %450 = vrot.lane.b32.xlu0 %v1255_v49, %s1322_s26 }
 0x61d   :  { %v439_v50 = vpop.permute.xlu0 %438 }
 0x61e   :  { %v443_v51 = vadd.f32 %v439_v50, %v354_v18 }
 0x620   :  { %1256 = vtanh.f32 %v443_v51 }
 0x626   :  { %v1257_v52 = vpop.eup %1256 }
 0x627   :  { %452 = vrot.lane.b32.xlu2 %v1257_v52, %s1322_s26 }
 0x67f   :  { %v451_v54 = vpop.permute.xlu0 %450 }
 0x680   :  { %v456_v57 = vmul.f32 %v451_v54, %v446_v53 }
 0x681   :  { %v453_v60 = vpop.permute.xlu2 %452 }
 0x682   :  { %v1433_v61 = vadd.f32 %v458_v55, %v456_v57  ;;  %v457_v1 = vmul.f32 %v453_v60, %v447_v58 }
 0x684   :  { %v1436_v2 = vadd.f32 %v459_v63, %v457_v1  ;;  %v486_v3 = vpack.c.bf16 %v1433_v61, %v1433_v61 }
 0x686   :  { %v487_v4 = vpack.c.bf16 %v1436_v2, %v1436_v2  ;;  %v490_v7 = vunpack.c.l.b16 %v486_v3 }
 0x688   :  { %v491_v6 = vunpack.c.l.b16 %v487_v4 }
 0x68a   :  { %v492_v8 = vrot.slane %v491_v6, 7 }
 0x68c   :  { %v493_v9 = vsel %vm230_vm10, %v492_v8, %v490_v7 }
 0x68d   :  { %v494_v10 = vpack.c.b16 %v493_v9, %v493_v9 }
 0x68f   :  { %495 = vrot.lane.b32.xlu1 %v494_v10, %s1322_s26 }
 0x701   :  { %v496_v11 = vpop.permute.xlu1 %495 }
 0x702   :  { %1200 = vmatmul.msk.bf16.vlgmr.msra.gmra.mxu3 %vm93_vm1, %v496_v11 }
 0x785   :  { %v509_v12 = vpop.f32.mrf.mxu3 }
 0x786   :  { %v510_v13 = vadd.f32 %v1363_v5, %v509_v12 }
 0x788   :  { %557 = vrot.lane.b32.xlu0 %v510_v13, %s1320_s20  ;;  %v514_v14 = vrot.slane %v510_v13, 1  ;;  %v517_v22 = vadd.f32 %v510_v13, %v484_v21 }
 0x78a   :  { %559 = vrot.lane.b32.xlu2 %v514_v14, %s1320_s20  ;;  %v518_v17 = vadd.f32 %v514_v14, %v485_v16  ;;  %v1201_v23 = vmul.f32 -1.442695, %v517_v22  ;;  %v616_v22 = vld [vmem:[%s1750_s0 + $0xb] sm:$0x1] }
 0x78c   :  { %v1202_v18 = vmul.f32 -1.442695, %v518_v17 }
 0x78d   :  { %v511_v15 = vpop.f32.mrf.mxu3 }
 0x78e   :  { %1258 = vpow2.f32 %v1202_v18 }
 0x794   :  { %v1259_v19 = vpop.eup %1258 }
 0x795   :  { %v526_v20 = vadd.f32 1.0, %v1259_v19 }
 0x797   :  { %1260 = vrcp.f32 %v526_v20  ;;  %v553_v31 = vand.u32 2147483648, %v526_v20  ;;  %vm547_vm15 = vweird.f32 %v526_v20  ;;  %v551_v32 = vand.u32 2147483647, %v526_v20 }
 0x798   :  { %1262 = vpow2.f32 %v1201_v23 }
 0x799   :  { %v554_v34 = vor.u32 1.1754944e-38, %v553_v31  ;;  %vm552_vm3 = vcmp.eq.f32.partialorder %v551_v32, 8.507059e+37 }
 0x79d   :  { %v1261_v24 = vpop.eup %1260 }
 0x79e   :  { %v543_v25 = vmul.f32 %v1261_v24, %v526_v20  ;;  %v1263_v27 = vpop.eup %1262  ;;  %vm548_vm14 = vweird.f32 %v1261_v24 }
 0x79f   :  { %v525_v29 = vadd.f32 1.0, %v1263_v27  ;;  %vm549_vm2 = vmor %vm547_vm15, %vm548_vm14 }
 0x7a0   :  { %v544_v26 = vsub.f32 1.0, %v543_v25 }
 0x7a1   :  { %1264 = vrcp.f32 %v525_v29  ;;  %v538_v43 = vand.u32 2147483648, %v525_v29  ;;  %vm532_vm5 = vweird.f32 %v525_v29  ;;  %v536_v44 = vand.u32 2147483647, %v525_v29 }
 0x7a2   :  { %v545_v28 = vmul.f32 %v1261_v24, %v544_v26 }
 0x7a3   :  { %v539_v46 = vor.u32 1.1754944e-38, %v538_v43  ;;  %vm537_vm7 = vcmp.eq.f32.partialorder %v536_v44, 8.507059e+37 }
 0x7a4   :  { %v546_v30 = vadd.f32 %v1261_v24, %v545_v28 }
 0x7a6   :  { %v550_v33 = vsel %vm549_vm2, %v1261_v24, %v546_v30 }
 0x7a7   :  { %v1265_v35 = vpop.eup %1264  ;;  %v555_v37 = vsel %vm552_vm3, %v554_v34, %v550_v33 }
 0x7a8   :  { %v528_v39 = vmul.f32 %v1265_v35, %v525_v29  ;;  %vm533_vm4 = vweird.f32 %v1265_v35  ;;  %v578_v1 = vsub.f32 1.0, %v555_v37  ;;  %v590_v6 = vmul.f32 %v555_v37, %v1436_v2 }
 0x7a9   :  { %vm534_vm6 = vmor %vm532_vm5, %vm533_vm4 }
 0x7aa   :  { %v529_v40 = vsub.f32 1.0, %v528_v39 }
 0x7ac   :  { %v530_v41 = vmul.f32 %v1265_v35, %v529_v40 }
 0x7ae   :  { %v531_v42 = vadd.f32 %v1265_v35, %v530_v41 }
 0x7b0   :  { %v535_v45 = vsel %vm534_vm6, %v1265_v35, %v531_v42 }
 0x7b1   :  { %v540_v48 = vsel %vm537_vm7, %v539_v46, %v535_v45 }
 0x7b2   :  { %v577_v57 = vsub.f32 1.0, %v540_v48  ;;  %v589_v60 = vmul.f32 %v540_v48, %v1433_v61 }
 0x7e4   :  { %v560_v36 = vpop.permute.xlu2 %559 }
 0x7e5   :  { %v564_v38 = vmul.f32 %v560_v36, %v555_v37 }
 0x7e7   :  { %569 = vrot.lane.b32.xlu1 %v564_v38, %s1320_s20 }
 0x7fa   :  { %v558_v47 = vpop.permute.xlu0 %557 }
 0x7fb   :  { %v563_v49 = vmul.f32 %v558_v47, %v540_v48 }
 0x7fd   :  { %567 = vrot.lane.b32.xlu2 %v563_v49, %s1320_s20 }
 0x857   :  { %v568_v50 = vpop.permute.xlu2 %567 }
 0x858   :  { %v573_v51 = vadd.f32 %v568_v50, %v484_v21  ;;  %v615_v21 = vld [vmem:[%s1750_s0 + $0x3] sm:$0x1] }
 0x859   :  { %v570_v52 = vpop.permute.xlu1 %569 }
 0x85a   :  { %1266 = vtanh.f32 %v573_v51  ;;  %v574_v53 = vadd.f32 %v570_v52, %v485_v16 }
 0x85c   :  { %1268 = vtanh.f32 %v574_v53 }
 0x860   :  { %v1267_v54 = vpop.eup %1266 }
 0x861   :  { %581 = vrot.lane.b32.xlu1 %v1267_v54, %s1322_s26 }
 0x862   :  { %v1269_v55 = vpop.eup %1268 }
 0x863   :  { %583 = vrot.lane.b32.xlu0 %v1269_v55, %s1322_s26 }
 0x8d3   :  { %v582_v58 = vpop.permute.xlu1 %581 }
 0x8d4   :  { %v587_v63 = vmul.f32 %v582_v58, %v577_v57 }
 0x8d5   :  { %v584_v3 = vpop.permute.xlu0 %583 }
 0x8d6   :  { %v1459_v4 = vadd.f32 %v589_v60, %v587_v63  ;;  %v588_v7 = vmul.f32 %v584_v3, %v578_v1 }
 0x8d8   :  { %v1462_v8 = vadd.f32 %v590_v6, %v588_v7  ;;  %v617_v9 = vpack.c.bf16 %v1459_v4, %v1459_v4 }
 0x8da   :  { %v618_v10 = vpack.c.bf16 %v1462_v8, %v1462_v8  ;;  %v621_v12 = vunpack.c.l.b16 %v617_v9 }
 0x8dc   :  { %v622_v11 = vunpack.c.l.b16 %v618_v10 }
 0x8de   :  { %v623_v13 = vrot.slane %v622_v11, 7 }
 0x8e0   :  { %v624_v14 = vsel %vm230_vm10, %v623_v13, %v621_v12 }
 0x8e1   :  { %v625_v15 = vpack.c.b16 %v624_v14, %v624_v14 }
 0x8e3   :  { %626 = vrot.lane.b32.xlu2 %v625_v15, %s1322_s26 }
 0x93d   :  { %v627_v16 = vpop.permute.xlu2 %626 }
 0x93e   :  { %1203 = vmatmul.msk.bf16.vlgmr.msrb.gmra.mxu0 %vm93_vm1, %v627_v16 }
 0x9bb   :  { %v640_v17 = vpop.f32.mrf.mxu0 }
 0x9bc   :  { %v641_v18 = vadd.f32 %v1363_v5, %v640_v17 }
 0x9be   :  { %688 = vrot.lane.b32.xlu1 %v641_v18, %s1320_s20  ;;  %v645_v19 = vrot.slane %v641_v18, 1  ;;  %v648_v23 = vadd.f32 %v641_v18, %v615_v21 }
 0x9c0   :  { %690 = vrot.lane.b32.xlu0 %v645_v19, %s1320_s20  ;;  %v649_v24 = vadd.f32 %v645_v19, %v616_v22  ;;  %v1204_v25 = vmul.f32 -1.442695, %v648_v23 }
 0x9c2   :  { %v1205_v26 = vmul.f32 -1.442695, %v649_v24  ;;  %1270 = vpow2.f32 %v1204_v25 }
 0x9c3   :  { %v642_v20 = vpop.f32.mrf.mxu0 }
 0x9c4   :  { %1272 = vpow2.f32 %v1205_v26 }
 0x9c8   :  { %v1271_v27 = vpop.eup %1270 }
 0x9c9   :  { %v656_v29 = vadd.f32 1.0, %v1271_v27 }
 0x9ca   :  { %v1273_v28 = vpop.eup %1272 }
 0x9cb   :  { %v657_v30 = vadd.f32 1.0, %v1273_v28  ;;  %1274 = vrcp.f32 %v656_v29  ;;  %v669_v40 = vand.u32 2147483648, %v656_v29  ;;  %vm663_vm9 = vweird.f32 %v656_v29  ;;  %v746_v28 = vld [vmem:[%s1750_s0 + $0x2] sm:$0x1] }
 0x9cc   :  { %v667_v41 = vand.u32 2147483647, %v656_v29 }
 0x9cd   :  { %1276 = vrcp.f32 %v657_v30  ;;  %v684_v43 = vand.u32 2147483648, %v657_v30  ;;  %vm678_vm13 = vweird.f32 %v657_v30  ;;  %v682_v45 = vand.u32 2147483647, %v657_v30 }
 0x9ce   :  { %v670_v46 = vor.u32 1.1754944e-38, %v669_v40  ;;  %vm668_vm15 = vcmp.eq.f32.partialorder %v667_v41, 8.507059e+37 }
 0x9cf   :  { %v685_v50 = vor.u32 1.1754944e-38, %v684_v43  ;;  %vm683_vm2 = vcmp.eq.f32.partialorder %v682_v45, 8.507059e+37 }
 0x9d1   :  { %v1275_v31 = vpop.eup %1274 }
 0x9d2   :  { %v659_v33 = vmul.f32 %v1275_v31, %v656_v29  ;;  %vm664_vm8 = vweird.f32 %v1275_v31 }
 0x9d3   :  { %v1277_v32 = vpop.eup %1276  ;;  %vm665_vm12 = vmor %vm663_vm9, %vm664_vm8 }
 0x9d4   :  { %v674_v34 = vmul.f32 %v1277_v32, %v657_v30  ;;  %v660_v35 = vsub.f32 1.0, %v659_v33  ;;  %vm679_vm11 = vweird.f32 %v1277_v32 }
 0x9d5   :  { %vm680_vm14 = vmor %vm678_vm13, %vm679_vm11 }
 0x9d6   :  { %v675_v36 = vsub.f32 1.0, %v674_v34  ;;  %v661_v37 = vmul.f32 %v1275_v31, %v660_v35 }
 0x9d8   :  { %v676_v38 = vmul.f32 %v1277_v32, %v675_v36  ;;  %v662_v39 = vadd.f32 %v1275_v31, %v661_v37 }
 0x9da   :  { %v677_v42 = vadd.f32 %v1277_v32, %v676_v38  ;;  %v666_v44 = vsel %vm665_vm12, %v1275_v31, %v662_v39 }
 0x9db   :  { %v671_v49 = vsel %vm668_vm15, %v670_v46, %v666_v44 }
 0x9dc   :  { %v681_v47 = vsel %vm680_vm14, %v1277_v32, %v677_v42  ;;  %v708_v3 = vsub.f32 1.0, %v671_v49  ;;  %v720_v7 = vmul.f32 %v671_v49, %v1459_v4 }
 0x9dd   :  { %v686_v53 = vsel %vm683_vm2, %v685_v50, %v681_v47 }
 0x9de   :  { %v709_v10 = vsub.f32 1.0, %v686_v53  ;;  %v721_v13 = vmul.f32 %v686_v53, %v1462_v8 }
 0xa30   :  { %v689_v48 = vpop.permute.xlu1 %688 }
 0xa31   :  { %v694_v51 = vmul.f32 %v689_v48, %v671_v49 }
 0xa32   :  { %v691_v52 = vpop.permute.xlu0 %690 }
 0xa33   :  { %v695_v54 = vmul.f32 %v691_v52, %v686_v53  ;;  %698 = vrot.lane.b32.xlu0 %v694_v51, %s1320_s20 }
 0xa35   :  { %700 = vrot.lane.b32.xlu2 %v695_v54, %s1320_s20 }
 0xa8f   :  { %v701_v55 = vpop.permute.xlu2 %700 }
 0xa90   :  { %v705_v57 = vadd.f32 %v701_v55, %v616_v22 }
 0xa92   :  { %1278 = vtanh.f32 %v705_v57 }
 0xa98   :  { %v1279_v58 = vpop.eup %1278 }
 0xa99   :  { %714 = vrot.lane.b32.xlu1 %v1279_v58, %s1322_s26 }
 0xaa5   :  { %v699_v60 = vpop.permute.xlu0 %698 }
 0xaa6   :  { %v704_v63 = vadd.f32 %v699_v60, %v615_v21 }
 0xaa8   :  { %1280 = vtanh.f32 %v704_v63 }
 0xaae   :  { %v1281_v1 = vpop.eup %1280 }
 0xaaf   :  { %712 = vrot.lane.b32.xlu2 %v1281_v1, %s1322_s26 }
 0xb09   :  { %v713_v6 = vpop.permute.xlu2 %712 }
 0xb0a   :  { %v718_v9 = vmul.f32 %v713_v6, %v708_v3 }
 0xb0b   :  { %v715_v11 = vpop.permute.xlu1 %714 }
 0xb0c   :  { %v1485_v12 = vadd.f32 %v720_v7, %v718_v9  ;;  %v719_v14 = vmul.f32 %v715_v11, %v709_v10 }
 0xb0e   :  { %v1488_v15 = vadd.f32 %v721_v13, %v719_v14  ;;  %v748_v16 = vpack.c.bf16 %v1485_v12, %v1485_v12 }
 0xb10   :  { %v749_v17 = vpack.c.bf16 %v1488_v15, %v1488_v15  ;;  %v752_v19 = vunpack.c.l.b16 %v748_v16 }
 0xb12   :  { %v753_v18 = vunpack.c.l.b16 %v749_v17 }
 0xb14   :  { %v754_v20 = vrot.slane %v753_v18, 7 }
 0xb16   :  { %v755_v21 = vsel %vm230_vm10, %v754_v20, %v752_v19 }
 0xb17   :  { %v756_v22 = vpack.c.b16 %v755_v21, %v755_v21 }
 0xb19   :  { %757 = vrot.lane.b32.xlu0 %v756_v22, %s1322_s26 }
 0xb8b   :  { %v758_v23 = vpop.permute.xlu0 %757 }
 0xb8c   :  { %1206 = vmatmul.msk.bf16.vlgmr.msrb.gmra.mxu1 %vm93_vm1, %v758_v23 }
 0xc09   :  { %v771_v24 = vpop.f32.mrf.mxu1 }
 0xc0a   :  { %v772_v25 = vadd.f32 %v1363_v5, %v771_v24  ;;  %v747_v5 = vld [vmem:[%s1750_s0 + $0xa] sm:$0x1] }
 0xc0c   :  { %819 = vrot.lane.b32.xlu2 %v772_v25, %s1320_s20  ;;  %v776_v26 = vrot.slane %v772_v25, 1  ;;  %v779_v29 = vadd.f32 %v772_v25, %v746_v28 }
 0xc0e   :  { %821 = vrot.lane.b32.xlu1 %v776_v26, %s1320_s20  ;;  %v1207_v30 = vmul.f32 -1.442695, %v779_v29  ;;  %v780_v33 = vadd.f32 %v776_v26, %v747_v5 }
 0xc10   :  { %1282 = vpow2.f32 %v1207_v30  ;;  %v1208_v35 = vmul.f32 -1.442695, %v780_v33 }
 0xc11   :  { %v773_v27 = vpop.f32.mrf.mxu1 }
 0xc16   :  { %v1283_v31 = vpop.eup %1282 }
 0xc17   :  { %v787_v32 = vadd.f32 1.0, %v1283_v31 }
 0xc19   :  { %1284 = vrcp.f32 %v787_v32  ;;  %v800_v42 = vand.u32 2147483648, %v787_v32  ;;  %vm794_vm4 = vweird.f32 %v787_v32  ;;  %v798_v43 = vand.u32 2147483647, %v787_v32 }
 0xc1a   :  { %1286 = vpow2.f32 %v1208_v35 }
 0xc1b   :  { %v801_v45 = vor.u32 1.1754944e-38, %v800_v42  ;;  %vm799_vm6 = vcmp.eq.f32.partialorder %v798_v43, 8.507059e+37 }
 0xc1f   :  { %v1285_v34 = vpop.eup %1284 }
 0xc20   :  { %v790_v36 = vmul.f32 %v1285_v34, %v787_v32  ;;  %v1287_v39 = vpop.eup %1286  ;;  %vm795_vm3 = vweird.f32 %v1285_v34 }
 0xc21   :  { %v788_v41 = vadd.f32 1.0, %v1287_v39  ;;  %vm796_vm5 = vmor %vm794_vm4, %vm795_vm3 }
 0xc22   :  { %v791_v37 = vsub.f32 1.0, %v790_v36  ;;  %v878_v36 = vld [vmem:[%s1750_s0 + $0x9] sm:$0x1] }
 0xc23   :  { %1288 = vrcp.f32 %v788_v41  ;;  %v815_v54 = vand.u32 2147483648, %v788_v41  ;;  %vm809_vm8 = vweird.f32 %v788_v41  ;;  %v813_v55 = vand.u32 2147483647, %v788_v41 }
 0xc24   :  { %v792_v38 = vmul.f32 %v1285_v34, %v791_v37 }
 0xc25   :  { %v816_v58 = vor.u32 1.1754944e-38, %v815_v54  ;;  %vm814_vm11 = vcmp.eq.f32.partialorder %v813_v55, 8.507059e+37 }
 0xc26   :  { %v793_v40 = vadd.f32 %v1285_v34, %v792_v38 }
 0xc28   :  { %v797_v44 = vsel %vm796_vm5, %v1285_v34, %v793_v40 }
 0xc29   :  { %v802_v47 = vsel %vm799_vm6, %v801_v45, %v797_v44  ;;  %v1289_v49 = vpop.eup %1288 }
 0xc2a   :  { %v805_v50 = vmul.f32 %v1289_v49, %v788_v41  ;;  %vm810_vm7 = vweird.f32 %v1289_v49  ;;  %v839_v13 = vsub.f32 1.0, %v802_v47  ;;  %v851_v16 = vmul.f32 %v802_v47, %v1485_v12  ;;  %v877_v41 = vld [vmem:[%s1750_s0 + $0x1] sm:$0x1] }
 0xc2b   :  { %vm811_vm9 = vmor %vm809_vm8, %vm810_vm7 }
 0xc2c   :  { %v806_v51 = vsub.f32 1.0, %v805_v50 }
 0xc2e   :  { %v807_v52 = vmul.f32 %v1289_v49, %v806_v51 }
 0xc30   :  { %v808_v53 = vadd.f32 %v1289_v49, %v807_v52 }
 0xc32   :  { %v812_v57 = vsel %vm811_vm9, %v1289_v49, %v808_v53 }
 0xc33   :  { %v817_v63 = vsel %vm814_vm11, %v816_v58, %v812_v57 }
 0xc34   :  { %v840_v18 = vsub.f32 1.0, %v817_v63  ;;  %v852_v21 = vmul.f32 %v817_v63, %v1488_v15 }
 0xc66   :  { %v820_v46 = vpop.permute.xlu2 %819 }
 0xc67   :  { %v825_v48 = vmul.f32 %v820_v46, %v802_v47 }
 0xc69   :  { %829 = vrot.lane.b32.xlu1 %v825_v48, %s1320_s20 }
 0xc80   :  { %v822_v60 = vpop.permute.xlu1 %821 }
 0xc81   :  { %v826_v1 = vmul.f32 %v822_v60, %v817_v63 }
 0xc83   :  { %831 = vrot.lane.b32.xlu0 %v826_v1, %s1320_s20 }
 0xcdb   :  { %v830_v3 = vpop.permute.xlu1 %829 }
 0xcdc   :  { %v835_v6 = vadd.f32 %v830_v3, %v746_v28 }
 0xcde   :  { %1290 = vtanh.f32 %v835_v6 }
 0xce4   :  { %v1291_v7 = vpop.eup %1290 }
 0xce5   :  { %843 = vrot.lane.b32.xlu0 %v1291_v7, %s1322_s26 }
 0xcf5   :  { %v832_v9 = vpop.permute.xlu0 %831 }
 0xcf6   :  { %v836_v10 = vadd.f32 %v832_v9, %v747_v5  ;;  %v1526_v5 = vld [vmem:[%s1749_s2] ss:$0 sm:$0xff] }
 0xcf8   :  { %1292 = vtanh.f32 %v836_v10 }
 0xcfe   :  { %v1293_v11 = vpop.eup %1292 }
 0xcff   :  { %845 = vrot.lane.b32.xlu2 %v1293_v11, %s1322_s26 }
 0xd57   :  { %v844_v14 = vpop.permute.xlu0 %843 }
 0xd58   :  { %v849_v17 = vmul.f32 %v844_v14, %v839_v13 }
 0xd59   :  { %v846_v19 = vpop.permute.xlu2 %845 }
 0xd5a   :  { %v1511_v20 = vadd.f32 %v851_v16, %v849_v17  ;;  %v850_v22 = vmul.f32 %v846_v19, %v840_v18 }
 0xd5c   :  { %v1514_v23 = vadd.f32 %v852_v21, %v850_v22  ;;  %v879_v24 = vpack.c.bf16 %v1511_v20, %v1511_v20 }
 0xd5e   :  { %v880_v25 = vpack.c.bf16 %v1514_v23, %v1514_v23  ;;  %v883_v27 = vunpack.c.l.b16 %v879_v24 }
 0xd60   :  { %v884_v26 = vunpack.c.l.b16 %v880_v25 }
 0xd62   :  { %v885_v28 = vrot.slane %v884_v26, 7 }
 0xd64   :  { %v886_v29 = vsel %vm230_vm10, %v885_v28, %v883_v27 }
 0xd65   :  { %v887_v30 = vpack.c.b16 %v886_v29, %v886_v29 }
 0xd67   :  { %888 = vrot.lane.b32.xlu1 %v887_v30, %s1322_s26 }
 0xdd9   :  { %v889_v31 = vpop.permute.xlu1 %888 }
 0xdda   :  { %1209 = vmatmul.msk.bf16.vlgmr.msrb.gmra.mxu2 %vm93_vm1, %v889_v31 }
 0xe5d   :  { %v902_v32 = vpop.f32.mrf.mxu2 }
 0xe5e   :  { %v903_v33 = vadd.f32 %v1526_v5, %v902_v32 }
 0xe60   :  { %950 = vrot.lane.b32.xlu0 %v903_v33, %s1320_s20  ;;  %v907_v34 = vrot.slane %v903_v33, 1  ;;  %v910_v42 = vadd.f32 %v903_v33, %v877_v41 }
 0xe62   :  { %952 = vrot.lane.b32.xlu2 %v907_v34, %s1320_s20  ;;  %v911_v37 = vadd.f32 %v907_v34, %v878_v36  ;;  %v1210_v43 = vmul.f32 -1.442695, %v910_v42 }
 0xe64   :  { %v1211_v38 = vmul.f32 -1.442695, %v911_v37 }
 0xe65   :  { %v904_v35 = vpop.f32.mrf.mxu2 }
 0xe66   :  { %1294 = vpow2.f32 %v1211_v38 }
 0xe6c   :  { %v1295_v39 = vpop.eup %1294 }
 0xe6d   :  { %v919_v40 = vadd.f32 1.0, %v1295_v39 }
 0xe6f   :  { %1296 = vrcp.f32 %v919_v40  ;;  %v946_v51 = vand.u32 2147483648, %v919_v40  ;;  %vm940_vm13 = vweird.f32 %v919_v40  ;;  %v944_v52 = vand.u32 2147483647, %v919_v40 }
 0xe70   :  { %1298 = vpow2.f32 %v1210_v43 }
 0xe71   :  { %v947_v54 = vor.u32 1.1754944e-38, %v946_v51  ;;  %vm945_vm15 = vcmp.eq.f32.partialorder %v944_v52, 8.507059e+37 }
 0xe75   :  { %v1297_v44 = vpop.eup %1296 }
 0xe76   :  { %v936_v45 = vmul.f32 %v1297_v44, %v919_v40  ;;  %v1299_v47 = vpop.eup %1298  ;;  %vm941_vm12 = vweird.f32 %v1297_v44 }
 0xe77   :  { %v918_v49 = vadd.f32 1.0, %v1299_v47  ;;  %vm942_vm14 = vmor %vm940_vm13, %vm941_vm12  ;;  %v198_v47 = vld [vmem:[%s1751_s3 + $0x7] sm:$0x1] }
 0xe78   :  { %v937_v46 = vsub.f32 1.0, %v936_v45 }
 0xe79   :  { %1300 = vrcp.f32 %v918_v49  ;;  %v931_v7 = vand.u32 2147483648, %v918_v49  ;;  %vm925_vm3 = vweird.f32 %v918_v49  ;;  %v929_v9 = vand.u32 2147483647, %v918_v49 }
 0xe7a   :  { %v938_v48 = vmul.f32 %v1297_v44, %v937_v46 }
 0xe7b   :  { %v932_v11 = vor.u32 1.1754944e-38, %v931_v7  ;;  %vm930_vm5 = vcmp.eq.f32.partialorder %v929_v9, 8.507059e+37 }
 0xe7c   :  { %v939_v50 = vadd.f32 %v1297_v44, %v938_v48  ;;  %v1564_v48 = vld [vmem:[%s1750_s0] sm:$0x1] }
 0xe7e   :  { %v943_v53 = vsel %vm942_vm14, %v1297_v44, %v939_v50  ;;  %vm218_vm14 = vcmask 253952  }
 0xe7f   :  { %v1301_v55 = vpop.eup %1300  ;;  %v948_v58 = vsel %vm945_vm15, %v947_v54, %v943_v53 }
 0xe80   :  { %v921_v63 = vmul.f32 %v1301_v55, %v918_v49  ;;  %vm926_vm2 = vweird.f32 %v1301_v55  ;;  %v971_v29 = vsub.f32 1.0, %v948_v58  ;;  %v983_v32 = vmul.f32 %v948_v58, %v1514_v23 }
 0xe81   :  { %vm927_vm4 = vmor %vm925_vm3, %vm926_vm2 }
 0xe82   :  { %v922_v1 = vsub.f32 1.0, %v921_v63 }
 0xe84   :  { %v923_v3 = vmul.f32 %v1301_v55, %v922_v1 }
 0xe86   :  { %v924_v6 = vadd.f32 %v1301_v55, %v923_v3 }
 0xe88   :  { %v928_v10 = vsel %vm927_vm4, %v1301_v55, %v924_v6 }
 0xe89   :  { %v933_v14 = vsel %vm930_vm5, %v932_v11, %v928_v10 }
 0xe8a   :  { %v970_v25 = vsub.f32 1.0, %v933_v14  ;;  %v982_v27 = vmul.f32 %v933_v14, %v1511_v20 }
 0xebc   :  { %v953_v57 = vpop.permute.xlu2 %952 }
 0xebd   :  { %v957_v60 = vmul.f32 %v953_v57, %v948_v58 }
 0xebf   :  { %962 = vrot.lane.b32.xlu1 %v957_v60, %s1320_s20 }
 0xed2   :  { %v951_v13 = vpop.permute.xlu0 %950 }
 0xed3   :  { %v956_v16 = vmul.f32 %v951_v13, %v933_v14 }
 0xed5   :  { %960 = vrot.lane.b32.xlu2 %v956_v16, %s1320_s20 }
 0xf2f   :  { %v961_v17 = vpop.permute.xlu2 %960 }
 0xf30   :  { %v966_v18 = vadd.f32 %v961_v17, %v877_v41 }
 0xf31   :  { %v963_v19 = vpop.permute.xlu1 %962 }
 0xf32   :  { %1302 = vtanh.f32 %v966_v18  ;;  %v967_v21 = vadd.f32 %v963_v19, %v878_v36 }
 0xf34   :  { %1304 = vtanh.f32 %v967_v21 }
 0xf38   :  { %v1303_v22 = vpop.eup %1302 }
 0xf39   :  { %974 = vrot.lane.b32.xlu1 %v1303_v22, %s1322_s26 }
 0xf3a   :  { %v1305_v24 = vpop.eup %1304 }
 0xf3b   :  { %976 = vrot.lane.b32.xlu0 %v1305_v24, %s1322_s26 }
 0xfab   :  { %v975_v26 = vpop.permute.xlu1 %974 }
 0xfac   :  { %v980_v28 = vmul.f32 %v975_v26, %v970_v25 }
 0xfad   :  { %v977_v30 = vpop.permute.xlu0 %976 }
 0xfae   :  { %v1542_v31 = vadd.f32 %v982_v27, %v980_v28  ;;  %v981_v33 = vmul.f32 %v977_v30, %v971_v29 }
 0xfb0   :  { %v1545_v34 = vadd.f32 %v983_v32, %v981_v33  ;;  %v1010_v35 = vpack.c.bf16 %v1542_v31, %v1542_v31  ;;  %v199_v33 = vld [vmem:[%s1751_s3 + $0xf] sm:$0x1] }
 0xfb2   :  { %v1011_v36 = vpack.c.bf16 %v1545_v34, %v1545_v34  ;;  %v1014_v38 = vunpack.c.l.b16 %v1010_v35  ;;  %v332_v35 = vld [vmem:[%s1751_s3 + $0xe] sm:$0x1] }
 0xfb4   :  { %v1015_v37 = vunpack.c.l.b16 %v1011_v36  ;;  %v331_v36 = vld [vmem:[%s1751_s3 + $0x6] sm:$0x1] }
 0xfb6   :  { %v1016_v39 = vrot.slane %v1015_v37, 7  ;;  %v463_v37 = vld [vmem:[%s1751_s3 + $0xd] sm:$0x1] }
 0xfb8   :  { %v1017_v40 = vsel %vm230_vm10, %v1016_v39, %v1014_v38  ;;  %v725_v38 = vld [vmem:[%s1751_s3 + $0xb] sm:$0x1]  ;;  %v724_v39 = vld [vmem:[%s1751_s3 + $0x3] sm:$0x1] }
 0xfb9   :  { %v1018_v41 = vpack.c.b16 %v1017_v40, %v1017_v40  ;;  %v986_v40 = vld [vmem:[%s1751_s3 + $0x1] sm:$0x1] }
 0xfbb   :  { %1019 = vrot.lane.b32.xlu2 %v1018_v41, %s1322_s26  ;;  %v856_v41 = vld [vmem:[%s1751_s3 + $0xa] sm:$0x1] }
0x1015   :  { %v1020_v42 = vpop.permute.xlu2 %1019 }
0x1016   :  { %1212 = vmatmul.msk.bf16.vlgmr.msrb.gmra.mxu3 %vm93_vm1, %v1020_v42 }
0x1099   :  { %v1033_v43 = vpop.f32.mrf.mxu3 }
0x109a   :  { %v1034_v44 = vadd.f32 %v1526_v5, %v1033_v43  ;;  %v1569_v5 = vld [vmem:[%s1750_s0 + $0x8] sm:$0x1] }
0x109c   :  { %1081 = vrot.lane.b32.xlu1 %v1034_v44, %s1320_s20  ;;  %v1038_v45 = vrot.slane %v1034_v44, 1  ;;  %v1041_v49 = vadd.f32 %v1034_v44, %v1564_v48 }
0x109e   :  { %1083 = vrot.lane.b32.xlu0 %v1038_v45, %s1320_s20  ;;  %v1042_v50 = vadd.f32 %v1038_v45, %v1569_v5  ;;  %v1213_v51 = vmul.f32 -1.442695, %v1041_v49 }
0x10a0   :  { %v1214_v52 = vmul.f32 -1.442695, %v1042_v50  ;;  %1306 = vpow2.f32 %v1213_v51 }
0x10a1   :  { %v1035_v46 = vpop.f32.mrf.mxu3 }
0x10a2   :  { %1308 = vpow2.f32 %v1214_v52 }
0x10a4   :  { %202 = vrot.lane.b32.xlu1 %v198_v47, %s1321_s25 }
0x10a6   :  { %v1307_v53 = vpop.eup %1306 }
0x10a7   :  { %v1049_v55 = vadd.f32 1.0, %v1307_v53  ;;  %v1118_v53 = vld [vmem:[%s1751_s3 + $0x8] sm:$0x1] }
0x10a8   :  { %v1309_v54 = vpop.eup %1308 }
0x10a9   :  { %v1050_v57 = vadd.f32 1.0, %v1309_v54  ;;  %1310 = vrcp.f32 %v1049_v55  ;;  %v1062_v11 = vand.u32 2147483648, %v1049_v55  ;;  %vm1056_vm6 = vweird.f32 %v1049_v55 }
0x10aa   :  { %v1060_v13 = vand.u32 2147483647, %v1049_v55 }
0x10ab   :  { %1312 = vrcp.f32 %v1050_v57  ;;  %v1077_v16 = vand.u32 2147483648, %v1050_v57  ;;  %vm1071_vm9 = vweird.f32 %v1050_v57  ;;  %v1075_v18 = vand.u32 2147483647, %v1050_v57 }
0x10ac   :  { %v1063_v19 = vor.u32 1.1754944e-38, %v1062_v11  ;;  %vm1061_vm12 = vcmp.eq.f32.partialorder %v1060_v13, 8.507059e+37 }
0x10ad   :  { %v1078_v25 = vor.u32 1.1754944e-38, %v1077_v16  ;;  %vm1076_vm13 = vcmp.eq.f32.partialorder %v1075_v18, 8.507059e+37 }
0x10af   :  { %v1311_v58 = vpop.eup %1310 }
0x10b0   :  { %v1052_v63 = vmul.f32 %v1311_v58, %v1049_v55  ;;  %vm1057_vm1 = vweird.f32 %v1311_v58  ;;  %v855_v55 = vld [vmem:[%s1751_s3 + $0x2] sm:$0x1] }
0x10b1   :  { %v1313_v60 = vpop.eup %1312  ;;  %vm1058_vm8 = vmor %vm1056_vm6, %vm1057_vm1 }
0x10b2   :  { %v1067_v1 = vmul.f32 %v1313_v60, %v1050_v57  ;;  %v1053_v3 = vsub.f32 1.0, %v1052_v63  ;;  %vm1072_vm7 = vweird.f32 %v1313_v60 }
0x10b3   :  { %vm1073_vm11 = vmor %vm1071_vm9, %vm1072_vm7 }
0x10b4   :  { %v1068_v6 = vsub.f32 1.0, %v1067_v1  ;;  %v1054_v7 = vmul.f32 %v1311_v58, %v1053_v3 }
0x10b6   :  { %v1069_v9 = vmul.f32 %v1313_v60, %v1068_v6  ;;  %v1055_v10 = vadd.f32 %v1311_v58, %v1054_v7 }
0x10b8   :  { %v1070_v14 = vadd.f32 %v1313_v60, %v1069_v9  ;;  %v1059_v17 = vsel %vm1058_vm8, %v1311_v58, %v1055_v10 }
0x10b9   :  { %v1573_v24 = vsel %vm1061_vm12, %v1063_v19, %v1059_v17 }
0x10ba   :  { %v1074_v21 = vsel %vm1073_vm11, %v1313_v60, %v1070_v14  ;;  %v987_v60 = vld [vmem:[%s1751_s3 + $0x9] sm:$0x1]  ;;  %v1101_v16 = vsub.f32 1.0, %v1573_v24 }
0x10bb   :  { %v1576_v28 = vsel %vm1076_vm13, %v1078_v25, %v1074_v21  ;;  %v1113_v21 = vmul.f32 %v1573_v24, %v1542_v31 }
0x10bc   :  { %v1102_v18 = vsub.f32 1.0, %v1576_v28 }
0x110e   :  { %v1082_v22 = vpop.permute.xlu1 %1081 }
0x110f   :  { %v1087_v26 = vmul.f32 %v1082_v22, %v1573_v24 }
0x1110   :  { %v1084_v27 = vpop.permute.xlu0 %1083 }
0x1111   :  { %v1088_v29 = vmul.f32 %v1084_v27, %v1576_v28  ;;  %1091 = vrot.lane.b32.xlu0 %v1087_v26, %s1320_s20 }
0x1113   :  { %1093 = vrot.lane.b32.xlu2 %v1088_v29, %s1320_s20 }
0x1116   :  { %v203_v30 = vpop.permute.xlu1 %202 }
0x1117   :  { %v208_v32 = vmul.f32 %v203_v30, %v1386_v0  ;;  %v593_v0 = vld [vmem:[%s1751_s3 + $0x4] sm:$0x1] }
0x1119   :  { %212 = vrot.lane.b32.xlu0 %v208_v32, %s1322_s26 }
0x111b   :  { %204 = vrot.lane.b32.xlu2 %v199_v33, %s1321_s25 }
0x1121   :  { %337 = vrot.lane.b32.xlu0 %v332_v35, %s1321_s25 }
0x1123   :  { %335 = vrot.lane.b32.xlu2 %v331_v36, %s1321_s25 }
0x1129   :  { %597 = vrot.lane.b32.xlu0 %v593_v0, %s1321_s25 }
0x112b   :  { %468 = vrot.lane.b32.xlu2 %v463_v37, %s1321_s25 }
0x1131   :  { %730 = vrot.lane.b32.xlu0 %v725_v38, %s1321_s25 }
0x1133   :  { %728 = vrot.lane.b32.xlu2 %v724_v39, %s1321_s25 }
0x1139   :  { %990 = vrot.lane.b32.xlu0 %v986_v40, %s1321_s25 }
0x113b   :  { %861 = vrot.lane.b32.xlu2 %v856_v41, %s1321_s25 }
0x116d   :  { %v1094_v42 = vpop.permute.xlu2 %1093 }
0x116e   :  { %v1098_v43 = vadd.f32 %v1094_v42, %v1569_v5  ;;  %v462_v5 = vld [vmem:[%s1751_s3 + $0x5] sm:$0x1] }
0x1170   :  { %1314 = vtanh.f32 %v1098_v43 }
0x1175   :  { %v205_v44 = vpop.permute.xlu2 %204 }
0x1176   :  { %v1315_v45 = vpop.eup %1314  ;;  %v209_v46 = vmul.f32 %v205_v44, %v1382_v56  ;;  %v1117_v56 = vld [vmem:[%s1751_s3] sm:$0x1] }
0x1177   :  { %1107 = vrot.lane.b32.xlu2 %v1315_v45, %s1322_s26 }
0x1178   :  { %214 = vrot.lane.b32.xlu1 %v209_v46, %s1322_s26 }
0x117d   :  { %v336_v47 = vpop.permute.xlu2 %335 }
0x117e   :  { %v341_v49 = vmul.f32 %v336_v47, %v1407_v59 }
0x117f   :  { %1121 = vrot.lane.b32.xlu2 %v1117_v56, %s1321_s25 }
0x1180   :  { %345 = vrot.lane.b32.xlu1 %v341_v49, %s1322_s26 }
0x1183   :  { %v1092_v50 = vpop.permute.xlu0 %1091 }
0x1184   :  { %v1097_v51 = vadd.f32 %v1092_v50, %v1564_v48  ;;  %v594_v48 = vld [vmem:[%s1751_s3 + $0xc] sm:$0x1] }
0x1185   :  { %v469_v54 = vpop.permute.xlu2 %468 }
0x1186   :  { %1316 = vtanh.f32 %v1097_v51  ;;  %v473_v57 = vmul.f32 %v469_v54, %v1436_v2 }
0x1188   :  { %466 = vrot.lane.b32.xlu1 %v462_v5, %s1321_s25 }
0x118b   :  { %v213_v59 = vpop.permute.xlu0 %212 }
0x118c   :  { %v1317_v52 = vpop.eup %1316  ;;  %219 = vst.msk [vmem:[%s1752_s4 + $0x7] sm:$0x1] %vm218_vm14, %v213_v59 }
0x118d   :  { %1105 = vrot.lane.b32.xlu0 %v1317_v52, %s1322_s26  ;;  %v729_v63 = vpop.permute.xlu2 %728 }
0x118e   :  { %v734_v1 = vmul.f32 %v729_v63, %v1485_v12 }
0x1190   :  { %599 = vrot.lane.b32.xlu1 %v594_v48, %s1321_s25 }
0x1193   :  { %v338_v58 = vpop.permute.xlu0 %337 }
0x1194   :  { %v342_v3 = vmul.f32 %v338_v58, %v1410_v62 }
0x1195   :  { %1123 = vrot.lane.b32.xlu0 %v1118_v53, %s1321_s25  ;;  %v862_v7 = vpop.permute.xlu2 %861 }
0x1196   :  { %v866_v2 = vmul.f32 %v862_v7, %v1514_v23 }
0x1198   :  { %859 = vrot.lane.b32.xlu1 %v855_v55, %s1321_s25 }
0x119b   :  { %v598_v6 = vpop.permute.xlu0 %597 }
0x119c   :  { %v603_v9 = vmul.f32 %v598_v6, %v1459_v4 }
0x119d   :  { %478 = vrot.lane.b32.xlu0 %v473_v57, %s1322_s26 }
0x11a0   :  { %992 = vrot.lane.b32.xlu1 %v987_v60, %s1321_s25 }
0x11a3   :  { %v731_v10 = vpop.permute.xlu0 %730 }
0x11a4   :  { %v735_v11 = vmul.f32 %v731_v10, %v1488_v15 }
0x11a5   :  { %738 = vrot.lane.b32.xlu0 %v734_v1, %s1322_s26 }
0x11a8   :  { %347 = vrot.lane.b32.xlu1 %v342_v3, %s1322_s26 }
0x11ab   :  { %v991_v12 = vpop.permute.xlu0 %990 }
0x11ac   :  { %v996_v62 = vmul.f32 %v991_v12, %v1542_v31 }
0x11ad   :  { %871 = vrot.lane.b32.xlu0 %v866_v2, %s1322_s26 }
0x11b0   :  { %607 = vrot.lane.b32.xlu1 %v603_v9, %s1322_s26 }
0x11b8   :  { %740 = vrot.lane.b32.xlu1 %v735_v11, %s1322_s26 }
0x11c0   :  { %1000 = vrot.lane.b32.xlu1 %v996_v62, %s1322_s26 }
0x11d1   :  { %v1108_v4 = vpop.permute.xlu2 %1107 }
0x11d2   :  { %v1112_v25 = vmul.f32 %v1108_v4, %v1102_v18 }
0x11d9   :  { %v1122_v22 = vpop.permute.xlu2 %1121 }
0x11ea   :  { %v215_v13 = vpop.permute.xlu1 %214 }
0x11eb   :  { %220 = vst.msk [vmem:[%s1752_s4 + $0xf] sm:$0x1] %vm218_vm14, %v215_v13 }
0x11f2   :  { %v346_v23 = vpop.permute.xlu1 %345 }
0x11f3   :  { %351 = vst.msk [vmem:[%s1752_s4 + $0x6] sm:$0x1] %vm218_vm14, %v346_v23 }
0x11fa   :  { %v467_v15 = vpop.permute.xlu1 %466 }
0x11fb   :  { %v472_v14 = vmul.f32 %v467_v15, %v1433_v61  ;;  %v1114_v61 = vmul.f32 %v1576_v28, %v1545_v34 }
0x11fd   :  { %476 = vrot.lane.b32.xlu2 %v472_v14, %s1322_s26  ;;  %v1116_v32 = vadd.f32 %v1114_v61, %v1112_v25 }
0x11ff   :  { %v1106_v17 = vpop.permute.xlu0 %1105 }
0x1200   :  { %v1111_v19 = vmul.f32 %v1106_v17, %v1101_v16 }
0x1202   :  { %v600_v26 = vpop.permute.xlu1 %599  ;;  %v1115_v27 = vadd.f32 %v1113_v21, %v1111_v19 }
0x1203   :  { %v604_v29 = vmul.f32 %v600_v26, %v1462_v8 }
0x1204   :  { %v1127_v30 = vmul.f32 %v1122_v22, %v1115_v27 }
0x1205   :  { %609 = vrot.lane.b32.xlu2 %v604_v29, %s1322_s26 }
0x1206   :  { %1131 = vrot.lane.b32.xlu0 %v1127_v30, %s1322_s26 }
0x1207   :  { %v1124_v33 = vpop.permute.xlu0 %1123 }
0x1208   :  { %v1128_v35 = vmul.f32 %v1124_v33, %v1116_v32 }
0x120a   :  { %v860_v36 = vpop.permute.xlu1 %859  ;;  %1133 = vrot.lane.b32.xlu1 %v1128_v35, %s1322_s26 }
0x120b   :  { %v865_v31 = vmul.f32 %v860_v36, %v1511_v20  ;;  %v1141_v20 = vrot.slane %v1116_v32, 7 }
0x120d   :  { %869 = vrot.lane.b32.xlu2 %v865_v31, %s1322_s26  ;;  %v1142_v38 = vsel %vm230_vm10, %v1141_v20, %v1115_v27 }
0x120f   :  { %v479_v24 = vpop.permute.xlu0 %478 }
0x1210   :  { %483 = vst.msk [vmem:[%s1752_s4 + $0xd] sm:$0x1] %vm218_vm14, %v479_v24 }
0x1212   :  { %v993_v8 = vpop.permute.xlu1 %992 }
0x1213   :  { %v997_v28 = vmul.f32 %v993_v8, %v1545_v34 }
0x1215   :  { %1002 = vrot.lane.b32.xlu2 %v997_v28, %s1322_s26 }
0x1217   :  { %v739_v0 = vpop.permute.xlu0 %738 }
0x1218   :  { %744 = vst.msk [vmem:[%s1752_s4 + $0x3] sm:$0x1] %vm218_vm14, %v739_v0 }
0x121a   :  { %v348_v37 = vpop.permute.xlu1 %347 }
0x121b   :  { %352 = vst.msk [vmem:[%s1752_s4 + $0xe] sm:$0x1] %vm218_vm14, %v348_v37 }
0x121d   :  { %1143 = vrot.lane.b32.xlu2 %v1142_v38, %s1322_s26 }
0x121f   :  { %v872_v34 = vpop.permute.xlu0 %871 }
0x1220   :  { %876 = vst.msk [vmem:[%s1752_s4 + $0xa] sm:$0x1] %vm218_vm14, %v872_v34 }
0x1222   :  { %v608_v39 = vpop.permute.xlu1 %607 }
0x1223   :  { %613 = vst.msk [vmem:[%s1752_s4 + $0x4] sm:$0x1] %vm218_vm14, %v608_v39 }
0x122a   :  { %v741_v40 = vpop.permute.xlu1 %740 }
0x122b   :  { %745 = vst.msk [vmem:[%s1752_s4 + $0xb] sm:$0x1] %vm218_vm14, %v741_v40 }
0x1232   :  { %v1001_v41 = vpop.permute.xlu1 %1000 }
0x1233   :  { %1006 = vst.msk [vmem:[%s1752_s4 + $0x1] sm:$0x1] %vm218_vm14, %v1001_v41 }
0x1257   :  { %v477_v42 = vpop.permute.xlu2 %476 }
0x1258   :  { %482 = vst.msk [vmem:[%s1752_s4 + $0x5] sm:$0x1] %vm218_vm14, %v477_v42 }
0x125f   :  { %v610_v43 = vpop.permute.xlu2 %609 }
0x1260   :  { %614 = vst.msk [vmem:[%s1752_s4 + $0xc] sm:$0x1] %vm218_vm14, %v610_v43 }
0x1267   :  { %v870_v44 = vpop.permute.xlu2 %869 }
0x1268   :  { %875 = vst.msk [vmem:[%s1752_s4 + $0x2] sm:$0x1] %vm218_vm14, %v870_v44 }
0x126f   :  { %v1003_v45 = vpop.permute.xlu2 %1002 }
0x1270   :  { %1007 = vst.msk [vmem:[%s1752_s4 + $0x9] sm:$0x1] %vm218_vm14, %v1003_v45 }
0x1277   :  { %v1144_v46 = vpop.permute.xlu2 %1143 }
0x1278   :  { %1147 = vst.msk [vmem:[#allocation2] sm:$0x3] %vm67_vm0, %v1144_v46  ;;  %v1132_v47 = vpop.permute.xlu0 %1131 }
0x1279   :  { %1137 = vst.msk [vmem:[%s1752_s4] sm:$0x1] %vm218_vm14, %v1132_v47 }
0x127c   :  { %v1134_v49 = vpop.permute.xlu1 %1133 }
0x127d   :  { %1138 = vst.msk [vmem:[%s1752_s4 + $0x8] sm:$0x1] %vm218_vm14, %v1134_v49 }

// kernel: rnn_block_forward.6
= control target key start
LH: loop header
LB: loop body
LE: loop exit
PB: predicated region body
PF: predicated region fallthrough
CT: control target
= control target key end

     0   :  { %vm22_vm0 = vcmask 254976   ;;  %v1243_v1 = vmov 0.0   ;;  %vm48_vm1 = vcmask 261120   ;;  %s1244_s20 = smov 64   ;;  %s1245_s25 = smov 32   ;;  %vm185_vm10 = vcmask 1041409   ;;  %s1672_s1 = inlined_call_operand.vmem [shape: bf16[32,96], index: 1, kind: input, shape index: {}]   ;;  %s1673_s2 = inlined_call_operand.vmem [shape: f32[1,96], index: 2, kind: input, shape index: {}]   ;;  %s1674_s0 = inlined_call_operand.vmem [shape: f32[2,8,96], index: 0, kind: input, shape index: {}]   ;;  %s1675_s3 = inlined_call_operand.vmem [shape: f32[2,8,32], index: 3, kind: input, shape index: {}]   ;;  %s1676_s4 = inlined_call_operand.vmem [shape: f32[2,8,32], index: 4, kind: output, shape index: {}]  }
   0x1   :  { %v1140_v0 = vld [vmem:[%s1672_s1 + $0x8] sm:$0xff]  ;;  %23 = vst.msk [vmem:[#allocation2] sm:$0x3] %vm22_vm0, %v1243_v1  ;;  %v1139_v2 = vld [vmem:[%s1672_s1] sm:$0xff]  ;;  %s1246_s26 = smov 96  }
   0x2   :  { %58 = vmatpush.bf16.msra.mxu0 %v1140_v0  ;;  %199 = vmatpush.bf16.msra.mxu1 %v1140_v0  ;;  %v1287_v5 = vld [vmem:[%s1673_s2] ss:$0 sm:$0xff]  ;;  %v31_v10 = vld [vmem:[%s1674_s0 + $0x8] sm:$0x1] }
   0x3   :  { %330 = vmatpush.bf16.msra.mxu2 %v1140_v0  ;;  %461 = vmatpush.bf16.msra.mxu3 %v1140_v0  ;;  %v30_v13 = vld [vmem:[%s1674_s0] sm:$0x1] }
   0x6   :  { %59 = vmatpush.bf16.msra.mxu0 %v1139_v2  ;;  %200 = vmatpush.bf16.msra.mxu1 %v1139_v2 }
   0x7   :  { %331 = vmatpush.bf16.msra.mxu2 %v1139_v2  ;;  %462 = vmatpush.bf16.msra.mxu3 %v1139_v2 }
   0x8   :  { %v1279_v3 = vld [vmem:[#allocation2] sm:$0x3] }
   0x9   :  { %v32_v4 = vpack.c.bf16 %v1279_v3, %v1279_v3  ;;  %v142_v49 = vrot.slane %v1279_v3, 1 }
   0xa   :  { %592 = vmatpush.bf16.msrb.mxu0 %v1140_v0  ;;  %723 = vmatpush.bf16.msrb.mxu1 %v1140_v0 }
   0xb   :  { %854 = vmatpush.bf16.msrb.mxu2 %v1140_v0  ;;  %985 = vmatpush.bf16.msrb.mxu3 %v1140_v0 }
   0xc   :  { %1115 = vmatmul.msk.bf16.vlgmr.msra.gmra.mxu0 %vm48_vm1, %v32_v4 }
   0xe   :  { %593 = vmatpush.bf16.msrb.mxu0 %v1139_v2  ;;  %724 = vmatpush.bf16.msrb.mxu1 %v1139_v2 }
   0xf   :  { %855 = vmatpush.bf16.msrb.mxu2 %v1139_v2  ;;  %986 = vmatpush.bf16.msrb.mxu3 %v1139_v2 }
  0x89   :  { %v61_v6 = vpop.f32.mrf.mxu0 }
  0x8a   :  { %v62_v7 = vadd.f32 %v1287_v5, %v61_v6 }
  0x8c   :  { %v66_v8 = vrot.slane %v62_v7, 1  ;;  %v69_v14 = vadd.f32 %v62_v7, %v30_v13 }
  0x8e   :  { %111 = vrot.lane.b32.xlu0 %v66_v8, %s1244_s20  ;;  %v70_v11 = vadd.f32 %v66_v8, %v31_v10  ;;  %v1116_v15 = vmul.f32 -1.442695, %v69_v14 }
  0x90   :  { %v1117_v12 = vmul.f32 -1.442695, %v70_v11 }
  0x91   :  { %v63_v9 = vpop.f32.mrf.mxu0 }
  0x92   :  { %1146 = vpow2.f32 %v1117_v12  ;;  %v176_v12 = vld [vmem:[%s1674_s0 + $0x1] sm:$0x1] }
  0x93   :  { %1148 = vpow2.f32 %v1116_v15 }
  0x96   :  { %109 = vrot.lane.b32.xlu0 %v62_v7, %s1244_s20 }
  0x98   :  { %v1147_v16 = vpop.eup %1146 }
  0x99   :  { %v78_v17 = vadd.f32 1.0, %v1147_v16  ;;  %v1149_v18 = vpop.eup %1148 }
  0x9a   :  { %v77_v19 = vadd.f32 1.0, %v1149_v18 }
  0x9b   :  { %1150 = vrcp.f32 %v78_v17  ;;  %v105_v28 = vand.u32 2147483648, %v78_v17  ;;  %vm99_vm3 = vweird.f32 %v78_v17  ;;  %v103_v29 = vand.u32 2147483647, %v78_v17 }
  0x9c   :  { %1152 = vrcp.f32 %v77_v19  ;;  %v90_v37 = vand.u32 2147483648, %v77_v19  ;;  %vm84_vm7 = vweird.f32 %v77_v19  ;;  %v88_v38 = vand.u32 2147483647, %v77_v19 }
  0x9d   :  { %v106_v32 = vor.u32 1.1754944e-38, %v105_v28  ;;  %vm104_vm5 = vcmp.eq.f32.partialorder %v103_v29, 8.507059e+37 }
  0x9e   :  { %v91_v40 = vor.u32 1.1754944e-38, %v90_v37  ;;  %vm89_vm9 = vcmp.eq.f32.partialorder %v88_v38, 8.507059e+37 }
  0xa1   :  { %v1151_v20 = vpop.eup %1150 }
  0xa2   :  { %v95_v21 = vmul.f32 %v1151_v20, %v78_v17  ;;  %v1153_v23 = vpop.eup %1152  ;;  %vm100_vm2 = vweird.f32 %v1151_v20 }
  0xa3   :  { %v80_v25 = vmul.f32 %v1153_v23, %v77_v19  ;;  %vm101_vm4 = vmor %vm99_vm3, %vm100_vm2  ;;  %vm85_vm6 = vweird.f32 %v1153_v23 }
  0xa4   :  { %v96_v22 = vsub.f32 1.0, %v95_v21  ;;  %vm86_vm8 = vmor %vm84_vm7, %vm85_vm6 }
  0xa5   :  { %v81_v27 = vsub.f32 1.0, %v80_v25 }
  0xa6   :  { %v97_v24 = vmul.f32 %v1151_v20, %v96_v22 }
  0xa7   :  { %v82_v31 = vmul.f32 %v1153_v23, %v81_v27 }
  0xa8   :  { %v98_v26 = vadd.f32 %v1151_v20, %v97_v24 }
  0xa9   :  { %v83_v36 = vadd.f32 %v1153_v23, %v82_v31 }
  0xaa   :  { %v102_v30 = vsel %vm101_vm4, %v1151_v20, %v98_v26 }
  0xab   :  { %v107_v34 = vsel %vm104_vm5, %v106_v32, %v102_v30  ;;  %v87_v39 = vsel %vm86_vm8, %v1153_v23, %v83_v36 }
  0xac   :  { %v92_v42 = vsel %vm89_vm9, %v91_v40, %v87_v39  ;;  %v130_v53 = vsub.f32 1.0, %v107_v34 }
  0xad   :  { %v129_v59 = vsub.f32 1.0, %v92_v42 }
 0x100   :  { %v112_v33 = vpop.permute.xlu0 %111 }
 0x101   :  { %v116_v35 = vmul.f32 %v112_v33, %v107_v34 }
 0x103   :  { %121 = vrot.lane.b32.xlu1 %v116_v35, %s1244_s20 }
 0x108   :  { %v110_v41 = vpop.permute.xlu0 %109 }
 0x109   :  { %v115_v43 = vmul.f32 %v110_v41, %v92_v42 }
 0x10b   :  { %119 = vrot.lane.b32.xlu1 %v115_v43, %s1244_s20 }
 0x113   :  { %143 = vrot.lane.b32.xlu1 %v1279_v3, %s1245_s25 }
 0x175   :  { %v122_v44 = vpop.permute.xlu1 %121 }
 0x176   :  { %v126_v45 = vadd.f32 %v122_v44, %v31_v10 }
 0x178   :  { %1154 = vtanh.f32 %v126_v45 }
 0x17d   :  { %v120_v46 = vpop.permute.xlu1 %119 }
 0x17e   :  { %v1155_v47 = vpop.eup %1154  ;;  %v125_v48 = vadd.f32 %v120_v46, %v30_v13  ;;  %v177_v13 = vld [vmem:[%s1674_s0 + $0x9] sm:$0x1] }
 0x17f   :  { %135 = vrot.lane.b32.xlu2 %v1155_v47, %s1246_s26 }
 0x180   :  { %1156 = vtanh.f32 %v125_v48 }
 0x185   :  { %v144_v57 = vpop.permute.xlu1 %143 }
 0x186   :  { %v1157_v50 = vpop.eup %1156  ;;  %v149_v61 = vmul.f32 %v144_v57, %v92_v42 }
 0x187   :  { %145 = vrot.lane.b32.xlu2 %v142_v49, %s1245_s25  ;;  %133 = vrot.lane.b32.xlu0 %v1157_v50, %s1246_s26 }
 0x1d9   :  { %v136_v51 = vpop.permute.xlu2 %135 }
 0x1da   :  { %v140_v55 = vmul.f32 %v136_v51, %v130_v53 }
 0x1e1   :  { %v146_v52 = vpop.permute.xlu2 %145 }
 0x1e2   :  { %v150_v54 = vmul.f32 %v146_v52, %v107_v34 }
 0x1e4   :  { %v1306_v56 = vadd.f32 %v150_v54, %v140_v55 }
 0x1e6   :  { %v179_v58 = vpack.c.bf16 %v1306_v56, %v1306_v56 }
 0x1e8   :  { %v183_v63 = vunpack.c.l.b16 %v179_v58 }
 0x1ea   :  { %v184_v2 = vrot.slane %v183_v63, 7 }
 0x1f9   :  { %v134_v60 = vpop.permute.xlu0 %133 }
 0x1fa   :  { %v139_v62 = vmul.f32 %v134_v60, %v129_v59 }
 0x1fc   :  { %v1310_v0 = vadd.f32 %v149_v61, %v139_v62 }
 0x1fe   :  { %v178_v1 = vpack.c.bf16 %v1310_v0, %v1310_v0 }
 0x200   :  { %v182_v3 = vunpack.c.l.b16 %v178_v1 }
 0x202   :  { %v186_v4 = vsel %vm185_vm10, %v184_v2, %v182_v3 }
 0x203   :  { %v187_v6 = vpack.c.b16 %v186_v4, %v186_v4 }
 0x205   :  { %188 = vrot.lane.b32.xlu2 %v187_v6, %s1246_s26 }
 0x25f   :  { %v189_v7 = vpop.permute.xlu2 %188 }
 0x260   :  { %1118 = vmatmul.msk.bf16.vlgmr.msra.gmra.mxu1 %vm48_vm1, %v189_v7 }
 0x2dd   :  { %v202_v8 = vpop.f32.mrf.mxu1 }
 0x2de   :  { %v203_v9 = vadd.f32 %v1287_v5, %v202_v8 }
 0x2e0   :  { %250 = vrot.lane.b32.xlu1 %v203_v9, %s1244_s20  ;;  %v207_v10 = vrot.slane %v203_v9, 1  ;;  %v210_v14 = vadd.f32 %v203_v9, %v176_v12 }
 0x2e2   :  { %252 = vrot.lane.b32.xlu0 %v207_v10, %s1244_s20  ;;  %v211_v15 = vadd.f32 %v207_v10, %v177_v13  ;;  %v1119_v16 = vmul.f32 -1.442695, %v210_v14 }
 0x2e4   :  { %v1120_v17 = vmul.f32 -1.442695, %v211_v15  ;;  %1158 = vpow2.f32 %v1119_v16 }
 0x2e5   :  { %v204_v11 = vpop.f32.mrf.mxu1 }
 0x2e6   :  { %1160 = vpow2.f32 %v1120_v17 }
 0x2ea   :  { %v1159_v18 = vpop.eup %1158 }
 0x2eb   :  { %v218_v20 = vadd.f32 1.0, %v1159_v18  ;;  %v309_v18 = vld [vmem:[%s1674_s0 + $0xa] sm:$0x1] }
 0x2ec   :  { %v1161_v19 = vpop.eup %1160 }
 0x2ed   :  { %v219_v21 = vadd.f32 1.0, %v1161_v19  ;;  %1162 = vrcp.f32 %v218_v20  ;;  %v231_v31 = vand.u32 2147483648, %v218_v20  ;;  %vm225_vm12 = vweird.f32 %v218_v20 }
 0x2ee   :  { %v229_v32 = vand.u32 2147483647, %v218_v20 }
 0x2ef   :  { %1164 = vrcp.f32 %v219_v21  ;;  %v246_v34 = vand.u32 2147483648, %v219_v21  ;;  %vm240_vm15 = vweird.f32 %v219_v21  ;;  %v244_v36 = vand.u32 2147483647, %v219_v21 }
 0x2f0   :  { %v232_v37 = vor.u32 1.1754944e-38, %v231_v31  ;;  %vm230_vm3 = vcmp.eq.f32.partialorder %v229_v32, 8.507059e+37 }
 0x2f1   :  { %v247_v41 = vor.u32 1.1754944e-38, %v246_v34  ;;  %vm245_vm4 = vcmp.eq.f32.partialorder %v244_v36, 8.507059e+37 }
 0x2f3   :  { %v1163_v22 = vpop.eup %1162 }
 0x2f4   :  { %v221_v24 = vmul.f32 %v1163_v22, %v218_v20  ;;  %vm226_vm11 = vweird.f32 %v1163_v22 }
 0x2f5   :  { %v1165_v23 = vpop.eup %1164  ;;  %vm227_vm14 = vmor %vm225_vm12, %vm226_vm11 }
 0x2f6   :  { %v236_v25 = vmul.f32 %v1165_v23, %v219_v21  ;;  %v222_v26 = vsub.f32 1.0, %v221_v24  ;;  %vm241_vm13 = vweird.f32 %v1165_v23 }
 0x2f7   :  { %vm242_vm2 = vmor %vm240_vm15, %vm241_vm13 }
 0x2f8   :  { %v237_v27 = vsub.f32 1.0, %v236_v25  ;;  %v223_v28 = vmul.f32 %v1163_v22, %v222_v26 }
 0x2fa   :  { %v238_v29 = vmul.f32 %v1165_v23, %v237_v27  ;;  %v224_v30 = vadd.f32 %v1163_v22, %v223_v28 }
 0x2fc   :  { %v239_v33 = vadd.f32 %v1165_v23, %v238_v29  ;;  %v228_v35 = vsel %vm227_vm14, %v1163_v22, %v224_v30 }
 0x2fd   :  { %v233_v40 = vsel %vm230_vm3, %v232_v37, %v228_v35 }
 0x2fe   :  { %v243_v38 = vsel %vm242_vm2, %v1165_v23, %v239_v33  ;;  %v270_v52 = vsub.f32 1.0, %v233_v40  ;;  %v282_v54 = vmul.f32 %v233_v40, %v1310_v0 }
 0x2ff   :  { %v248_v44 = vsel %vm245_vm4, %v247_v41, %v243_v38 }
 0x300   :  { %v271_v57 = vsub.f32 1.0, %v248_v44  ;;  %v283_v60 = vmul.f32 %v248_v44, %v1306_v56 }
 0x352   :  { %v251_v39 = vpop.permute.xlu1 %250 }
 0x353   :  { %v256_v42 = vmul.f32 %v251_v39, %v233_v40 }
 0x354   :  { %v253_v43 = vpop.permute.xlu0 %252 }
 0x355   :  { %v257_v45 = vmul.f32 %v253_v43, %v248_v44  ;;  %260 = vrot.lane.b32.xlu0 %v256_v42, %s1244_s20 }
 0x357   :  { %262 = vrot.lane.b32.xlu2 %v257_v45, %s1244_s20 }
 0x3b1   :  { %v263_v46 = vpop.permute.xlu2 %262 }
 0x3b2   :  { %v267_v47 = vadd.f32 %v263_v46, %v177_v13  ;;  %v308_v13 = vld [vmem:[%s1674_s0 + $0x2] sm:$0x1] }
 0x3b4   :  { %1166 = vtanh.f32 %v267_v47 }
 0x3ba   :  { %v1167_v48 = vpop.eup %1166 }
 0x3bb   :  { %276 = vrot.lane.b32.xlu1 %v1167_v48, %s1246_s26 }
 0x3c7   :  { %v261_v49 = vpop.permute.xlu0 %260 }
 0x3c8   :  { %v266_v50 = vadd.f32 %v261_v49, %v176_v12 }
 0x3ca   :  { %1168 = vtanh.f32 %v266_v50 }
 0x3d0   :  { %v1169_v51 = vpop.eup %1168 }
 0x3d1   :  { %274 = vrot.lane.b32.xlu2 %v1169_v51, %s1246_s26 }
 0x42b   :  { %v275_v53 = vpop.permute.xlu2 %274 }
 0x42c   :  { %v280_v55 = vmul.f32 %v275_v53, %v270_v52 }
 0x42d   :  { %v277_v58 = vpop.permute.xlu1 %276 }
 0x42e   :  { %v1331_v59 = vadd.f32 %v282_v54, %v280_v55  ;;  %v281_v61 = vmul.f32 %v277_v58, %v271_v57 }
 0x430   :  { %v1334_v62 = vadd.f32 %v283_v60, %v281_v61  ;;  %v310_v63 = vpack.c.bf16 %v1331_v59, %v1331_v59 }
 0x432   :  { %v311_v1 = vpack.c.bf16 %v1334_v62, %v1334_v62  ;;  %v314_v3 = vunpack.c.l.b16 %v310_v63 }
 0x434   :  { %v315_v2 = vunpack.c.l.b16 %v311_v1 }
 0x436   :  { %v316_v4 = vrot.slane %v315_v2, 7 }
 0x438   :  { %v317_v6 = vsel %vm185_vm10, %v316_v4, %v314_v3 }
 0x439   :  { %v318_v7 = vpack.c.b16 %v317_v6, %v317_v6 }
 0x43b   :  { %319 = vrot.lane.b32.xlu0 %v318_v7, %s1246_s26 }
 0x4ad   :  { %v320_v8 = vpop.permute.xlu0 %319 }
 0x4ae   :  { %1121 = vmatmul.msk.bf16.vlgmr.msra.gmra.mxu2 %vm48_vm1, %v320_v8 }
 0x531   :  { %v333_v9 = vpop.f32.mrf.mxu2 }
 0x532   :  { %v334_v10 = vadd.f32 %v1287_v5, %v333_v9 }
 0x534   :  { %381 = vrot.lane.b32.xlu2 %v334_v10, %s1244_s20  ;;  %v338_v11 = vrot.slane %v334_v10, 1  ;;  %v341_v14 = vadd.f32 %v334_v10, %v308_v13 }
 0x536   :  { %383 = vrot.lane.b32.xlu1 %v338_v11, %s1244_s20  ;;  %v1122_v15 = vmul.f32 -1.442695, %v341_v14  ;;  %v342_v19 = vadd.f32 %v338_v11, %v309_v18 }
 0x538   :  { %1170 = vpow2.f32 %v1122_v15  ;;  %v1123_v21 = vmul.f32 -1.442695, %v342_v19 }
 0x539   :  { %v335_v12 = vpop.f32.mrf.mxu2 }
 0x53e   :  { %v1171_v16 = vpop.eup %1170 }
 0x53f   :  { %v349_v17 = vadd.f32 1.0, %v1171_v16  ;;  %v440_v16 = vld [vmem:[%s1674_s0 + $0xb] sm:$0x1] }
 0x541   :  { %1172 = vrcp.f32 %v349_v17  ;;  %v362_v28 = vand.u32 2147483648, %v349_v17  ;;  %vm356_vm6 = vweird.f32 %v349_v17  ;;  %v360_v29 = vand.u32 2147483647, %v349_v17 }
 0x542   :  { %1174 = vpow2.f32 %v1123_v21  ;;  %v439_v21 = vld [vmem:[%s1674_s0 + $0x3] sm:$0x1] }
 0x543   :  { %v363_v31 = vor.u32 1.1754944e-38, %v362_v28  ;;  %vm361_vm8 = vcmp.eq.f32.partialorder %v360_v29, 8.507059e+37 }
 0x547   :  { %v1173_v20 = vpop.eup %1172 }
 0x548   :  { %v352_v22 = vmul.f32 %v1173_v20, %v349_v17  ;;  %v1175_v25 = vpop.eup %1174  ;;  %vm357_vm5 = vweird.f32 %v1173_v20 }
 0x549   :  { %v350_v27 = vadd.f32 1.0, %v1175_v25  ;;  %vm358_vm7 = vmor %vm356_vm6, %vm357_vm5 }
 0x54a   :  { %v353_v23 = vsub.f32 1.0, %v352_v22 }
 0x54b   :  { %1176 = vrcp.f32 %v350_v27  ;;  %v377_v40 = vand.u32 2147483648, %v350_v27  ;;  %vm371_vm11 = vweird.f32 %v350_v27  ;;  %v375_v41 = vand.u32 2147483647, %v350_v27 }
 0x54c   :  { %v354_v24 = vmul.f32 %v1173_v20, %v353_v23 }
 0x54d   :  { %v378_v43 = vor.u32 1.1754944e-38, %v377_v40  ;;  %vm376_vm13 = vcmp.eq.f32.partialorder %v375_v41, 8.507059e+37 }
 0x54e   :  { %v355_v26 = vadd.f32 %v1173_v20, %v354_v24 }
 0x550   :  { %v359_v30 = vsel %vm358_vm7, %v1173_v20, %v355_v26 }
 0x551   :  { %v364_v33 = vsel %vm361_vm8, %v363_v31, %v359_v30  ;;  %v1177_v35 = vpop.eup %1176 }
 0x552   :  { %v367_v36 = vmul.f32 %v1177_v35, %v350_v27  ;;  %vm372_vm9 = vweird.f32 %v1177_v35  ;;  %v401_v53 = vsub.f32 1.0, %v364_v33  ;;  %v413_v55 = vmul.f32 %v364_v33, %v1331_v59 }
 0x553   :  { %vm373_vm12 = vmor %vm371_vm11, %vm372_vm9 }
 0x554   :  { %v368_v37 = vsub.f32 1.0, %v367_v36 }
 0x556   :  { %v369_v38 = vmul.f32 %v1177_v35, %v368_v37 }
 0x558   :  { %v370_v39 = vadd.f32 %v1177_v35, %v369_v38 }
 0x55a   :  { %v374_v42 = vsel %vm373_vm12, %v1177_v35, %v370_v39 }
 0x55b   :  { %v379_v45 = vsel %vm376_vm13, %v378_v43, %v374_v42 }
 0x55c   :  { %v402_v58 = vsub.f32 1.0, %v379_v45  ;;  %v414_v63 = vmul.f32 %v379_v45, %v1334_v62 }
 0x58e   :  { %v382_v32 = vpop.permute.xlu2 %381 }
 0x58f   :  { %v387_v34 = vmul.f32 %v382_v32, %v364_v33 }
 0x591   :  { %391 = vrot.lane.b32.xlu1 %v387_v34, %s1244_s20 }
 0x5a8   :  { %v384_v44 = vpop.permute.xlu1 %383 }
 0x5a9   :  { %v388_v46 = vmul.f32 %v384_v44, %v379_v45 }
 0x5ab   :  { %393 = vrot.lane.b32.xlu0 %v388_v46, %s1244_s20 }
 0x603   :  { %v392_v47 = vpop.permute.xlu1 %391 }
 0x604   :  { %v397_v48 = vadd.f32 %v392_v47, %v308_v13 }
 0x606   :  { %1178 = vtanh.f32 %v397_v48 }
 0x60c   :  { %v1179_v49 = vpop.eup %1178 }
 0x60d   :  { %405 = vrot.lane.b32.xlu0 %v1179_v49, %s1246_s26 }
 0x61d   :  { %v394_v50 = vpop.permute.xlu0 %393 }
 0x61e   :  { %v398_v51 = vadd.f32 %v394_v50, %v309_v18 }
 0x620   :  { %1180 = vtanh.f32 %v398_v51 }
 0x626   :  { %v1181_v52 = vpop.eup %1180 }
 0x627   :  { %407 = vrot.lane.b32.xlu2 %v1181_v52, %s1246_s26 }
 0x67f   :  { %v406_v54 = vpop.permute.xlu0 %405 }
 0x680   :  { %v411_v57 = vmul.f32 %v406_v54, %v401_v53 }
 0x681   :  { %v408_v60 = vpop.permute.xlu2 %407 }
 0x682   :  { %v1357_v61 = vadd.f32 %v413_v55, %v411_v57  ;;  %v412_v1 = vmul.f32 %v408_v60, %v402_v58 }
 0x684   :  { %v1360_v2 = vadd.f32 %v414_v63, %v412_v1  ;;  %v441_v3 = vpack.c.bf16 %v1357_v61, %v1357_v61 }
 0x686   :  { %v442_v4 = vpack.c.bf16 %v1360_v2, %v1360_v2  ;;  %v445_v7 = vunpack.c.l.b16 %v441_v3 }
 0x688   :  { %v446_v6 = vunpack.c.l.b16 %v442_v4 }
 0x68a   :  { %v447_v8 = vrot.slane %v446_v6, 7 }
 0x68c   :  { %v448_v9 = vsel %vm185_vm10, %v447_v8, %v445_v7 }
 0x68d   :  { %v449_v10 = vpack.c.b16 %v448_v9, %v448_v9 }
 0x68f   :  { %450 = vrot.lane.b32.xlu1 %v449_v10, %s1246_s26 }
 0x701   :  { %v451_v11 = vpop.permute.xlu1 %450 }
 0x702   :  { %1124 = vmatmul.msk.bf16.vlgmr.msra.gmra.mxu3 %vm48_vm1, %v451_v11 }
 0x785   :  { %v464_v12 = vpop.f32.mrf.mxu3 }
 0x786   :  { %v465_v13 = vadd.f32 %v1287_v5, %v464_v12 }
 0x788   :  { %512 = vrot.lane.b32.xlu0 %v465_v13, %s1244_s20  ;;  %v469_v14 = vrot.slane %v465_v13, 1  ;;  %v472_v22 = vadd.f32 %v465_v13, %v439_v21 }
 0x78a   :  { %514 = vrot.lane.b32.xlu2 %v469_v14, %s1244_s20  ;;  %v473_v17 = vadd.f32 %v469_v14, %v440_v16  ;;  %v1125_v23 = vmul.f32 -1.442695, %v472_v22  ;;  %v571_v22 = vld [vmem:[%s1674_s0 + $0xc] sm:$0x1] }
 0x78c   :  { %v1126_v18 = vmul.f32 -1.442695, %v473_v17 }
 0x78d   :  { %v466_v15 = vpop.f32.mrf.mxu3 }
 0x78e   :  { %1182 = vpow2.f32 %v1126_v18 }
 0x794   :  { %v1183_v19 = vpop.eup %1182 }
 0x795   :  { %v481_v20 = vadd.f32 1.0, %v1183_v19 }
 0x797   :  { %1184 = vrcp.f32 %v481_v20  ;;  %v508_v31 = vand.u32 2147483648, %v481_v20  ;;  %vm502_vm15 = vweird.f32 %v481_v20  ;;  %v506_v32 = vand.u32 2147483647, %v481_v20 }
 0x798   :  { %1186 = vpow2.f32 %v1125_v23 }
 0x799   :  { %v509_v34 = vor.u32 1.1754944e-38, %v508_v31  ;;  %vm507_vm3 = vcmp.eq.f32.partialorder %v506_v32, 8.507059e+37 }
 0x79d   :  { %v1185_v24 = vpop.eup %1184 }
 0x79e   :  { %v498_v25 = vmul.f32 %v1185_v24, %v481_v20  ;;  %v1187_v27 = vpop.eup %1186  ;;  %vm503_vm14 = vweird.f32 %v1185_v24 }
 0x79f   :  { %v480_v29 = vadd.f32 1.0, %v1187_v27  ;;  %vm504_vm2 = vmor %vm502_vm15, %vm503_vm14 }
 0x7a0   :  { %v499_v26 = vsub.f32 1.0, %v498_v25 }
 0x7a1   :  { %1188 = vrcp.f32 %v480_v29  ;;  %v493_v43 = vand.u32 2147483648, %v480_v29  ;;  %vm487_vm5 = vweird.f32 %v480_v29  ;;  %v491_v44 = vand.u32 2147483647, %v480_v29 }
 0x7a2   :  { %v500_v28 = vmul.f32 %v1185_v24, %v499_v26 }
 0x7a3   :  { %v494_v46 = vor.u32 1.1754944e-38, %v493_v43  ;;  %vm492_vm7 = vcmp.eq.f32.partialorder %v491_v44, 8.507059e+37 }
 0x7a4   :  { %v501_v30 = vadd.f32 %v1185_v24, %v500_v28 }
 0x7a6   :  { %v505_v33 = vsel %vm504_vm2, %v1185_v24, %v501_v30 }
 0x7a7   :  { %v1189_v35 = vpop.eup %1188  ;;  %v510_v37 = vsel %vm507_vm3, %v509_v34, %v505_v33 }
 0x7a8   :  { %v483_v39 = vmul.f32 %v1189_v35, %v480_v29  ;;  %vm488_vm4 = vweird.f32 %v1189_v35  ;;  %v533_v1 = vsub.f32 1.0, %v510_v37  ;;  %v545_v6 = vmul.f32 %v510_v37, %v1360_v2 }
 0x7a9   :  { %vm489_vm6 = vmor %vm487_vm5, %vm488_vm4 }
 0x7aa   :  { %v484_v40 = vsub.f32 1.0, %v483_v39 }
 0x7ac   :  { %v485_v41 = vmul.f32 %v1189_v35, %v484_v40 }
 0x7ae   :  { %v486_v42 = vadd.f32 %v1189_v35, %v485_v41 }
 0x7b0   :  { %v490_v45 = vsel %vm489_vm6, %v1189_v35, %v486_v42 }
 0x7b1   :  { %v495_v48 = vsel %vm492_vm7, %v494_v46, %v490_v45 }
 0x7b2   :  { %v532_v57 = vsub.f32 1.0, %v495_v48  ;;  %v544_v60 = vmul.f32 %v495_v48, %v1357_v61 }
 0x7e4   :  { %v515_v36 = vpop.permute.xlu2 %514 }
 0x7e5   :  { %v519_v38 = vmul.f32 %v515_v36, %v510_v37 }
 0x7e7   :  { %524 = vrot.lane.b32.xlu1 %v519_v38, %s1244_s20 }
 0x7fa   :  { %v513_v47 = vpop.permute.xlu0 %512 }
 0x7fb   :  { %v518_v49 = vmul.f32 %v513_v47, %v495_v48 }
 0x7fd   :  { %522 = vrot.lane.b32.xlu2 %v518_v49, %s1244_s20 }
 0x857   :  { %v523_v50 = vpop.permute.xlu2 %522 }
 0x858   :  { %v528_v51 = vadd.f32 %v523_v50, %v439_v21  ;;  %v570_v21 = vld [vmem:[%s1674_s0 + $0x4] sm:$0x1] }
 0x859   :  { %v525_v52 = vpop.permute.xlu1 %524 }
 0x85a   :  { %1190 = vtanh.f32 %v528_v51  ;;  %v529_v53 = vadd.f32 %v525_v52, %v440_v16 }
 0x85c   :  { %1192 = vtanh.f32 %v529_v53 }
 0x860   :  { %v1191_v54 = vpop.eup %1190 }
 0x861   :  { %536 = vrot.lane.b32.xlu1 %v1191_v54, %s1246_s26 }
 0x862   :  { %v1193_v55 = vpop.eup %1192 }
 0x863   :  { %538 = vrot.lane.b32.xlu0 %v1193_v55, %s1246_s26 }
 0x8d3   :  { %v537_v58 = vpop.permute.xlu1 %536 }
 0x8d4   :  { %v542_v63 = vmul.f32 %v537_v58, %v532_v57 }
 0x8d5   :  { %v539_v3 = vpop.permute.xlu0 %538 }
 0x8d6   :  { %v1383_v4 = vadd.f32 %v544_v60, %v542_v63  ;;  %v543_v7 = vmul.f32 %v539_v3, %v533_v1 }
 0x8d8   :  { %v1386_v8 = vadd.f32 %v545_v6, %v543_v7  ;;  %v572_v9 = vpack.c.bf16 %v1383_v4, %v1383_v4 }
 0x8da   :  { %v573_v10 = vpack.c.bf16 %v1386_v8, %v1386_v8  ;;  %v576_v12 = vunpack.c.l.b16 %v572_v9 }
 0x8dc   :  { %v577_v11 = vunpack.c.l.b16 %v573_v10 }
 0x8de   :  { %v578_v13 = vrot.slane %v577_v11, 7 }
 0x8e0   :  { %v579_v14 = vsel %vm185_vm10, %v578_v13, %v576_v12 }
 0x8e1   :  { %v580_v15 = vpack.c.b16 %v579_v14, %v579_v14 }
 0x8e3   :  { %581 = vrot.lane.b32.xlu2 %v580_v15, %s1246_s26 }
 0x93d   :  { %v582_v16 = vpop.permute.xlu2 %581 }
 0x93e   :  { %1127 = vmatmul.msk.bf16.vlgmr.msrb.gmra.mxu0 %vm48_vm1, %v582_v16 }
 0x9bb   :  { %v595_v17 = vpop.f32.mrf.mxu0 }
 0x9bc   :  { %v596_v18 = vadd.f32 %v1287_v5, %v595_v17 }
 0x9be   :  { %643 = vrot.lane.b32.xlu1 %v596_v18, %s1244_s20  ;;  %v600_v19 = vrot.slane %v596_v18, 1  ;;  %v603_v23 = vadd.f32 %v596_v18, %v570_v21 }
 0x9c0   :  { %645 = vrot.lane.b32.xlu0 %v600_v19, %s1244_s20  ;;  %v604_v24 = vadd.f32 %v600_v19, %v571_v22  ;;  %v1128_v25 = vmul.f32 -1.442695, %v603_v23 }
 0x9c2   :  { %v1129_v26 = vmul.f32 -1.442695, %v604_v24  ;;  %1194 = vpow2.f32 %v1128_v25 }
 0x9c3   :  { %v597_v20 = vpop.f32.mrf.mxu0 }
 0x9c4   :  { %1196 = vpow2.f32 %v1129_v26 }
 0x9c8   :  { %v1195_v27 = vpop.eup %1194 }
 0x9c9   :  { %v611_v29 = vadd.f32 1.0, %v1195_v27 }
 0x9ca   :  { %v1197_v28 = vpop.eup %1196 }
 0x9cb   :  { %v612_v30 = vadd.f32 1.0, %v1197_v28  ;;  %1198 = vrcp.f32 %v611_v29  ;;  %v624_v40 = vand.u32 2147483648, %v611_v29  ;;  %vm618_vm9 = vweird.f32 %v611_v29  ;;  %v701_v28 = vld [vmem:[%s1674_s0 + $0x5] sm:$0x1] }
 0x9cc   :  { %v622_v41 = vand.u32 2147483647, %v611_v29 }
 0x9cd   :  { %1200 = vrcp.f32 %v612_v30  ;;  %v639_v43 = vand.u32 2147483648, %v612_v30  ;;  %vm633_vm13 = vweird.f32 %v612_v30  ;;  %v637_v45 = vand.u32 2147483647, %v612_v30 }
 0x9ce   :  { %v625_v46 = vor.u32 1.1754944e-38, %v624_v40  ;;  %vm623_vm15 = vcmp.eq.f32.partialorder %v622_v41, 8.507059e+37 }
 0x9cf   :  { %v640_v50 = vor.u32 1.1754944e-38, %v639_v43  ;;  %vm638_vm2 = vcmp.eq.f32.partialorder %v637_v45, 8.507059e+37 }
 0x9d1   :  { %v1199_v31 = vpop.eup %1198 }
 0x9d2   :  { %v614_v33 = vmul.f32 %v1199_v31, %v611_v29  ;;  %vm619_vm8 = vweird.f32 %v1199_v31 }
 0x9d3   :  { %v1201_v32 = vpop.eup %1200  ;;  %vm620_vm12 = vmor %vm618_vm9, %vm619_vm8 }
 0x9d4   :  { %v629_v34 = vmul.f32 %v1201_v32, %v612_v30  ;;  %v615_v35 = vsub.f32 1.0, %v614_v33  ;;  %vm634_vm11 = vweird.f32 %v1201_v32 }
 0x9d5   :  { %vm635_vm14 = vmor %vm633_vm13, %vm634_vm11 }
 0x9d6   :  { %v630_v36 = vsub.f32 1.0, %v629_v34  ;;  %v616_v37 = vmul.f32 %v1199_v31, %v615_v35 }
 0x9d8   :  { %v631_v38 = vmul.f32 %v1201_v32, %v630_v36  ;;  %v617_v39 = vadd.f32 %v1199_v31, %v616_v37 }
 0x9da   :  { %v632_v42 = vadd.f32 %v1201_v32, %v631_v38  ;;  %v621_v44 = vsel %vm620_vm12, %v1199_v31, %v617_v39 }
 0x9db   :  { %v626_v49 = vsel %vm623_vm15, %v625_v46, %v621_v44 }
 0x9dc   :  { %v636_v47 = vsel %vm635_vm14, %v1201_v32, %v632_v42  ;;  %v663_v3 = vsub.f32 1.0, %v626_v49  ;;  %v675_v7 = vmul.f32 %v626_v49, %v1383_v4 }
 0x9dd   :  { %v641_v53 = vsel %vm638_vm2, %v640_v50, %v636_v47 }
 0x9de   :  { %v664_v10 = vsub.f32 1.0, %v641_v53  ;;  %v676_v13 = vmul.f32 %v641_v53, %v1386_v8 }
 0xa30   :  { %v644_v48 = vpop.permute.xlu1 %643 }
 0xa31   :  { %v649_v51 = vmul.f32 %v644_v48, %v626_v49 }
 0xa32   :  { %v646_v52 = vpop.permute.xlu0 %645 }
 0xa33   :  { %v650_v54 = vmul.f32 %v646_v52, %v641_v53  ;;  %653 = vrot.lane.b32.xlu0 %v649_v51, %s1244_s20 }
 0xa35   :  { %655 = vrot.lane.b32.xlu2 %v650_v54, %s1244_s20 }
 0xa8f   :  { %v656_v55 = vpop.permute.xlu2 %655 }
 0xa90   :  { %v660_v57 = vadd.f32 %v656_v55, %v571_v22 }
 0xa92   :  { %1202 = vtanh.f32 %v660_v57 }
 0xa98   :  { %v1203_v58 = vpop.eup %1202 }
 0xa99   :  { %669 = vrot.lane.b32.xlu1 %v1203_v58, %s1246_s26 }
 0xaa5   :  { %v654_v60 = vpop.permute.xlu0 %653 }
 0xaa6   :  { %v659_v63 = vadd.f32 %v654_v60, %v570_v21 }
 0xaa8   :  { %1204 = vtanh.f32 %v659_v63 }
 0xaae   :  { %v1205_v1 = vpop.eup %1204 }
 0xaaf   :  { %667 = vrot.lane.b32.xlu2 %v1205_v1, %s1246_s26 }
 0xb09   :  { %v668_v6 = vpop.permute.xlu2 %667 }
 0xb0a   :  { %v673_v9 = vmul.f32 %v668_v6, %v663_v3 }
 0xb0b   :  { %v670_v11 = vpop.permute.xlu1 %669 }
 0xb0c   :  { %v1409_v12 = vadd.f32 %v675_v7, %v673_v9  ;;  %v674_v14 = vmul.f32 %v670_v11, %v664_v10 }
 0xb0e   :  { %v1412_v15 = vadd.f32 %v676_v13, %v674_v14  ;;  %v703_v16 = vpack.c.bf16 %v1409_v12, %v1409_v12 }
 0xb10   :  { %v704_v17 = vpack.c.bf16 %v1412_v15, %v1412_v15  ;;  %v707_v19 = vunpack.c.l.b16 %v703_v16 }
 0xb12   :  { %v708_v18 = vunpack.c.l.b16 %v704_v17 }
 0xb14   :  { %v709_v20 = vrot.slane %v708_v18, 7 }
 0xb16   :  { %v710_v21 = vsel %vm185_vm10, %v709_v20, %v707_v19 }
 0xb17   :  { %v711_v22 = vpack.c.b16 %v710_v21, %v710_v21 }
 0xb19   :  { %712 = vrot.lane.b32.xlu0 %v711_v22, %s1246_s26 }
 0xb8b   :  { %v713_v23 = vpop.permute.xlu0 %712 }
 0xb8c   :  { %1130 = vmatmul.msk.bf16.vlgmr.msrb.gmra.mxu1 %vm48_vm1, %v713_v23 }
 0xc09   :  { %v726_v24 = vpop.f32.mrf.mxu1 }
 0xc0a   :  { %v727_v25 = vadd.f32 %v1287_v5, %v726_v24  ;;  %v702_v5 = vld [vmem:[%s1674_s0 + $0xd] sm:$0x1] }
 0xc0c   :  { %774 = vrot.lane.b32.xlu2 %v727_v25, %s1244_s20  ;;  %v731_v26 = vrot.slane %v727_v25, 1  ;;  %v734_v29 = vadd.f32 %v727_v25, %v701_v28 }
 0xc0e   :  { %776 = vrot.lane.b32.xlu1 %v731_v26, %s1244_s20  ;;  %v1131_v30 = vmul.f32 -1.442695, %v734_v29  ;;  %v735_v33 = vadd.f32 %v731_v26, %v702_v5 }
 0xc10   :  { %1206 = vpow2.f32 %v1131_v30  ;;  %v1132_v35 = vmul.f32 -1.442695, %v735_v33 }
 0xc11   :  { %v728_v27 = vpop.f32.mrf.mxu1 }
 0xc16   :  { %v1207_v31 = vpop.eup %1206 }
 0xc17   :  { %v742_v32 = vadd.f32 1.0, %v1207_v31 }
 0xc19   :  { %1208 = vrcp.f32 %v742_v32  ;;  %v755_v42 = vand.u32 2147483648, %v742_v32  ;;  %vm749_vm4 = vweird.f32 %v742_v32  ;;  %v753_v43 = vand.u32 2147483647, %v742_v32 }
 0xc1a   :  { %1210 = vpow2.f32 %v1132_v35 }
 0xc1b   :  { %v756_v45 = vor.u32 1.1754944e-38, %v755_v42  ;;  %vm754_vm6 = vcmp.eq.f32.partialorder %v753_v43, 8.507059e+37 }
 0xc1f   :  { %v1209_v34 = vpop.eup %1208 }
 0xc20   :  { %v745_v36 = vmul.f32 %v1209_v34, %v742_v32  ;;  %v1211_v39 = vpop.eup %1210  ;;  %vm750_vm3 = vweird.f32 %v1209_v34 }
 0xc21   :  { %v743_v41 = vadd.f32 1.0, %v1211_v39  ;;  %vm751_vm5 = vmor %vm749_vm4, %vm750_vm3 }
 0xc22   :  { %v746_v37 = vsub.f32 1.0, %v745_v36  ;;  %v833_v36 = vld [vmem:[%s1674_s0 + $0xe] sm:$0x1] }
 0xc23   :  { %1212 = vrcp.f32 %v743_v41  ;;  %v770_v54 = vand.u32 2147483648, %v743_v41  ;;  %vm764_vm8 = vweird.f32 %v743_v41  ;;  %v768_v55 = vand.u32 2147483647, %v743_v41 }
 0xc24   :  { %v747_v38 = vmul.f32 %v1209_v34, %v746_v37 }
 0xc25   :  { %v771_v58 = vor.u32 1.1754944e-38, %v770_v54  ;;  %vm769_vm11 = vcmp.eq.f32.partialorder %v768_v55, 8.507059e+37 }
 0xc26   :  { %v748_v40 = vadd.f32 %v1209_v34, %v747_v38 }
 0xc28   :  { %v752_v44 = vsel %vm751_vm5, %v1209_v34, %v748_v40 }
 0xc29   :  { %v757_v47 = vsel %vm754_vm6, %v756_v45, %v752_v44  ;;  %v1213_v49 = vpop.eup %1212 }
 0xc2a   :  { %v760_v50 = vmul.f32 %v1213_v49, %v743_v41  ;;  %vm765_vm7 = vweird.f32 %v1213_v49  ;;  %v794_v13 = vsub.f32 1.0, %v757_v47  ;;  %v806_v16 = vmul.f32 %v757_v47, %v1409_v12  ;;  %v832_v41 = vld [vmem:[%s1674_s0 + $0x6] sm:$0x1] }
 0xc2b   :  { %vm766_vm9 = vmor %vm764_vm8, %vm765_vm7 }
 0xc2c   :  { %v761_v51 = vsub.f32 1.0, %v760_v50 }
 0xc2e   :  { %v762_v52 = vmul.f32 %v1213_v49, %v761_v51 }
 0xc30   :  { %v763_v53 = vadd.f32 %v1213_v49, %v762_v52 }
 0xc32   :  { %v767_v57 = vsel %vm766_vm9, %v1213_v49, %v763_v53 }
 0xc33   :  { %v772_v63 = vsel %vm769_vm11, %v771_v58, %v767_v57 }
 0xc34   :  { %v795_v18 = vsub.f32 1.0, %v772_v63  ;;  %v807_v21 = vmul.f32 %v772_v63, %v1412_v15 }
 0xc66   :  { %v775_v46 = vpop.permute.xlu2 %774 }
 0xc67   :  { %v780_v48 = vmul.f32 %v775_v46, %v757_v47 }
 0xc69   :  { %784 = vrot.lane.b32.xlu1 %v780_v48, %s1244_s20 }
 0xc80   :  { %v777_v60 = vpop.permute.xlu1 %776 }
 0xc81   :  { %v781_v1 = vmul.f32 %v777_v60, %v772_v63 }
 0xc83   :  { %786 = vrot.lane.b32.xlu0 %v781_v1, %s1244_s20 }
 0xcdb   :  { %v785_v3 = vpop.permute.xlu1 %784 }
 0xcdc   :  { %v790_v6 = vadd.f32 %v785_v3, %v701_v28 }
 0xcde   :  { %1214 = vtanh.f32 %v790_v6 }
 0xce4   :  { %v1215_v7 = vpop.eup %1214 }
 0xce5   :  { %798 = vrot.lane.b32.xlu0 %v1215_v7, %s1246_s26 }
 0xcf5   :  { %v787_v9 = vpop.permute.xlu0 %786 }
 0xcf6   :  { %v791_v10 = vadd.f32 %v787_v9, %v702_v5  ;;  %v1450_v5 = vld [vmem:[%s1673_s2] ss:$0 sm:$0xff] }
 0xcf8   :  { %1216 = vtanh.f32 %v791_v10 }
 0xcfe   :  { %v1217_v11 = vpop.eup %1216 }
 0xcff   :  { %800 = vrot.lane.b32.xlu2 %v1217_v11, %s1246_s26 }
 0xd57   :  { %v799_v14 = vpop.permute.xlu0 %798 }
 0xd58   :  { %v804_v17 = vmul.f32 %v799_v14, %v794_v13 }
 0xd59   :  { %v801_v19 = vpop.permute.xlu2 %800 }
 0xd5a   :  { %v1435_v20 = vadd.f32 %v806_v16, %v804_v17  ;;  %v805_v22 = vmul.f32 %v801_v19, %v795_v18 }
 0xd5c   :  { %v1438_v23 = vadd.f32 %v807_v21, %v805_v22  ;;  %v834_v24 = vpack.c.bf16 %v1435_v20, %v1435_v20 }
 0xd5e   :  { %v835_v25 = vpack.c.bf16 %v1438_v23, %v1438_v23  ;;  %v838_v27 = vunpack.c.l.b16 %v834_v24 }
 0xd60   :  { %v839_v26 = vunpack.c.l.b16 %v835_v25 }
 0xd62   :  { %v840_v28 = vrot.slane %v839_v26, 7 }
 0xd64   :  { %v841_v29 = vsel %vm185_vm10, %v840_v28, %v838_v27 }
 0xd65   :  { %v842_v30 = vpack.c.b16 %v841_v29, %v841_v29 }
 0xd67   :  { %843 = vrot.lane.b32.xlu1 %v842_v30, %s1246_s26 }
 0xdd9   :  { %v844_v31 = vpop.permute.xlu1 %843 }
 0xdda   :  { %1133 = vmatmul.msk.bf16.vlgmr.msrb.gmra.mxu2 %vm48_vm1, %v844_v31 }
 0xe5d   :  { %v857_v32 = vpop.f32.mrf.mxu2 }
 0xe5e   :  { %v858_v33 = vadd.f32 %v1450_v5, %v857_v32 }
 0xe60   :  { %905 = vrot.lane.b32.xlu0 %v858_v33, %s1244_s20  ;;  %v862_v34 = vrot.slane %v858_v33, 1  ;;  %v865_v42 = vadd.f32 %v858_v33, %v832_v41 }
 0xe62   :  { %907 = vrot.lane.b32.xlu2 %v862_v34, %s1244_s20  ;;  %v866_v37 = vadd.f32 %v862_v34, %v833_v36  ;;  %v1134_v43 = vmul.f32 -1.442695, %v865_v42 }
 0xe64   :  { %v1135_v38 = vmul.f32 -1.442695, %v866_v37 }
 0xe65   :  { %v859_v35 = vpop.f32.mrf.mxu2 }
 0xe66   :  { %1218 = vpow2.f32 %v1135_v38 }
 0xe6c   :  { %v1219_v39 = vpop.eup %1218 }
 0xe6d   :  { %v874_v40 = vadd.f32 1.0, %v1219_v39 }
 0xe6f   :  { %1220 = vrcp.f32 %v874_v40  ;;  %v901_v51 = vand.u32 2147483648, %v874_v40  ;;  %vm895_vm13 = vweird.f32 %v874_v40  ;;  %v899_v52 = vand.u32 2147483647, %v874_v40 }
 0xe70   :  { %1222 = vpow2.f32 %v1134_v43 }
 0xe71   :  { %v902_v54 = vor.u32 1.1754944e-38, %v901_v51  ;;  %vm900_vm15 = vcmp.eq.f32.partialorder %v899_v52, 8.507059e+37 }
 0xe75   :  { %v1221_v44 = vpop.eup %1220 }
 0xe76   :  { %v891_v45 = vmul.f32 %v1221_v44, %v874_v40  ;;  %v1223_v47 = vpop.eup %1222  ;;  %vm896_vm12 = vweird.f32 %v1221_v44 }
 0xe77   :  { %v873_v49 = vadd.f32 1.0, %v1223_v47  ;;  %vm897_vm14 = vmor %vm895_vm13, %vm896_vm12  ;;  %v153_v47 = vld [vmem:[%s1675_s3] sm:$0x1] }
 0xe78   :  { %v892_v46 = vsub.f32 1.0, %v891_v45 }
 0xe79   :  { %1224 = vrcp.f32 %v873_v49  ;;  %v886_v7 = vand.u32 2147483648, %v873_v49  ;;  %vm880_vm3 = vweird.f32 %v873_v49  ;;  %v884_v9 = vand.u32 2147483647, %v873_v49 }
 0xe7a   :  { %v893_v48 = vmul.f32 %v1221_v44, %v892_v46 }
 0xe7b   :  { %v887_v11 = vor.u32 1.1754944e-38, %v886_v7  ;;  %vm885_vm5 = vcmp.eq.f32.partialorder %v884_v9, 8.507059e+37 }
 0xe7c   :  { %v894_v50 = vadd.f32 %v1221_v44, %v893_v48  ;;  %v1488_v48 = vld [vmem:[%s1674_s0 + $0x7] sm:$0x1] }
 0xe7e   :  { %v898_v53 = vsel %vm897_vm14, %v1221_v44, %v894_v50  ;;  %vm173_vm14 = vcmask 253952  }
 0xe7f   :  { %v1225_v55 = vpop.eup %1224  ;;  %v903_v58 = vsel %vm900_vm15, %v902_v54, %v898_v53 }
 0xe80   :  { %v876_v63 = vmul.f32 %v1225_v55, %v873_v49  ;;  %vm881_vm2 = vweird.f32 %v1225_v55  ;;  %v926_v29 = vsub.f32 1.0, %v903_v58  ;;  %v938_v32 = vmul.f32 %v903_v58, %v1438_v23 }
 0xe81   :  { %vm882_vm4 = vmor %vm880_vm3, %vm881_vm2 }
 0xe82   :  { %v877_v1 = vsub.f32 1.0, %v876_v63 }
 0xe84   :  { %v878_v3 = vmul.f32 %v1225_v55, %v877_v1 }
 0xe86   :  { %v879_v6 = vadd.f32 %v1225_v55, %v878_v3 }
 0xe88   :  { %v883_v10 = vsel %vm882_vm4, %v1225_v55, %v879_v6 }
 0xe89   :  { %v888_v14 = vsel %vm885_vm5, %v887_v11, %v883_v10 }
 0xe8a   :  { %v925_v25 = vsub.f32 1.0, %v888_v14  ;;  %v937_v27 = vmul.f32 %v888_v14, %v1435_v20 }
 0xebc   :  { %v908_v57 = vpop.permute.xlu2 %907 }
 0xebd   :  { %v912_v60 = vmul.f32 %v908_v57, %v903_v58 }
 0xebf   :  { %917 = vrot.lane.b32.xlu1 %v912_v60, %s1244_s20 }
 0xed2   :  { %v906_v13 = vpop.permute.xlu0 %905 }
 0xed3   :  { %v911_v16 = vmul.f32 %v906_v13, %v888_v14 }
 0xed5   :  { %915 = vrot.lane.b32.xlu2 %v911_v16, %s1244_s20 }
 0xf2f   :  { %v916_v17 = vpop.permute.xlu2 %915 }
 0xf30   :  { %v921_v18 = vadd.f32 %v916_v17, %v832_v41 }
 0xf31   :  { %v918_v19 = vpop.permute.xlu1 %917 }
 0xf32   :  { %1226 = vtanh.f32 %v921_v18  ;;  %v922_v21 = vadd.f32 %v918_v19, %v833_v36 }
 0xf34   :  { %1228 = vtanh.f32 %v922_v21 }
 0xf38   :  { %v1227_v22 = vpop.eup %1226 }
 0xf39   :  { %929 = vrot.lane.b32.xlu1 %v1227_v22, %s1246_s26 }
 0xf3a   :  { %v1229_v24 = vpop.eup %1228 }
 0xf3b   :  { %931 = vrot.lane.b32.xlu0 %v1229_v24, %s1246_s26 }
 0xfab   :  { %v930_v26 = vpop.permute.xlu1 %929 }
 0xfac   :  { %v935_v28 = vmul.f32 %v930_v26, %v925_v25 }
 0xfad   :  { %v932_v30 = vpop.permute.xlu0 %931 }
 0xfae   :  { %v1466_v31 = vadd.f32 %v937_v27, %v935_v28  ;;  %v936_v33 = vmul.f32 %v932_v30, %v926_v29 }
 0xfb0   :  { %v1469_v34 = vadd.f32 %v938_v32, %v936_v33  ;;  %v965_v35 = vpack.c.bf16 %v1466_v31, %v1466_v31  ;;  %v154_v33 = vld [vmem:[%s1675_s3 + $0x8] sm:$0x1] }
 0xfb2   :  { %v966_v36 = vpack.c.bf16 %v1469_v34, %v1469_v34  ;;  %v969_v38 = vunpack.c.l.b16 %v965_v35  ;;  %v287_v35 = vld [vmem:[%s1675_s3 + $0x9] sm:$0x1] }
 0xfb4   :  { %v970_v37 = vunpack.c.l.b16 %v966_v36  ;;  %v286_v36 = vld [vmem:[%s1675_s3 + $0x1] sm:$0x1] }
 0xfb6   :  { %v971_v39 = vrot.slane %v970_v37, 7  ;;  %v418_v37 = vld [vmem:[%s1675_s3 + $0xa] sm:$0x1] }
 0xfb8   :  { %v972_v40 = vsel %vm185_vm10, %v971_v39, %v969_v38  ;;  %v680_v38 = vld [vmem:[%s1675_s3 + $0xc] sm:$0x1]  ;;  %v679_v39 = vld [vmem:[%s1675_s3 + $0x4] sm:$0x1] }
 0xfb9   :  { %v973_v41 = vpack.c.b16 %v972_v40, %v972_v40  ;;  %v941_v40 = vld [vmem:[%s1675_s3 + $0x6] sm:$0x1] }
 0xfbb   :  { %974 = vrot.lane.b32.xlu2 %v973_v41, %s1246_s26  ;;  %v811_v41 = vld [vmem:[%s1675_s3 + $0xd] sm:$0x1] }
0x1015   :  { %v975_v42 = vpop.permute.xlu2 %974 }
0x1016   :  { %1136 = vmatmul.msk.bf16.vlgmr.msrb.gmra.mxu3 %vm48_vm1, %v975_v42 }
0x1099   :  { %v988_v43 = vpop.f32.mrf.mxu3 }
0x109a   :  { %v989_v44 = vadd.f32 %v1450_v5, %v988_v43  ;;  %v1493_v5 = vld [vmem:[%s1674_s0 + $0xf] sm:$0x1] }
0x109c   :  { %1036 = vrot.lane.b32.xlu1 %v989_v44, %s1244_s20  ;;  %v993_v45 = vrot.slane %v989_v44, 1  ;;  %v996_v49 = vadd.f32 %v989_v44, %v1488_v48 }
0x109e   :  { %1038 = vrot.lane.b32.xlu0 %v993_v45, %s1244_s20  ;;  %v997_v50 = vadd.f32 %v993_v45, %v1493_v5  ;;  %v1137_v51 = vmul.f32 -1.442695, %v996_v49 }
0x10a0   :  { %v1138_v52 = vmul.f32 -1.442695, %v997_v50  ;;  %1230 = vpow2.f32 %v1137_v51 }
0x10a1   :  { %v990_v46 = vpop.f32.mrf.mxu3 }
0x10a2   :  { %1232 = vpow2.f32 %v1138_v52 }
0x10a4   :  { %157 = vrot.lane.b32.xlu1 %v153_v47, %s1245_s25 }
0x10a6   :  { %v1231_v53 = vpop.eup %1230 }
0x10a7   :  { %v1004_v55 = vadd.f32 1.0, %v1231_v53  ;;  %v1073_v53 = vld [vmem:[%s1675_s3 + $0xf] sm:$0x1] }
0x10a8   :  { %v1233_v54 = vpop.eup %1232 }
0x10a9   :  { %v1005_v57 = vadd.f32 1.0, %v1233_v54  ;;  %1234 = vrcp.f32 %v1004_v55  ;;  %v1017_v11 = vand.u32 2147483648, %v1004_v55  ;;  %vm1011_vm6 = vweird.f32 %v1004_v55 }
0x10aa   :  { %v1015_v13 = vand.u32 2147483647, %v1004_v55 }
0x10ab   :  { %1236 = vrcp.f32 %v1005_v57  ;;  %v1032_v16 = vand.u32 2147483648, %v1005_v57  ;;  %vm1026_vm9 = vweird.f32 %v1005_v57  ;;  %v1030_v18 = vand.u32 2147483647, %v1005_v57 }
0x10ac   :  { %v1018_v19 = vor.u32 1.1754944e-38, %v1017_v11  ;;  %vm1016_vm12 = vcmp.eq.f32.partialorder %v1015_v13, 8.507059e+37 }
0x10ad   :  { %v1033_v25 = vor.u32 1.1754944e-38, %v1032_v16  ;;  %vm1031_vm13 = vcmp.eq.f32.partialorder %v1030_v18, 8.507059e+37 }
0x10af   :  { %v1235_v58 = vpop.eup %1234 }
0x10b0   :  { %v1007_v63 = vmul.f32 %v1235_v58, %v1004_v55  ;;  %vm1012_vm1 = vweird.f32 %v1235_v58  ;;  %v810_v55 = vld [vmem:[%s1675_s3 + $0x5] sm:$0x1] }
0x10b1   :  { %v1237_v60 = vpop.eup %1236  ;;  %vm1013_vm8 = vmor %vm1011_vm6, %vm1012_vm1 }
0x10b2   :  { %v1022_v1 = vmul.f32 %v1237_v60, %v1005_v57  ;;  %v1008_v3 = vsub.f32 1.0, %v1007_v63  ;;  %vm1027_vm7 = vweird.f32 %v1237_v60 }
0x10b3   :  { %vm1028_vm11 = vmor %vm1026_vm9, %vm1027_vm7 }
0x10b4   :  { %v1023_v6 = vsub.f32 1.0, %v1022_v1  ;;  %v1009_v7 = vmul.f32 %v1235_v58, %v1008_v3 }
0x10b6   :  { %v1024_v9 = vmul.f32 %v1237_v60, %v1023_v6  ;;  %v1010_v10 = vadd.f32 %v1235_v58, %v1009_v7 }
0x10b8   :  { %v1025_v14 = vadd.f32 %v1237_v60, %v1024_v9  ;;  %v1014_v17 = vsel %vm1013_vm8, %v1235_v58, %v1010_v10 }
0x10b9   :  { %v1497_v24 = vsel %vm1016_vm12, %v1018_v19, %v1014_v17 }
0x10ba   :  { %v1029_v21 = vsel %vm1028_vm11, %v1237_v60, %v1025_v14  ;;  %v942_v60 = vld [vmem:[%s1675_s3 + $0xe] sm:$0x1]  ;;  %v1056_v16 = vsub.f32 1.0, %v1497_v24 }
0x10bb   :  { %v1500_v28 = vsel %vm1031_vm13, %v1033_v25, %v1029_v21  ;;  %v1068_v21 = vmul.f32 %v1497_v24, %v1466_v31 }
0x10bc   :  { %v1057_v18 = vsub.f32 1.0, %v1500_v28 }
0x110e   :  { %v1037_v22 = vpop.permute.xlu1 %1036 }
0x110f   :  { %v1042_v26 = vmul.f32 %v1037_v22, %v1497_v24 }
0x1110   :  { %v1039_v27 = vpop.permute.xlu0 %1038 }
0x1111   :  { %v1043_v29 = vmul.f32 %v1039_v27, %v1500_v28  ;;  %1046 = vrot.lane.b32.xlu0 %v1042_v26, %s1244_s20 }
0x1113   :  { %1048 = vrot.lane.b32.xlu2 %v1043_v29, %s1244_s20 }
0x1116   :  { %v158_v30 = vpop.permute.xlu1 %157 }
0x1117   :  { %v163_v32 = vmul.f32 %v158_v30, %v1310_v0  ;;  %v548_v0 = vld [vmem:[%s1675_s3 + $0x3] sm:$0x1] }
0x1119   :  { %167 = vrot.lane.b32.xlu0 %v163_v32, %s1246_s26 }
0x111b   :  { %159 = vrot.lane.b32.xlu2 %v154_v33, %s1245_s25 }
0x1121   :  { %292 = vrot.lane.b32.xlu0 %v287_v35, %s1245_s25 }
0x1123   :  { %290 = vrot.lane.b32.xlu2 %v286_v36, %s1245_s25 }
0x1129   :  { %552 = vrot.lane.b32.xlu0 %v548_v0, %s1245_s25 }
0x112b   :  { %423 = vrot.lane.b32.xlu2 %v418_v37, %s1245_s25 }
0x1131   :  { %685 = vrot.lane.b32.xlu0 %v680_v38, %s1245_s25 }
0x1133   :  { %683 = vrot.lane.b32.xlu2 %v679_v39, %s1245_s25 }
0x1139   :  { %945 = vrot.lane.b32.xlu0 %v941_v40, %s1245_s25 }
0x113b   :  { %816 = vrot.lane.b32.xlu2 %v811_v41, %s1245_s25 }
0x116d   :  { %v1049_v42 = vpop.permute.xlu2 %1048 }
0x116e   :  { %v1053_v43 = vadd.f32 %v1049_v42, %v1493_v5  ;;  %v417_v5 = vld [vmem:[%s1675_s3 + $0x2] sm:$0x1] }
0x1170   :  { %1238 = vtanh.f32 %v1053_v43 }
0x1175   :  { %v160_v44 = vpop.permute.xlu2 %159 }
0x1176   :  { %v1239_v45 = vpop.eup %1238  ;;  %v164_v46 = vmul.f32 %v160_v44, %v1306_v56  ;;  %v1072_v56 = vld [vmem:[%s1675_s3 + $0x7] sm:$0x1] }
0x1177   :  { %1062 = vrot.lane.b32.xlu2 %v1239_v45, %s1246_s26 }
0x1178   :  { %169 = vrot.lane.b32.xlu1 %v164_v46, %s1246_s26 }
0x117d   :  { %v291_v47 = vpop.permute.xlu2 %290 }
0x117e   :  { %v296_v49 = vmul.f32 %v291_v47, %v1331_v59 }
0x117f   :  { %1076 = vrot.lane.b32.xlu2 %v1072_v56, %s1245_s25 }
0x1180   :  { %300 = vrot.lane.b32.xlu1 %v296_v49, %s1246_s26 }
0x1183   :  { %v1047_v50 = vpop.permute.xlu0 %1046 }
0x1184   :  { %v1052_v51 = vadd.f32 %v1047_v50, %v1488_v48  ;;  %v549_v48 = vld [vmem:[%s1675_s3 + $0xb] sm:$0x1] }
0x1185   :  { %v424_v54 = vpop.permute.xlu2 %423 }
0x1186   :  { %1240 = vtanh.f32 %v1052_v51  ;;  %v428_v57 = vmul.f32 %v424_v54, %v1360_v2 }
0x1188   :  { %421 = vrot.lane.b32.xlu1 %v417_v5, %s1245_s25 }
0x118b   :  { %v168_v59 = vpop.permute.xlu0 %167 }
0x118c   :  { %v1241_v52 = vpop.eup %1240  ;;  %174 = vst.msk [vmem:[%s1676_s4] sm:$0x1] %vm173_vm14, %v168_v59 }
0x118d   :  { %1060 = vrot.lane.b32.xlu0 %v1241_v52, %s1246_s26  ;;  %v684_v63 = vpop.permute.xlu2 %683 }
0x118e   :  { %v689_v1 = vmul.f32 %v684_v63, %v1409_v12 }
0x1190   :  { %554 = vrot.lane.b32.xlu1 %v549_v48, %s1245_s25 }
0x1193   :  { %v293_v58 = vpop.permute.xlu0 %292 }
0x1194   :  { %v297_v3 = vmul.f32 %v293_v58, %v1334_v62 }
0x1195   :  { %1078 = vrot.lane.b32.xlu0 %v1073_v53, %s1245_s25  ;;  %v817_v7 = vpop.permute.xlu2 %816 }
0x1196   :  { %v821_v2 = vmul.f32 %v817_v7, %v1438_v23 }
0x1198   :  { %814 = vrot.lane.b32.xlu1 %v810_v55, %s1245_s25 }
0x119b   :  { %v553_v6 = vpop.permute.xlu0 %552 }
0x119c   :  { %v558_v9 = vmul.f32 %v553_v6, %v1383_v4 }
0x119d   :  { %433 = vrot.lane.b32.xlu0 %v428_v57, %s1246_s26 }
0x11a0   :  { %947 = vrot.lane.b32.xlu1 %v942_v60, %s1245_s25 }
0x11a3   :  { %v686_v10 = vpop.permute.xlu0 %685 }
0x11a4   :  { %v690_v11 = vmul.f32 %v686_v10, %v1412_v15 }
0x11a5   :  { %693 = vrot.lane.b32.xlu0 %v689_v1, %s1246_s26 }
0x11a8   :  { %302 = vrot.lane.b32.xlu1 %v297_v3, %s1246_s26 }
0x11ab   :  { %v946_v12 = vpop.permute.xlu0 %945 }
0x11ac   :  { %v951_v62 = vmul.f32 %v946_v12, %v1466_v31 }
0x11ad   :  { %826 = vrot.lane.b32.xlu0 %v821_v2, %s1246_s26 }
0x11b0   :  { %562 = vrot.lane.b32.xlu1 %v558_v9, %s1246_s26 }
0x11b8   :  { %695 = vrot.lane.b32.xlu1 %v690_v11, %s1246_s26 }
0x11c0   :  { %955 = vrot.lane.b32.xlu1 %v951_v62, %s1246_s26 }
0x11d1   :  { %v1063_v4 = vpop.permute.xlu2 %1062 }
0x11d2   :  { %v1067_v25 = vmul.f32 %v1063_v4, %v1057_v18 }
0x11d9   :  { %v1077_v22 = vpop.permute.xlu2 %1076 }
0x11ea   :  { %v170_v13 = vpop.permute.xlu1 %169 }
0x11eb   :  { %175 = vst.msk [vmem:[%s1676_s4 + $0x8] sm:$0x1] %vm173_vm14, %v170_v13 }
0x11f2   :  { %v301_v23 = vpop.permute.xlu1 %300 }
0x11f3   :  { %306 = vst.msk [vmem:[%s1676_s4 + $0x1] sm:$0x1] %vm173_vm14, %v301_v23 }
0x11fa   :  { %v422_v15 = vpop.permute.xlu1 %421 }
0x11fb   :  { %v427_v14 = vmul.f32 %v422_v15, %v1357_v61  ;;  %v1069_v61 = vmul.f32 %v1500_v28, %v1469_v34 }
0x11fd   :  { %431 = vrot.lane.b32.xlu2 %v427_v14, %s1246_s26  ;;  %v1071_v32 = vadd.f32 %v1069_v61, %v1067_v25 }
0x11ff   :  { %v1061_v17 = vpop.permute.xlu0 %1060 }
0x1200   :  { %v1066_v19 = vmul.f32 %v1061_v17, %v1056_v16 }
0x1202   :  { %v555_v26 = vpop.permute.xlu1 %554  ;;  %v1070_v27 = vadd.f32 %v1068_v21, %v1066_v19 }
0x1203   :  { %v559_v29 = vmul.f32 %v555_v26, %v1386_v8 }
0x1204   :  { %v1082_v30 = vmul.f32 %v1077_v22, %v1070_v27 }
0x1205   :  { %564 = vrot.lane.b32.xlu2 %v559_v29, %s1246_s26 }
0x1206   :  { %1086 = vrot.lane.b32.xlu0 %v1082_v30, %s1246_s26 }
0x1207   :  { %v1079_v33 = vpop.permute.xlu0 %1078 }
0x1208   :  { %v1083_v35 = vmul.f32 %v1079_v33, %v1071_v32 }
0x120a   :  { %v815_v36 = vpop.permute.xlu1 %814  ;;  %1088 = vrot.lane.b32.xlu1 %v1083_v35, %s1246_s26 }
0x120b   :  { %v820_v31 = vmul.f32 %v815_v36, %v1435_v20  ;;  %v1096_v20 = vrot.slane %v1071_v32, 7 }
0x120d   :  { %824 = vrot.lane.b32.xlu2 %v820_v31, %s1246_s26  ;;  %v1097_v38 = vsel %vm185_vm10, %v1096_v20, %v1070_v27 }
0x120f   :  { %v434_v24 = vpop.permute.xlu0 %433 }
0x1210   :  { %438 = vst.msk [vmem:[%s1676_s4 + $0xa] sm:$0x1] %vm173_vm14, %v434_v24 }
0x1212   :  { %v948_v8 = vpop.permute.xlu1 %947 }
0x1213   :  { %v952_v28 = vmul.f32 %v948_v8, %v1469_v34 }
0x1215   :  { %957 = vrot.lane.b32.xlu2 %v952_v28, %s1246_s26 }
0x1217   :  { %v694_v0 = vpop.permute.xlu0 %693 }
0x1218   :  { %699 = vst.msk [vmem:[%s1676_s4 + $0x4] sm:$0x1] %vm173_vm14, %v694_v0 }
0x121a   :  { %v303_v37 = vpop.permute.xlu1 %302 }
0x121b   :  { %307 = vst.msk [vmem:[%s1676_s4 + $0x9] sm:$0x1] %vm173_vm14, %v303_v37 }
0x121d   :  { %1098 = vrot.lane.b32.xlu2 %v1097_v38, %s1246_s26 }
0x121f   :  { %v827_v34 = vpop.permute.xlu0 %826 }
0x1220   :  { %831 = vst.msk [vmem:[%s1676_s4 + $0xd] sm:$0x1] %vm173_vm14, %v827_v34 }
0x1222   :  { %v563_v39 = vpop.permute.xlu1 %562 }
0x1223   :  { %568 = vst.msk [vmem:[%s1676_s4 + $0x3] sm:$0x1] %vm173_vm14, %v563_v39 }
0x122a   :  { %v696_v40 = vpop.permute.xlu1 %695 }
0x122b   :  { %700 = vst.msk [vmem:[%s1676_s4 + $0xc] sm:$0x1] %vm173_vm14, %v696_v40 }
0x1232   :  { %v956_v41 = vpop.permute.xlu1 %955 }
0x1233   :  { %961 = vst.msk [vmem:[%s1676_s4 + $0x6] sm:$0x1] %vm173_vm14, %v956_v41 }
0x1257   :  { %v432_v42 = vpop.permute.xlu2 %431 }
0x1258   :  { %437 = vst.msk [vmem:[%s1676_s4 + $0x2] sm:$0x1] %vm173_vm14, %v432_v42 }
0x125f   :  { %v565_v43 = vpop.permute.xlu2 %564 }
0x1260   :  { %569 = vst.msk [vmem:[%s1676_s4 + $0xb] sm:$0x1] %vm173_vm14, %v565_v43 }
0x1267   :  { %v825_v44 = vpop.permute.xlu2 %824 }
0x1268   :  { %830 = vst.msk [vmem:[%s1676_s4 + $0x5] sm:$0x1] %vm173_vm14, %v825_v44 }
0x126f   :  { %v958_v45 = vpop.permute.xlu2 %957 }
0x1270   :  { %962 = vst.msk [vmem:[%s1676_s4 + $0xe] sm:$0x1] %vm173_vm14, %v958_v45 }
0x1277   :  { %v1099_v46 = vpop.permute.xlu2 %1098 }
0x1278   :  { %1102 = vst.msk [vmem:[#allocation2] sm:$0x3] %vm22_vm0, %v1099_v46  ;;  %v1087_v47 = vpop.permute.xlu0 %1086 }
0x1279   :  { %1092 = vst.msk [vmem:[%s1676_s4 + $0x7] sm:$0x1] %vm173_vm14, %v1087_v47 }
0x127c   :  { %v1089_v49 = vpop.permute.xlu1 %1088 }
0x127d   :  { %1093 = vst.msk [vmem:[%s1676_s4 + $0xf] sm:$0x1] %vm173_vm14, %v1089_v49 }

</bundles_post_ra>
